<compile_context>
chip_gen: v5e
topology: v5e:2x2
jax: 0.10.0
libtpu: 0.0.40
codegen_flags: <defaults>
</compile_context>

<pallas_src>
import functools

import jax
import jax.numpy as jnp
import numpy as np
from jax.experimental import pallas as pl
from jax.experimental.pallas import tpu as pltpu


# ----------------------------------------------------------------------------
# Fused Pallas kernel (one batch block of B images per grid step)
# ----------------------------------------------------------------------------
def _sphere_attn_kernel(x_ref, w1_ref, b1_ref, wfc1_ref, wfc2_ref,
                        wsa_ref, bsa_ref, y_ref, *, H, W):
    B = x_ref.shape[0]
    HW = H * W
    P = W + 1                                  # lane zero-padding of the input

    taps = [(dh, dw) for dh in (-1, 0, 1) for dw in (-1, 0, 1)]

    # --- boundary masks for the dw = +/-1 taps, built ONCE (hoisted) ---------
    col = jax.lax.broadcasted_iota(jnp.int32, (1, HW), 1) % W
    mask_l = jnp.where(col >= 1, 1.0, 0.0)          # valid when reading w-1
    mask_r = jnp.where(col <= W - 2, 1.0, 0.0)      # valid when reading w+1
    mask_l_bf = mask_l.astype(jnp.bfloat16)
    mask_r_bf = mask_r.astype(jnp.bfloat16)

    # --- conv1 (3x3, SAME): ONE (Cout, 9*Cin) x (9*Cin, B*HW) MXU matmul -----
    # The 9 shifted bf16 taps are stacked once into a single LHS; the vertical
    # (dh) boundary is handled by the W+1 zero padding of the input slab, the
    # horizontal (dw) boundary by the two precomputed {0,1} masks.
    stacks = []
    for b in range(B):
        xb = x_ref[b]                              # (Cin, HW + 2P)  bf16
        pieces = []
        for (dh, dw) in taps:
            off = dh * W + dw
            sl = xb[:, P + off: P + off + HW]      # (Cin, HW) bf16
            if dw == 1:
                sl = sl * mask_r_bf
            elif dw == -1:
                sl = sl * mask_l_bf
            pieces.append(sl)
        stacks.append(jnp.concatenate(pieces, axis=0))          # (9*Cin, HW)
    lhs = stacks[0] if B == 1 else jnp.concatenate(stacks, axis=1)

    out = jnp.dot(w1_ref[...], lhs, preferred_element_type=jnp.float32)
    out = jnp.maximum(out + b1_ref[...], 0.0)                   # (Cout, B*HW) f32

    zp = jnp.zeros((1, P), jnp.float32)

    # Per-image epilogue: only one image's temporaries live at a time
    # (keeps vreg pressure low when the block grows).
    for b in range(B):
        out_b = out[:, b * HW:(b + 1) * HW]                     # (Cout, HW) f32

        # -- ChannelAttention: gap & gmp as the two columns of one MLP RHS ----
        pooled = jnp.concatenate(
            [jnp.mean(out_b, axis=1, keepdims=True),
             jnp.max(out_b, axis=1, keepdims=True)], axis=1)    # (Cout, 2)
        h = jnp.maximum(
            jnp.dot(wfc1_ref[...], pooled, preferred_element_type=jnp.float32),
            0.0)
        o2 = jnp.dot(wfc2_ref[...], h, preferred_element_type=jnp.float32)
        ca = jax.nn.sigmoid(o2[:, 0:1] + o2[:, 1:2])            # (Cout, 1)
        oc = out_b * ca                                         # (Cout, HW)

        # -- SpatialAttention: 3x3 conv over [avg, max] on the VPU ------------
        # (no VMEM scratch, no zero fill: padded rows are small values)
        avgp = jnp.concatenate(
            [zp, jnp.mean(oc, axis=0, keepdims=True), zp], axis=1)  # (1, HW+2P)
        maxp = jnp.concatenate(
            [zp, jnp.max(oc, axis=0, keepdims=True), zp], axis=1)
        sa = jnp.zeros((1, HW), jnp.float32) + bsa_ref[0]
        for t, (dh, dw) in enumerate(taps):
            off = dh * W + dw
            contrib = (wsa_ref[2 * t] * avgp[:, P + off: P + off + HW]
                       + wsa_ref[2 * t + 1] * maxp[:, P + off: P + off + HW])
            if dw == 1:
                contrib = contrib * mask_r
            elif dw == -1:
                contrib = contrib * mask_l
            sa = sa + contrib
        att = jax.nn.sigmoid(sa)                                # (1, HW)

        # -- gate + final ReLU; bf16 writeback, lane-dense flattened NCHW -----
        y_ref[b] = jnp.maximum(oc * att, 0.0).astype(y_ref.dtype)


# ----------------------------------------------------------------------------
# Helpers / wrapper (layout plumbing only; no im2col, no output transpose)
# ----------------------------------------------------------------------------
def _pick_batch_block(n, cin, cout, hw):
    """Largest divisor of n whose per-step working set stays well inside VMEM.

    Budget is sized for v7x (64 MiB physical, 32 MiB scoped default); v6e/v5e
    (128 MiB) could use a larger budget and batch block.
    """
    budget = 24 * 1024 * 1024
    per_img = (cout * hw * 4              # f32 conv output slab
               + 9 * cin * hw * 2         # bf16 stacked LHS
               + 2 * cout * hw * 4        # epilogue temporaries
               + 2 * 2 * (cin + cout) * hw * 2)   # double-buffered in/out
    max_b = max(1, budget // max(per_img, 1))
    b = 1
    for cand in range(1, n + 1):
        if n % cand == 0 and cand <= max_b:
            b = cand
    return b


@jax.jit
def sphere_attention_block(x_nchw, params):
    w1 = params["w1"]        # (3, 3, Cin, Cout)   HWIO
    b1 = params["b1"]        # (Cout,)
    wfc1 = params["wfc1"]    # (Cout, Cout // 16)
    wfc2 = params["wfc2"]    # (Cout // 16, Cout)
    wsa = params["wsa"]      # (3, 3, 2, 1)        HWIO
    bsa = params["bsa"]      # (1,)

    N, Cin, H, W = x_nchw.shape
    Cout = w1.shape[-1]
    Cr = wfc1.shape[-1]
    HW = H * W
    P = W + 1
    padw = HW + 2 * P

    B_blk = _pick_batch_block(N, Cin, Cout, HW)

    # Flattened NCHW input (channels on sublanes, HW on lanes), zero-padded
    # along HW, cast to bf16 (halves HBM/DMA bytes; matmul accumulates in f32).
    x_pad = jnp.pad(x_nchw.reshape(N, Cin, HW).astype(jnp.bfloat16),
                    ((0, 0), (0, 0), (P, P)))

    # Conv weight as a single (Cout, 9*Cin) bf16 matrix, K index = tap*Cin + c.
    w1c = (jnp.transpose(w1.reshape(9, Cin, Cout), (2, 0, 1))
           .reshape(Cout, 9 * Cin).astype(jnp.bfloat16))
    b1c = b1.reshape(Cout, 1).astype(jnp.float32)
    wfc1t = wfc1.T.astype(jnp.float32)                 # (Cr, Cout)
    wfc2t = wfc2.T.astype(jnp.float32)                 # (Cout, Cr)
    wsa_flat = wsa.reshape(18).astype(jnp.float32)     # (kh, kw, {avg,max})
    bsa_s = bsa.reshape(1).astype(jnp.float32)

    kernel = functools.partial(_sphere_attn_kernel, H=H, W=W)

    grid_spec = pltpu.PrefetchScalarGridSpec(
        num_scalar_prefetch=0,
        grid=(N // B_blk,),
        in_specs=[
            pl.BlockSpec((B_blk, Cin, padw), lambda i: (i, 0, 0)),
            pl.BlockSpec((Cout, 9 * Cin), lambda i: (0, 0)),
            pl.BlockSpec((Cout, 1), lambda i: (0, 0)),
            pl.BlockSpec((Cr, Cout), lambda i: (0, 0)),
            pl.BlockSpec((Cout, Cr), lambda i: (0, 0)),
            pl.BlockSpec(memory_space=pltpu.MemorySpace.SMEM),   # wsa scalars
            pl.BlockSpec(memory_space=pltpu.MemorySpace.SMEM),   # bsa scalar
        ],
        out_specs=pl.BlockSpec((B_blk, Cout, HW), lambda i: (i, 0, 0)),
    )

    y = pl.pallas_call(
        kernel,
        # bf16 writeback (largest HBM transfer halved); accumulation stays f32.
        out_shape=jax.ShapeDtypeStruct((N, Cout, HW), jnp.bfloat16),
        grid_spec=grid_spec,
        compiler_params=pltpu.CompilerParams(
            dimension_semantics=("parallel",),
            vmem_limit_bytes=48 * 1024 * 1024),
    )(x_pad, w1c, b1c, wfc1t, wfc2t, wsa_flat, bsa_s)

    return y.reshape(N, Cout, H, W)                    # already NCHW-ordered


# ----------------------------------------------------------------------------
# Pure-JAX reference (same math, XLA convs, f32) for correctness check
# ----------------------------------------------------------------------------
def _reference(x_nchw, params):
    w1, b1 = params["w1"], params["b1"]
    wfc1, wfc2 = params["wfc1"], params["wfc2"]
    wsa, bsa = params["wsa"], params["bsa"]

    x = jnp.transpose(x_nchw, (0, 2, 3, 1)).astype(jnp.float32)
    dn = ("NHWC", "HWIO", "NHWC")
    out = jax.lax.conv_general_dilated(x, w1, (1, 1), "SAME",
                                       dimension_numbers=dn) + b1
    out = jax.nn.relu(out)

    gap = out.mean(axis=(1, 2))                                  # (N, C)
    gmp = out.max(axis=(1, 2))                                   # (N, C)

    def mlp(v):
        return jax.nn.relu(v @ wfc1) @ wfc2

    ca = jax.nn.sigmoid(mlp(gap) + mlp(gmp))
    out = out * ca[:, None, None, :]

    sa_feat = jnp.stack([out.mean(axis=-1), out.max(axis=-1)], axis=-1)
    sa = jax.lax.conv_general_dilated(sa_feat, wsa, (1, 1), "SAME",
                                      dimension_numbers=dn) + bsa
    out = out * jax.nn.sigmoid(sa)
    out = jax.nn.relu(out)
    return jnp.transpose(out, (0, 3, 1, 2))


# ----------------------------------------------------------------------------
if __name__ == "__main__":
    N, Cin, H, W = 2, 4, 16, 16
    Cout = 32                      # planes (>= 16 so ChannelAttention ratio works)
    Cr = Cout // 16

    key = jax.random.PRNGKey(0)
    kx, k1, k2, k3, k4, k5, k6 = jax.random.split(key, 7)

    params = {
        "w1":   jax.random.normal(k1, (3, 3, Cin, Cout), jnp.float32) * 0.1,
        "b1":   jax.random.normal(k2, (Cout,), jnp.float32) * 0.1,
        "wfc1": jax.random.normal(k3, (Cout, Cr), jnp.float32) * 0.1,
        "wfc2": jax.random.normal(k4, (Cr, Cout), jnp.float32) * 0.1,
        "wsa":  jax.random.normal(k5, (3, 3, 2, 1), jnp.float32) * 0.1,
        "bsa":  jax.random.normal(k6, (1,), jnp.float32) * 0.1,
    }
    x = jax.random.normal(kx, (N, Cin, H, W), jnp.float32)

    out = jax.block_until_ready(sphere_attention_block(x, params))
    ref = jax.block_until_ready(_reference(x, params))

    # bf16 MXU inputs + bf16 writeback with f32 accumulation -> loosened
    # tolerance vs the pure-f32 reference.
    np.testing.assert_allclose(np.asarray(out.astype(jnp.float32)),
                               np.asarray(ref), atol=3e-2, rtol=3e-2)

    assert out.shape == (N, Cout, H, W)
    print("KERNEL_OK")
</pallas_src>

<mosaic_0001>
module attributes {stable_mosaic.version = 11 : i64} {
  func.func @_sphere_attn_kernel(%arg0: i32, %arg1: memref<2x4x290xbf16, #tpu.memory_space<vmem>>, %arg2: memref<32x36xbf16, #tpu.memory_space<vmem>>, %arg3: memref<32x1xf32, #tpu.memory_space<vmem>>, %arg4: memref<2x32xf32, #tpu.memory_space<vmem>>, %arg5: memref<32x2xf32, #tpu.memory_space<vmem>>, %arg6: memref<18xf32, #tpu.memory_space<smem>>, %arg7: memref<1xf32, #tpu.memory_space<smem>>, %arg8: memref<2x32x256xbf16, #tpu.memory_space<vmem>>) attributes {dimension_semantics = [#tpu.dimension_semantics<parallel>], iteration_bounds = array<i64: 1>, scalar_prefetch = 0 : i64, scratch_operands = 0 : i64, tpu.core_type = #tpu.core_type<tc>, window_params = [{transform_indices = @transform_0, window_bounds = array<i64: 2, 4, 290>}, {pipeline_mode = #tpu.pipeline_mode<synchronous>, transform_indices = @transform_1, window_bounds = array<i64: 32, 36>}, {pipeline_mode = #tpu.pipeline_mode<synchronous>, transform_indices = @transform_2, window_bounds = array<i64: 32, 1>}, {pipeline_mode = #tpu.pipeline_mode<synchronous>, transform_indices = @transform_3, window_bounds = array<i64: 2, 32>}, {pipeline_mode = #tpu.pipeline_mode<synchronous>, transform_indices = @transform_4, window_bounds = array<i64: 32, 2>}, {transform_indices = @transform_5, window_bounds = array<i64: 18>}, {transform_indices = @transform_6, window_bounds = array<i64: 1>}, {transform_indices = @transform_7, window_bounds = array<i64: 2, 32, 256>}]} {
    %0 = tpu.iota {dimensions = array<i32: 1>} : vector<1x256xi32>
    %c16_i32 = arith.constant 16 : i32
    %c0_i32 = arith.constant 0 : i32
    %1 = arith.cmpi eq, %c16_i32, %c0_i32 : i32
    %c1_i32 = arith.constant 1 : i32
    %2 = arith.select %1, %c1_i32, %c16_i32 : i32
    %3 = vector.broadcast %2 : i32 to vector<1x256xi32>
    %4 = arith.remsi %0, %3 : vector<1x256xi32>
    %c0_i32_0 = arith.constant 0 : i32
    %5 = vector.broadcast %c0_i32_0 : i32 to vector<1x256xi32>
    %6 = arith.cmpi ne, %4, %5 : vector<1x256xi32>
    %c0_i32_1 = arith.constant 0 : i32
    %7 = vector.broadcast %c0_i32_1 : i32 to vector<1x256xi32>
    %8 = arith.cmpi slt, %4, %7 : vector<1x256xi32>
    %c0_i32_2 = arith.constant 0 : i32
    %9 = arith.cmpi slt, %2, %c0_i32_2 : i32
    %10 = vector.broadcast %9 : i1 to vector<1x256xi1>
    %11 = vector.broadcast %10 : vector<1x256xi1> to vector<1x256xi1>
    %12 = arith.xori %8, %11 : vector<1x256xi1>
    %13 = arith.andi %12, %6 : vector<1x256xi1>
    %14 = vector.broadcast %2 : i32 to vector<1x256xi32>
    %15 = arith.addi %4, %14 : vector<1x256xi32>
    %16 = arith.select %13, %15, %4 : vector<1x256xi1>, vector<1x256xi32>
    %c1_i32_3 = arith.constant 1 : i32
    %17 = vector.broadcast %c1_i32_3 : i32 to vector<1x256xi32>
    %18 = arith.cmpi sge, %16, %17 : vector<1x256xi32>
    %cst = arith.constant 1.000000e+00 : f32
    %cst_4 = arith.constant 0.000000e+00 : f32
    %19 = vector.broadcast %cst : f32 to vector<1x256xf32>
    %20 = vector.broadcast %cst_4 : f32 to vector<1x256xf32>
    %21 = arith.select %18, %19, %20 : vector<1x256xi1>, vector<1x256xf32>
    %c14_i32 = arith.constant 14 : i32
    %22 = vector.broadcast %c14_i32 : i32 to vector<1x256xi32>
    %23 = arith.cmpi sle, %16, %22 : vector<1x256xi32>
    %cst_5 = arith.constant 1.000000e+00 : f32
    %cst_6 = arith.constant 0.000000e+00 : f32
    %24 = vector.broadcast %cst_5 : f32 to vector<1x256xf32>
    %25 = vector.broadcast %cst_6 : f32 to vector<1x256xf32>
    %26 = arith.select %23, %24, %25 : vector<1x256xi1>, vector<1x256xf32>
    %27 = arith.truncf %21 : vector<1x256xf32> to vector<1x256xbf16>
    %28 = arith.truncf %26 : vector<1x256xf32> to vector<1x256xbf16>
    %c0 = arith.constant 0 : index
    %c0_7 = arith.constant 0 : index
    %c0_8 = arith.constant 0 : index
    %29 = vector.load %arg1[%c0, %c0_7, %c0_8] : memref<2x4x290xbf16, #tpu.memory_space<vmem>>, vector<1x4x290xbf16>
    %30 = vector.shape_cast %29 : vector<1x4x290xbf16> to vector<4x290xbf16>
    %31 = vector.extract_strided_slice %30 {offsets = [0, 0], sizes = [4, 256], strides = [1, 1]} : vector<4x290xbf16> to vector<4x256xbf16>
    %32 = vector.broadcast %27 : vector<1x256xbf16> to vector<4x256xbf16>
    %33 = arith.mulf %31, %32 : vector<4x256xbf16>
    %34 = vector.extract_strided_slice %30 {offsets = [0, 1], sizes = [4, 256], strides = [1, 1]} : vector<4x290xbf16> to vector<4x256xbf16>
    %35 = vector.extract_strided_slice %30 {offsets = [0, 2], sizes = [4, 256], strides = [1, 1]} : vector<4x290xbf16> to vector<4x256xbf16>
    %36 = vector.broadcast %28 : vector<1x256xbf16> to vector<4x256xbf16>
    %37 = arith.mulf %35, %36 : vector<4x256xbf16>
    %38 = vector.extract_strided_slice %30 {offsets = [0, 16], sizes = [4, 256], strides = [1, 1]} : vector<4x290xbf16> to vector<4x256xbf16>
    %39 = vector.broadcast %27 : vector<1x256xbf16> to vector<4x256xbf16>
    %40 = arith.mulf %38, %39 : vector<4x256xbf16>
    %41 = vector.extract_strided_slice %30 {offsets = [0, 17], sizes = [4, 256], strides = [1, 1]} : vector<4x290xbf16> to vector<4x256xbf16>
    %42 = vector.extract_strided_slice %30 {offsets = [0, 18], sizes = [4, 256], strides = [1, 1]} : vector<4x290xbf16> to vector<4x256xbf16>
    %43 = vector.broadcast %28 : vector<1x256xbf16> to vector<4x256xbf16>
    %44 = arith.mulf %42, %43 : vector<4x256xbf16>
    %45 = vector.extract_strided_slice %30 {offsets = [0, 32], sizes = [4, 256], strides = [1, 1]} : vector<4x290xbf16> to vector<4x256xbf16>
    %46 = vector.broadcast %27 : vector<1x256xbf16> to vector<4x256xbf16>
    %47 = arith.mulf %45, %46 : vector<4x256xbf16>
    %48 = vector.extract_strided_slice %30 {offsets = [0, 33], sizes = [4, 256], strides = [1, 1]} : vector<4x290xbf16> to vector<4x256xbf16>
    %49 = vector.extract_strided_slice %30 {offsets = [0, 34], sizes = [4, 256], strides = [1, 1]} : vector<4x290xbf16> to vector<4x256xbf16>
    %50 = vector.broadcast %28 : vector<1x256xbf16> to vector<4x256xbf16>
    %51 = arith.mulf %49, %50 : vector<4x256xbf16>
    %52 = tpu.concatenate %33, %34, %37, %40, %41, %44, %47, %48, %51 in 0 : vector<4x256xbf16>, vector<4x256xbf16>, vector<4x256xbf16>, vector<4x256xbf16>, vector<4x256xbf16>, vector<4x256xbf16>, vector<4x256xbf16>, vector<4x256xbf16>, vector<4x256xbf16> -> vector<36x256xbf16>
    %c1 = arith.constant 1 : index
    %c0_9 = arith.constant 0 : index
    %c0_10 = arith.constant 0 : index
    %53 = vector.load %arg1[%c1, %c0_9, %c0_10] : memref<2x4x290xbf16, #tpu.memory_space<vmem>>, vector<1x4x290xbf16>
    %54 = vector.shape_cast %53 : vector<1x4x290xbf16> to vector<4x290xbf16>
    %55 = vector.extract_strided_slice %54 {offsets = [0, 0], sizes = [4, 256], strides = [1, 1]} : vector<4x290xbf16> to vector<4x256xbf16>
    %56 = vector.broadcast %27 : vector<1x256xbf16> to vector<4x256xbf16>
    %57 = arith.mulf %55, %56 : vector<4x256xbf16>
    %58 = vector.extract_strided_slice %54 {offsets = [0, 1], sizes = [4, 256], strides = [1, 1]} : vector<4x290xbf16> to vector<4x256xbf16>
    %59 = vector.extract_strided_slice %54 {offsets = [0, 2], sizes = [4, 256], strides = [1, 1]} : vector<4x290xbf16> to vector<4x256xbf16>
    %60 = vector.broadcast %28 : vector<1x256xbf16> to vector<4x256xbf16>
    %61 = arith.mulf %59, %60 : vector<4x256xbf16>
    %62 = vector.extract_strided_slice %54 {offsets = [0, 16], sizes = [4, 256], strides = [1, 1]} : vector<4x290xbf16> to vector<4x256xbf16>
    %63 = vector.broadcast %27 : vector<1x256xbf16> to vector<4x256xbf16>
    %64 = arith.mulf %62, %63 : vector<4x256xbf16>
    %65 = vector.extract_strided_slice %54 {offsets = [0, 17], sizes = [4, 256], strides = [1, 1]} : vector<4x290xbf16> to vector<4x256xbf16>
    %66 = vector.extract_strided_slice %54 {offsets = [0, 18], sizes = [4, 256], strides = [1, 1]} : vector<4x290xbf16> to vector<4x256xbf16>
    %67 = vector.broadcast %28 : vector<1x256xbf16> to vector<4x256xbf16>
    %68 = arith.mulf %66, %67 : vector<4x256xbf16>
    %69 = vector.extract_strided_slice %54 {offsets = [0, 32], sizes = [4, 256], strides = [1, 1]} : vector<4x290xbf16> to vector<4x256xbf16>
    %70 = vector.broadcast %27 : vector<1x256xbf16> to vector<4x256xbf16>
    %71 = arith.mulf %69, %70 : vector<4x256xbf16>
    %72 = vector.extract_strided_slice %54 {offsets = [0, 33], sizes = [4, 256], strides = [1, 1]} : vector<4x290xbf16> to vector<4x256xbf16>
    %73 = vector.extract_strided_slice %54 {offsets = [0, 34], sizes = [4, 256], strides = [1, 1]} : vector<4x290xbf16> to vector<4x256xbf16>
    %74 = vector.broadcast %28 : vector<1x256xbf16> to vector<4x256xbf16>
    %75 = arith.mulf %73, %74 : vector<4x256xbf16>
    %76 = tpu.concatenate %57, %58, %61, %64, %65, %68, %71, %72, %75 in 0 : vector<4x256xbf16>, vector<4x256xbf16>, vector<4x256xbf16>, vector<4x256xbf16>, vector<4x256xbf16>, vector<4x256xbf16>, vector<4x256xbf16>, vector<4x256xbf16>, vector<4x256xbf16> -> vector<36x256xbf16>
    %77 = tpu.concatenate %52, %76 in 1 : vector<36x256xbf16>, vector<36x256xbf16> -> vector<36x512xbf16>
    %c0_11 = arith.constant 0 : index
    %c0_12 = arith.constant 0 : index
    %78 = vector.load %arg2[%c0_11, %c0_12] : memref<32x36xbf16, #tpu.memory_space<vmem>>, vector<32x36xbf16>
    %cst_13 = arith.constant dense<0.000000e+00> : vector<32x512xf32>
    %79 = tpu.matmul %78, %77, %cst_13 {dimension_numbers = #tpu.dot_dimension_numbers<[1], [0], [0], [1], [0, 0, 1, 1], [], []>} : vector<32x36xbf16>, vector<36x512xbf16>, vector<32x512xf32> -> vector<32x512xf32>
    %c0_14 = arith.constant 0 : index
    %c0_15 = arith.constant 0 : index
    %80 = vector.load %arg3[%c0_14, %c0_15] : memref<32x1xf32, #tpu.memory_space<vmem>>, vector<32x1xf32>
    %81 = vector.broadcast %80 : vector<32x1xf32> to vector<32x512xf32>
    %82 = arith.addf %79, %81 : vector<32x512xf32>
    %cst_16 = arith.constant 0.000000e+00 : f32
    %83 = vector.broadcast %cst_16 : f32 to vector<32x512xf32>
    %84 = arith.maximumf %82, %83 : vector<32x512xf32>
    %cst_17 = arith.constant 0.000000e+00 : f32
    %85 = vector.broadcast %cst_17 : f32 to vector<1x17xf32>
    %86 = vector.extract_strided_slice %84 {offsets = [0, 0], sizes = [32, 256], strides = [1, 1]} : vector<32x512xf32> to vector<32x256xf32>
    %cst_18 = arith.constant dense<0.000000e+00> : vector<32xf32>
    %87 = vector.multi_reduction <add>, %86, %cst_18 [1] : vector<32x256xf32> to vector<32xf32>
    %88 = vector.shape_cast %87 : vector<32xf32> to vector<32x1xf32>
    %cst_19 = arith.constant 2.560000e+02 : f32
    %89 = vector.broadcast %cst_19 : f32 to vector<32x1xf32>
    %90 = arith.divf %88, %89 : vector<32x1xf32>
    %cst_20 = arith.constant dense<0xFF800000> : vector<32xf32>
    %91 = vector.multi_reduction <maximumf>, %86, %cst_20 [1] : vector<32x256xf32> to vector<32xf32>
    %92 = vector.shape_cast %91 : vector<32xf32> to vector<32x1xf32>
    %93 = tpu.concatenate %90, %92 in 1 : vector<32x1xf32>, vector<32x1xf32> -> vector<32x2xf32>
    %c0_21 = arith.constant 0 : index
    %c0_22 = arith.constant 0 : index
    %94 = vector.load %arg4[%c0_21, %c0_22] : memref<2x32xf32, #tpu.memory_space<vmem>>, vector<2x32xf32>
    %cst_23 = arith.constant dense<0.000000e+00> : vector<2x2xf32>
    %95 = tpu.matmul %94, %93, %cst_23 {dimension_numbers = #tpu.dot_dimension_numbers<[1], [0], [0], [1], [0, 0, 1, 1], [], []>} : vector<2x32xf32>, vector<32x2xf32>, vector<2x2xf32> -> vector<2x2xf32>
    %cst_24 = arith.constant 0.000000e+00 : f32
    %96 = vector.broadcast %cst_24 : f32 to vector<2x2xf32>
    %97 = arith.maximumf %95, %96 : vector<2x2xf32>
    %c0_25 = arith.constant 0 : index
    %c0_26 = arith.constant 0 : index
    %98 = vector.load %arg5[%c0_25, %c0_26] : memref<32x2xf32, #tpu.memory_space<vmem>>, vector<32x2xf32>
    %cst_27 = arith.constant dense<0.000000e+00> : vector<32x2xf32>
    %99 = tpu.matmul %98, %97, %cst_27 {dimension_numbers = #tpu.dot_dimension_numbers<[1], [0], [0], [1], [0, 0, 1, 1], [], []>} : vector<32x2xf32>, vector<2x2xf32>, vector<32x2xf32> -> vector<32x2xf32>
    %100 = vector.extract_strided_slice %99 {offsets = [0, 0], sizes = [32, 1], strides = [1, 1]} : vector<32x2xf32> to vector<32x1xf32>
    %101 = vector.extract_strided_slice %99 {offsets = [0, 1], sizes = [32, 1], strides = [1, 1]} : vector<32x2xf32> to vector<32x1xf32>
    %102 = arith.addf %100, %101 : vector<32x1xf32>
    %103 = arith.negf %102 : vector<32x1xf32>
    %104 = math.exp %103 : vector<32x1xf32>
    %cst_28 = arith.constant 1.000000e+00 : f32
    %105 = vector.broadcast %cst_28 : f32 to vector<32x1xf32>
    %106 = arith.addf %105, %104 : vector<32x1xf32>
    %107 = arith.divf %105, %106 : vector<32x1xf32>
    %108 = vector.broadcast %107 : vector<32x1xf32> to vector<32x256xf32>
    %109 = arith.mulf %86, %108 : vector<32x256xf32>
    %cst_29 = arith.constant dense<0.000000e+00> : vector<256xf32>
    %110 = vector.multi_reduction <add>, %109, %cst_29 [0] : vector<32x256xf32> to vector<256xf32>
    %111 = vector.shape_cast %110 : vector<256xf32> to vector<1x256xf32>
    %cst_30 = arith.constant 3.200000e+01 : f32
    %112 = vector.broadcast %cst_30 : f32 to vector<1x256xf32>
    %113 = arith.divf %111, %112 : vector<1x256xf32>
    %114 = tpu.concatenate %85, %113, %85 in 1 : vector<1x17xf32>, vector<1x256xf32>, vector<1x17xf32> -> vector<1x290xf32>
    %cst_31 = arith.constant dense<0xFF800000> : vector<256xf32>
    %115 = vector.multi_reduction <maximumf>, %109, %cst_31 [0] : vector<32x256xf32> to vector<256xf32>
    %116 = vector.shape_cast %115 : vector<256xf32> to vector<1x256xf32>
    %117 = tpu.concatenate %85, %116, %85 in 1 : vector<1x17xf32>, vector<1x256xf32>, vector<1x17xf32> -> vector<1x290xf32>
    %cst_32 = arith.constant 0.000000e+00 : f32
    %118 = vector.broadcast %cst_32 : f32 to vector<1x256xf32>
    %c0_33 = arith.constant 0 : index
    %119 = memref.load %arg7[%c0_33] : memref<1xf32, #tpu.memory_space<smem>>
    %120 = vector.broadcast %119 : f32 to vector<1x256xf32>
    %121 = arith.addf %118, %120 : vector<1x256xf32>
    %c0_34 = arith.constant 0 : index
    %122 = memref.load %arg6[%c0_34] : memref<18xf32, #tpu.memory_space<smem>>
    %123 = vector.extract_strided_slice %114 {offsets = [0, 0], sizes = [1, 256], strides = [1, 1]} : vector<1x290xf32> to vector<1x256xf32>
    %124 = vector.broadcast %122 : f32 to vector<1x256xf32>
    %125 = arith.mulf %124, %123 : vector<1x256xf32>
    %c1_35 = arith.constant 1 : index
    %126 = memref.load %arg6[%c1_35] : memref<18xf32, #tpu.memory_space<smem>>
    %127 = vector.extract_strided_slice %117 {offsets = [0, 0], sizes = [1, 256], strides = [1, 1]} : vector<1x290xf32> to vector<1x256xf32>
    %128 = vector.broadcast %126 : f32 to vector<1x256xf32>
    %129 = arith.mulf %128, %127 : vector<1x256xf32>
    %130 = arith.addf %125, %129 : vector<1x256xf32>
    %131 = arith.mulf %130, %21 : vector<1x256xf32>
    %132 = arith.addf %121, %131 : vector<1x256xf32>
    %c2 = arith.constant 2 : index
    %133 = memref.load %arg6[%c2] : memref<18xf32, #tpu.memory_space<smem>>
    %134 = vector.extract_strided_slice %114 {offsets = [0, 1], sizes = [1, 256], strides = [1, 1]} : vector<1x290xf32> to vector<1x256xf32>
    %135 = vector.broadcast %133 : f32 to vector<1x256xf32>
    %136 = arith.mulf %135, %134 : vector<1x256xf32>
    %c3 = arith.constant 3 : index
    %137 = memref.load %arg6[%c3] : memref<18xf32, #tpu.memory_space<smem>>
    %138 = vector.extract_strided_slice %117 {offsets = [0, 1], sizes = [1, 256], strides = [1, 1]} : vector<1x290xf32> to vector<1x256xf32>
    %139 = vector.broadcast %137 : f32 to vector<1x256xf32>
    %140 = arith.mulf %139, %138 : vector<1x256xf32>
    %141 = arith.addf %136, %140 : vector<1x256xf32>
    %142 = arith.addf %132, %141 : vector<1x256xf32>
    %c4 = arith.constant 4 : index
    %143 = memref.load %arg6[%c4] : memref<18xf32, #tpu.memory_space<smem>>
    %144 = vector.extract_strided_slice %114 {offsets = [0, 2], sizes = [1, 256], strides = [1, 1]} : vector<1x290xf32> to vector<1x256xf32>
    %145 = vector.broadcast %143 : f32 to vector<1x256xf32>
    %146 = arith.mulf %145, %144 : vector<1x256xf32>
    %c5 = arith.constant 5 : index
    %147 = memref.load %arg6[%c5] : memref<18xf32, #tpu.memory_space<smem>>
    %148 = vector.extract_strided_slice %117 {offsets = [0, 2], sizes = [1, 256], strides = [1, 1]} : vector<1x290xf32> to vector<1x256xf32>
    %149 = vector.broadcast %147 : f32 to vector<1x256xf32>
    %150 = arith.mulf %149, %148 : vector<1x256xf32>
    %151 = arith.addf %146, %150 : vector<1x256xf32>
    %152 = arith.mulf %151, %26 : vector<1x256xf32>
    %153 = arith.addf %142, %152 : vector<1x256xf32>
    %c6 = arith.constant 6 : index
    %154 = memref.load %arg6[%c6] : memref<18xf32, #tpu.memory_space<smem>>
    %155 = vector.extract_strided_slice %114 {offsets = [0, 16], sizes = [1, 256], strides = [1, 1]} : vector<1x290xf32> to vector<1x256xf32>
    %156 = vector.broadcast %154 : f32 to vector<1x256xf32>
    %157 = arith.mulf %156, %155 : vector<1x256xf32>
    %c7 = arith.constant 7 : index
    %158 = memref.load %arg6[%c7] : memref<18xf32, #tpu.memory_space<smem>>
    %159 = vector.extract_strided_slice %117 {offsets = [0, 16], sizes = [1, 256], strides = [1, 1]} : vector<1x290xf32> to vector<1x256xf32>
    %160 = vector.broadcast %158 : f32 to vector<1x256xf32>
    %161 = arith.mulf %160, %159 : vector<1x256xf32>
    %162 = arith.addf %157, %161 : vector<1x256xf32>
    %163 = arith.mulf %162, %21 : vector<1x256xf32>
    %164 = arith.addf %153, %163 : vector<1x256xf32>
    %c8 = arith.constant 8 : index
    %165 = memref.load %arg6[%c8] : memref<18xf32, #tpu.memory_space<smem>>
    %166 = vector.extract_strided_slice %114 {offsets = [0, 17], sizes = [1, 256], strides = [1, 1]} : vector<1x290xf32> to vector<1x256xf32>
    %167 = vector.broadcast %165 : f32 to vector<1x256xf32>
    %168 = arith.mulf %167, %166 : vector<1x256xf32>
    %c9 = arith.constant 9 : index
    %169 = memref.load %arg6[%c9] : memref<18xf32, #tpu.memory_space<smem>>
    %170 = vector.extract_strided_slice %117 {offsets = [0, 17], sizes = [1, 256], strides = [1, 1]} : vector<1x290xf32> to vector<1x256xf32>
    %171 = vector.broadcast %169 : f32 to vector<1x256xf32>
    %172 = arith.mulf %171, %170 : vector<1x256xf32>
    %173 = arith.addf %168, %172 : vector<1x256xf32>
    %174 = arith.addf %164, %173 : vector<1x256xf32>
    %c10 = arith.constant 10 : index
    %175 = memref.load %arg6[%c10] : memref<18xf32, #tpu.memory_space<smem>>
    %176 = vector.extract_strided_slice %114 {offsets = [0, 18], sizes = [1, 256], strides = [1, 1]} : vector<1x290xf32> to vector<1x256xf32>
    %177 = vector.broadcast %175 : f32 to vector<1x256xf32>
    %178 = arith.mulf %177, %176 : vector<1x256xf32>
    %c11 = arith.constant 11 : index
    %179 = memref.load %arg6[%c11] : memref<18xf32, #tpu.memory_space<smem>>
    %180 = vector.extract_strided_slice %117 {offsets = [0, 18], sizes = [1, 256], strides = [1, 1]} : vector<1x290xf32> to vector<1x256xf32>
    %181 = vector.broadcast %179 : f32 to vector<1x256xf32>
    %182 = arith.mulf %181, %180 : vector<1x256xf32>
    %183 = arith.addf %178, %182 : vector<1x256xf32>
    %184 = arith.mulf %183, %26 : vector<1x256xf32>
    %185 = arith.addf %174, %184 : vector<1x256xf32>
    %c12 = arith.constant 12 : index
    %186 = memref.load %arg6[%c12] : memref<18xf32, #tpu.memory_space<smem>>
    %187 = vector.extract_strided_slice %114 {offsets = [0, 32], sizes = [1, 256], strides = [1, 1]} : vector<1x290xf32> to vector<1x256xf32>
    %188 = vector.broadcast %186 : f32 to vector<1x256xf32>
    %189 = arith.mulf %188, %187 : vector<1x256xf32>
    %c13 = arith.constant 13 : index
    %190 = memref.load %arg6[%c13] : memref<18xf32, #tpu.memory_space<smem>>
    %191 = vector.extract_strided_slice %117 {offsets = [0, 32], sizes = [1, 256], strides = [1, 1]} : vector<1x290xf32> to vector<1x256xf32>
    %192 = vector.broadcast %190 : f32 to vector<1x256xf32>
    %193 = arith.mulf %192, %191 : vector<1x256xf32>
    %194 = arith.addf %189, %193 : vector<1x256xf32>
    %195 = arith.mulf %194, %21 : vector<1x256xf32>
    %196 = arith.addf %185, %195 : vector<1x256xf32>
    %c14 = arith.constant 14 : index
    %197 = memref.load %arg6[%c14] : memref<18xf32, #tpu.memory_space<smem>>
    %198 = vector.extract_strided_slice %114 {offsets = [0, 33], sizes = [1, 256], strides = [1, 1]} : vector<1x290xf32> to vector<1x256xf32>
    %199 = vector.broadcast %197 : f32 to vector<1x256xf32>
    %200 = arith.mulf %199, %198 : vector<1x256xf32>
    %c15 = arith.constant 15 : index
    %201 = memref.load %arg6[%c15] : memref<18xf32, #tpu.memory_space<smem>>
    %202 = vector.extract_strided_slice %117 {offsets = [0, 33], sizes = [1, 256], strides = [1, 1]} : vector<1x290xf32> to vector<1x256xf32>
    %203 = vector.broadcast %201 : f32 to vector<1x256xf32>
    %204 = arith.mulf %203, %202 : vector<1x256xf32>
    %205 = arith.addf %200, %204 : vector<1x256xf32>
    %206 = arith.addf %196, %205 : vector<1x256xf32>
    %c16 = arith.constant 16 : index
    %207 = memref.load %arg6[%c16] : memref<18xf32, #tpu.memory_space<smem>>
    %208 = vector.extract_strided_slice %114 {offsets = [0, 34], sizes = [1, 256], strides = [1, 1]} : vector<1x290xf32> to vector<1x256xf32>
    %209 = vector.broadcast %207 : f32 to vector<1x256xf32>
    %210 = arith.mulf %209, %208 : vector<1x256xf32>
    %c17 = arith.constant 17 : index
    %211 = memref.load %arg6[%c17] : memref<18xf32, #tpu.memory_space<smem>>
    %212 = vector.extract_strided_slice %117 {offsets = [0, 34], sizes = [1, 256], strides = [1, 1]} : vector<1x290xf32> to vector<1x256xf32>
    %213 = vector.broadcast %211 : f32 to vector<1x256xf32>
    %214 = arith.mulf %213, %212 : vector<1x256xf32>
    %215 = arith.addf %210, %214 : vector<1x256xf32>
    %216 = arith.mulf %215, %26 : vector<1x256xf32>
    %217 = arith.addf %206, %216 : vector<1x256xf32>
    %218 = arith.negf %217 : vector<1x256xf32>
    %219 = math.exp %218 : vector<1x256xf32>
    %cst_36 = arith.constant 1.000000e+00 : f32
    %220 = vector.broadcast %cst_36 : f32 to vector<1x256xf32>
    %221 = arith.addf %220, %219 : vector<1x256xf32>
    %222 = arith.divf %220, %221 : vector<1x256xf32>
    %223 = vector.broadcast %222 : vector<1x256xf32> to vector<32x256xf32>
    %224 = arith.mulf %109, %223 : vector<32x256xf32>
    %cst_37 = arith.constant 0.000000e+00 : f32
    %225 = vector.broadcast %cst_37 : f32 to vector<32x256xf32>
    %226 = arith.maximumf %224, %225 : vector<32x256xf32>
    %227 = arith.truncf %226 : vector<32x256xf32> to vector<32x256xbf16>
    %c0_38 = arith.constant 0 : index
    %c0_39 = arith.constant 0 : index
    %c0_40 = arith.constant 0 : index
    %228 = vector.load %arg8[%c0_38, %c0_39, %c0_40] : memref<2x32x256xbf16, #tpu.memory_space<vmem>>, vector<1x32x256xbf16>
    %229 = vector.shape_cast %228 : vector<1x32x256xbf16> to vector<32x256xbf16>
    %230 = vector.shape_cast %227 : vector<32x256xbf16> to vector<1x32x256xbf16>
    tpu.vector_store %arg8[%c0_38, %c0_39, %c0_40], %230 {strides = array<i32>} : memref<2x32x256xbf16, #tpu.memory_space<vmem>>, vector<1x32x256xbf16>,
    %231 = vector.extract_strided_slice %84 {offsets = [0, 256], sizes = [32, 256], strides = [1, 1]} : vector<32x512xf32> to vector<32x256xf32>
    %cst_41 = arith.constant dense<0.000000e+00> : vector<32xf32>
    %232 = vector.multi_reduction <add>, %231, %cst_41 [1] : vector<32x256xf32> to vector<32xf32>
    %233 = vector.shape_cast %232 : vector<32xf32> to vector<32x1xf32>
    %cst_42 = arith.constant 2.560000e+02 : f32
    %234 = vector.broadcast %cst_42 : f32 to vector<32x1xf32>
    %235 = arith.divf %233, %234 : vector<32x1xf32>
    %cst_43 = arith.constant dense<0xFF800000> : vector<32xf32>
    %236 = vector.multi_reduction <maximumf>, %231, %cst_43 [1] : vector<32x256xf32> to vector<32xf32>
    %237 = vector.shape_cast %236 : vector<32xf32> to vector<32x1xf32>
    %238 = tpu.concatenate %235, %237 in 1 : vector<32x1xf32>, vector<32x1xf32> -> vector<32x2xf32>
    %c0_44 = arith.constant 0 : index
    %c0_45 = arith.constant 0 : index
    %239 = vector.load %arg4[%c0_44, %c0_45] : memref<2x32xf32, #tpu.memory_space<vmem>>, vector<2x32xf32>
    %cst_46 = arith.constant dense<0.000000e+00> : vector<2x2xf32>
    %240 = tpu.matmul %239, %238, %cst_46 {dimension_numbers = #tpu.dot_dimension_numbers<[1], [0], [0], [1], [0, 0, 1, 1], [], []>} : vector<2x32xf32>, vector<32x2xf32>, vector<2x2xf32> -> vector<2x2xf32>
    %cst_47 = arith.constant 0.000000e+00 : f32
    %241 = vector.broadcast %cst_47 : f32 to vector<2x2xf32>
    %242 = arith.maximumf %240, %241 : vector<2x2xf32>
    %c0_48 = arith.constant 0 : index
    %c0_49 = arith.constant 0 : index
    %243 = vector.load %arg5[%c0_48, %c0_49] : memref<32x2xf32, #tpu.memory_space<vmem>>, vector<32x2xf32>
    %cst_50 = arith.constant dense<0.000000e+00> : vector<32x2xf32>
    %244 = tpu.matmul %243, %242, %cst_50 {dimension_numbers = #tpu.dot_dimension_numbers<[1], [0], [0], [1], [0, 0, 1, 1], [], []>} : vector<32x2xf32>, vector<2x2xf32>, vector<32x2xf32> -> vector<32x2xf32>
    %245 = vector.extract_strided_slice %244 {offsets = [0, 0], sizes = [32, 1], strides = [1, 1]} : vector<32x2xf32> to vector<32x1xf32>
    %246 = vector.extract_strided_slice %244 {offsets = [0, 1], sizes = [32, 1], strides = [1, 1]} : vector<32x2xf32> to vector<32x1xf32>
    %247 = arith.addf %245, %246 : vector<32x1xf32>
    %248 = arith.negf %247 : vector<32x1xf32>
    %249 = math.exp %248 : vector<32x1xf32>
    %cst_51 = arith.constant 1.000000e+00 : f32
    %250 = vector.broadcast %cst_51 : f32 to vector<32x1xf32>
    %251 = arith.addf %250, %249 : vector<32x1xf32>
    %252 = arith.divf %250, %251 : vector<32x1xf32>
    %253 = vector.broadcast %252 : vector<32x1xf32> to vector<32x256xf32>
    %254 = arith.mulf %231, %253 : vector<32x256xf32>
    %cst_52 = arith.constant dense<0.000000e+00> : vector<256xf32>
    %255 = vector.multi_reduction <add>, %254, %cst_52 [0] : vector<32x256xf32> to vector<256xf32>
    %256 = vector.shape_cast %255 : vector<256xf32> to vector<1x256xf32>
    %cst_53 = arith.constant 3.200000e+01 : f32
    %257 = vector.broadcast %cst_53 : f32 to vector<1x256xf32>
    %258 = arith.divf %256, %257 : vector<1x256xf32>
    %259 = tpu.concatenate %85, %258, %85 in 1 : vector<1x17xf32>, vector<1x256xf32>, vector<1x17xf32> -> vector<1x290xf32>
    %cst_54 = arith.constant dense<0xFF800000> : vector<256xf32>
    %260 = vector.multi_reduction <maximumf>, %254, %cst_54 [0] : vector<32x256xf32> to vector<256xf32>
    %261 = vector.shape_cast %260 : vector<256xf32> to vector<1x256xf32>
    %262 = tpu.concatenate %85, %261, %85 in 1 : vector<1x17xf32>, vector<1x256xf32>, vector<1x17xf32> -> vector<1x290xf32>
    %cst_55 = arith.constant 0.000000e+00 : f32
    %263 = vector.broadcast %cst_55 : f32 to vector<1x256xf32>
    %c0_56 = arith.constant 0 : index
    %264 = memref.load %arg7[%c0_56] : memref<1xf32, #tpu.memory_space<smem>>
    %265 = vector.broadcast %264 : f32 to vector<1x256xf32>
    %266 = arith.addf %263, %265 : vector<1x256xf32>
    %c0_57 = arith.constant 0 : index
    %267 = memref.load %arg6[%c0_57] : memref<18xf32, #tpu.memory_space<smem>>
    %268 = vector.extract_strided_slice %259 {offsets = [0, 0], sizes = [1, 256], strides = [1, 1]} : vector<1x290xf32> to vector<1x256xf32>
    %269 = vector.broadcast %267 : f32 to vector<1x256xf32>
    %270 = arith.mulf %269, %268 : vector<1x256xf32>
    %c1_58 = arith.constant 1 : index
    %271 = memref.load %arg6[%c1_58] : memref<18xf32, #tpu.memory_space<smem>>
    %272 = vector.extract_strided_slice %262 {offsets = [0, 0], sizes = [1, 256], strides = [1, 1]} : vector<1x290xf32> to vector<1x256xf32>
    %273 = vector.broadcast %271 : f32 to vector<1x256xf32>
    %274 = arith.mulf %273, %272 : vector<1x256xf32>
    %275 = arith.addf %270, %274 : vector<1x256xf32>
    %276 = arith.mulf %275, %21 : vector<1x256xf32>
    %277 = arith.addf %266, %276 : vector<1x256xf32>
    %c2_59 = arith.constant 2 : index
    %278 = memref.load %arg6[%c2_59] : memref<18xf32, #tpu.memory_space<smem>>
    %279 = vector.extract_strided_slice %259 {offsets = [0, 1], sizes = [1, 256], strides = [1, 1]} : vector<1x290xf32> to vector<1x256xf32>
    %280 = vector.broadcast %278 : f32 to vector<1x256xf32>
    %281 = arith.mulf %280, %279 : vector<1x256xf32>
    %c3_60 = arith.constant 3 : index
    %282 = memref.load %arg6[%c3_60] : memref<18xf32, #tpu.memory_space<smem>>
    %283 = vector.extract_strided_slice %262 {offsets = [0, 1], sizes = [1, 256], strides = [1, 1]} : vector<1x290xf32> to vector<1x256xf32>
    %284 = vector.broadcast %282 : f32 to vector<1x256xf32>
    %285 = arith.mulf %284, %283 : vector<1x256xf32>
    %286 = arith.addf %281, %285 : vector<1x256xf32>
    %287 = arith.addf %277, %286 : vector<1x256xf32>
    %c4_61 = arith.constant 4 : index
    %288 = memref.load %arg6[%c4_61] : memref<18xf32, #tpu.memory_space<smem>>
    %289 = vector.extract_strided_slice %259 {offsets = [0, 2], sizes = [1, 256], strides = [1, 1]} : vector<1x290xf32> to vector<1x256xf32>
    %290 = vector.broadcast %288 : f32 to vector<1x256xf32>
    %291 = arith.mulf %290, %289 : vector<1x256xf32>
    %c5_62 = arith.constant 5 : index
    %292 = memref.load %arg6[%c5_62] : memref<18xf32, #tpu.memory_space<smem>>
    %293 = vector.extract_strided_slice %262 {offsets = [0, 2], sizes = [1, 256], strides = [1, 1]} : vector<1x290xf32> to vector<1x256xf32>
    %294 = vector.broadcast %292 : f32 to vector<1x256xf32>
    %295 = arith.mulf %294, %293 : vector<1x256xf32>
    %296 = arith.addf %291, %295 : vector<1x256xf32>
    %297 = arith.mulf %296, %26 : vector<1x256xf32>
    %298 = arith.addf %287, %297 : vector<1x256xf32>
    %c6_63 = arith.constant 6 : index
    %299 = memref.load %arg6[%c6_63] : memref<18xf32, #tpu.memory_space<smem>>
    %300 = vector.extract_strided_slice %259 {offsets = [0, 16], sizes = [1, 256], strides = [1, 1]} : vector<1x290xf32> to vector<1x256xf32>
    %301 = vector.broadcast %299 : f32 to vector<1x256xf32>
    %302 = arith.mulf %301, %300 : vector<1x256xf32>
    %c7_64 = arith.constant 7 : index
    %303 = memref.load %arg6[%c7_64] : memref<18xf32, #tpu.memory_space<smem>>
    %304 = vector.extract_strided_slice %262 {offsets = [0, 16], sizes = [1, 256], strides = [1, 1]} : vector<1x290xf32> to vector<1x256xf32>
    %305 = vector.broadcast %303 : f32 to vector<1x256xf32>
    %306 = arith.mulf %305, %304 : vector<1x256xf32>
    %307 = arith.addf %302, %306 : vector<1x256xf32>
    %308 = arith.mulf %307, %21 : vector<1x256xf32>
    %309 = arith.addf %298, %308 : vector<1x256xf32>
    %c8_65 = arith.constant 8 : index
    %310 = memref.load %arg6[%c8_65] : memref<18xf32, #tpu.memory_space<smem>>
    %311 = vector.extract_strided_slice %259 {offsets = [0, 17], sizes = [1, 256], strides = [1, 1]} : vector<1x290xf32> to vector<1x256xf32>
    %312 = vector.broadcast %310 : f32 to vector<1x256xf32>
    %313 = arith.mulf %312, %311 : vector<1x256xf32>
    %c9_66 = arith.constant 9 : index
    %314 = memref.load %arg6[%c9_66] : memref<18xf32, #tpu.memory_space<smem>>
    %315 = vector.extract_strided_slice %262 {offsets = [0, 17], sizes = [1, 256], strides = [1, 1]} : vector<1x290xf32> to vector<1x256xf32>
    %316 = vector.broadcast %314 : f32 to vector<1x256xf32>
    %317 = arith.mulf %316, %315 : vector<1x256xf32>
    %318 = arith.addf %313, %317 : vector<1x256xf32>
    %319 = arith.addf %309, %318 : vector<1x256xf32>
    %c10_67 = arith.constant 10 : index
    %320 = memref.load %arg6[%c10_67] : memref<18xf32, #tpu.memory_space<smem>>
    %321 = vector.extract_strided_slice %259 {offsets = [0, 18], sizes = [1, 256], strides = [1, 1]} : vector<1x290xf32> to vector<1x256xf32>
    %322 = vector.broadcast %320 : f32 to vector<1x256xf32>
    %323 = arith.mulf %322, %321 : vector<1x256xf32>
    %c11_68 = arith.constant 11 : index
    %324 = memref.load %arg6[%c11_68] : memref<18xf32, #tpu.memory_space<smem>>
    %325 = vector.extract_strided_slice %262 {offsets = [0, 18], sizes = [1, 256], strides = [1, 1]} : vector<1x290xf32> to vector<1x256xf32>
    %326 = vector.broadcast %324 : f32 to vector<1x256xf32>
    %327 = arith.mulf %326, %325 : vector<1x256xf32>
    %328 = arith.addf %323, %327 : vector<1x256xf32>
    %329 = arith.mulf %328, %26 : vector<1x256xf32>
    %330 = arith.addf %319, %329 : vector<1x256xf32>
    %c12_69 = arith.constant 12 : index
    %331 = memref.load %arg6[%c12_69] : memref<18xf32, #tpu.memory_space<smem>>
    %332 = vector.extract_strided_slice %259 {offsets = [0, 32], sizes = [1, 256], strides = [1, 1]} : vector<1x290xf32> to vector<1x256xf32>
    %333 = vector.broadcast %331 : f32 to vector<1x256xf32>
    %334 = arith.mulf %333, %332 : vector<1x256xf32>
    %c13_70 = arith.constant 13 : index
    %335 = memref.load %arg6[%c13_70] : memref<18xf32, #tpu.memory_space<smem>>
    %336 = vector.extract_strided_slice %262 {offsets = [0, 32], sizes = [1, 256], strides = [1, 1]} : vector<1x290xf32> to vector<1x256xf32>
    %337 = vector.broadcast %335 : f32 to vector<1x256xf32>
    %338 = arith.mulf %337, %336 : vector<1x256xf32>
    %339 = arith.addf %334, %338 : vector<1x256xf32>
    %340 = arith.mulf %339, %21 : vector<1x256xf32>
    %341 = arith.addf %330, %340 : vector<1x256xf32>
    %c14_71 = arith.constant 14 : index
    %342 = memref.load %arg6[%c14_71] : memref<18xf32, #tpu.memory_space<smem>>
    %343 = vector.extract_strided_slice %259 {offsets = [0, 33], sizes = [1, 256], strides = [1, 1]} : vector<1x290xf32> to vector<1x256xf32>
    %344 = vector.broadcast %342 : f32 to vector<1x256xf32>
    %345 = arith.mulf %344, %343 : vector<1x256xf32>
    %c15_72 = arith.constant 15 : index
    %346 = memref.load %arg6[%c15_72] : memref<18xf32, #tpu.memory_space<smem>>
    %347 = vector.extract_strided_slice %262 {offsets = [0, 33], sizes = [1, 256], strides = [1, 1]} : vector<1x290xf32> to vector<1x256xf32>
    %348 = vector.broadcast %346 : f32 to vector<1x256xf32>
    %349 = arith.mulf %348, %347 : vector<1x256xf32>
    %350 = arith.addf %345, %349 : vector<1x256xf32>
    %351 = arith.addf %341, %350 : vector<1x256xf32>
    %c16_73 = arith.constant 16 : index
    %352 = memref.load %arg6[%c16_73] : memref<18xf32, #tpu.memory_space<smem>>
    %353 = vector.extract_strided_slice %259 {offsets = [0, 34], sizes = [1, 256], strides = [1, 1]} : vector<1x290xf32> to vector<1x256xf32>
    %354 = vector.broadcast %352 : f32 to vector<1x256xf32>
    %355 = arith.mulf %354, %353 : vector<1x256xf32>
    %c17_74 = arith.constant 17 : index
    %356 = memref.load %arg6[%c17_74] : memref<18xf32, #tpu.memory_space<smem>>
    %357 = vector.extract_strided_slice %262 {offsets = [0, 34], sizes = [1, 256], strides = [1, 1]} : vector<1x290xf32> to vector<1x256xf32>
    %358 = vector.broadcast %356 : f32 to vector<1x256xf32>
    %359 = arith.mulf %358, %357 : vector<1x256xf32>
    %360 = arith.addf %355, %359 : vector<1x256xf32>
    %361 = arith.mulf %360, %26 : vector<1x256xf32>
    %362 = arith.addf %351, %361 : vector<1x256xf32>
    %363 = arith.negf %362 : vector<1x256xf32>
    %364 = math.exp %363 : vector<1x256xf32>
    %cst_75 = arith.constant 1.000000e+00 : f32
    %365 = vector.broadcast %cst_75 : f32 to vector<1x256xf32>
    %366 = arith.addf %365, %364 : vector<1x256xf32>
    %367 = arith.divf %365, %366 : vector<1x256xf32>
    %368 = vector.broadcast %367 : vector<1x256xf32> to vector<32x256xf32>
    %369 = arith.mulf %254, %368 : vector<32x256xf32>
    %cst_76 = arith.constant 0.000000e+00 : f32
    %370 = vector.broadcast %cst_76 : f32 to vector<32x256xf32>
    %371 = arith.maximumf %369, %370 : vector<32x256xf32>
    %372 = arith.truncf %371 : vector<32x256xf32> to vector<32x256xbf16>
    %c1_77 = arith.constant 1 : index
    %c0_78 = arith.constant 0 : index
    %c0_79 = arith.constant 0 : index
    %373 = vector.load %arg8[%c1_77, %c0_78, %c0_79] : memref<2x32x256xbf16, #tpu.memory_space<vmem>>, vector<1x32x256xbf16>
    %374 = vector.shape_cast %373 : vector<1x32x256xbf16> to vector<32x256xbf16>
    %375 = vector.shape_cast %372 : vector<32x256xbf16> to vector<1x32x256xbf16>
    tpu.vector_store %arg8[%c1_77, %c0_78, %c0_79], %375 {strides = array<i32>} : memref<2x32x256xbf16, #tpu.memory_space<vmem>>, vector<1x32x256xbf16>,
    return
  }
  func.func @transform_0(%arg0: i32) -> (i32, i32, i32) {
    %c0_i32 = arith.constant 0 : i32
    %c0_i32_0 = arith.constant 0 : i32
    %c0_i32_1 = arith.constant 0 : i32
    return %arg0, %c0_i32, %c0_i32_0 : i32, i32, i32
  }
  func.func @transform_1(%arg0: i32) -> (i32, i32) {
    %c0_i32 = arith.constant 0 : i32
    %c0_i32_0 = arith.constant 0 : i32
    %c0_i32_1 = arith.constant 0 : i32
    return %c0_i32, %c0_i32_0 : i32, i32
  }
  func.func @transform_2(%arg0: i32) -> (i32, i32) {
    %c0_i32 = arith.constant 0 : i32
    %c0_i32_0 = arith.constant 0 : i32
    %c0_i32_1 = arith.constant 0 : i32
    return %c0_i32, %c0_i32_0 : i32, i32
  }
  func.func @transform_3(%arg0: i32) -> (i32, i32) {
    %c0_i32 = arith.constant 0 : i32
    %c0_i32_0 = arith.constant 0 : i32
    %c0_i32_1 = arith.constant 0 : i32
    return %c0_i32, %c0_i32_0 : i32, i32
  }
  func.func @transform_4(%arg0: i32) -> (i32, i32) {
    %c0_i32 = arith.constant 0 : i32
    %c0_i32_0 = arith.constant 0 : i32
    %c0_i32_1 = arith.constant 0 : i32
    return %c0_i32, %c0_i32_0 : i32, i32
  }
  func.func @transform_5(%arg0: i32) -> i32 {
    %c0_i32 = arith.constant 0 : i32
    %c0_i32_0 = arith.constant 0 : i32
    return %c0_i32 : i32
  }
  func.func @transform_6(%arg0: i32) -> i32 {
    %c0_i32 = arith.constant 0 : i32
    %c0_i32_0 = arith.constant 0 : i32
    return %c0_i32 : i32
  }
  func.func @transform_7(%arg0: i32) -> (i32, i32, i32) {
    %c0_i32 = arith.constant 0 : i32
    %c0_i32_0 = arith.constant 0 : i32
    %c0_i32_1 = arith.constant 0 : i32
    return %arg0, %c0_i32, %c0_i32_0 : i32, i32, i32
  }
}

</mosaic_0001>

<bundles_post_ra>
// kernel: sphere_attention_block.1
= control target key start
LH: loop header
LB: loop body
LE: loop exit
PB: predicated region body
PF: predicated region fallthrough
CT: control target
= control target key end

     0   :  { %13 = vsyncpa [#allocation4], 0  ;;  %s2297_s27 = smov [#allocation3]   ;;  %s3708_s0 = inlined_call_operand.vmem [shape: bf16[2,4,290], index: 0, kind: input, shape index: {}]   ;;  %s3709_s1 = inlined_call_operand.vmem [shape: bf16[32,36], index: 1, kind: input, shape index: {}]   ;;  %s3710_s2 = inlined_call_operand.vmem [shape: f32[32,1], index: 2, kind: input, shape index: {}]   ;;  %s3711_s3 = inlined_call_operand.vmem [shape: f32[2,32], index: 3, kind: input, shape index: {}]   ;;  %s3712_s4 = inlined_call_operand.vmem [shape: f32[32,2], index: 4, kind: input, shape index: {}]   ;;  %s3713_s5 = inlined_call_operand.vmem [shape: f32[18], index: 5, kind: input, shape index: {}]   ;;  %s3714_s6 = inlined_call_operand.<no memory space> [shape: f32[1], index: 6, kind: input, shape index: {}]   ;;  %s3715_s7 = inlined_call_operand.vmem [shape: bf16[2,32,256], index: 7, kind: output, shape index: {}]  }
   0x1   :  { %s29_s26 = sshll.u32 %s3713_s5, 4  ;;  %s30_s26 = int_to_ptr.vmem [resolvable:$true] %s29_s26 }
   0x2   :  { %32 = dma.vmem_to_smem %s30_s26, 16, %s2297_s27, [#allocation4]  }
   0x3   :  { %2295 = dma.done.wait [#allocation4], 16  }
   0x4   :  { %2296 = vsyncadd [#allocation4], 4294967280 }
   0x5   :  { %39 = sfence }
   0x6   :  { %v41_v0 = vlaneseq  ;;  %v2362_v4 = vld [vmem:[%s3708_s0] sm:$0x3f]  ;;  %vm85_vm3 = vcmask 1043456   ;;  %v2298_v7 = vmov 0.0   ;;  %s2299_s5 = smov 2   ;;  %s2300_s30 = smov 18  }
   0x7   :  { %v2365_v6 = vunpack.c.l.bf16 %v2362_v4  ;;  %s2301_s8 = smov 34   ;;  %s2302_s9 = smov 16   ;;  %v96_v17 = vunpack.c.h.bf16 %v2362_v4  ;;  %vm106_vm5 = vcmask 15360   ;;  %vm128_vm6 = vcmask 130048  }
   0x8   :  { %v42_v1 = vand.u32 127, %v41_v0  ;;  %s2303_s10 = smov 32   ;;  %vm150_vm7 = vcmask 146432   ;;  %s2304_s11 = smov 126   ;;  %vm172_vm8 = vcmask 261120   ;;  %vm3716_vm9 = vcmask 277504  }
   0x9   :  { %s2305_s12 = smov 110   ;;  %s2306_s13 = smov 96   ;;  %vm3717_vm10 = vcmask 769024   ;;  %vm360_vm11 = vcmask 1041408   ;;  %vm286_vm12 = vcmask 908288   ;;  %vm3720_vm13 = vcmask 900096  }
   0xa   :  { %v43_v2 = vadd.s32 128, %v42_v1  ;;  %v48_v3 = vand.u32 15, %v42_v1  ;;  %s2307_s14 = smov 94   ;;  %s2308_s15 = smov 127   ;;  %vm3719_vm14 = vcmask 785408   ;;  %vm3718_vm15 = vcmask 777216  }
   0xb   :  { %s2309_s18 = smov 111   ;;  %s2311_s19 = smov 112  }
   0xc   :  { %v55_v5 = vand.u32 15, %v43_v2  ;;  %vm72_vm0 = vcmp.le.s32.totalorder %v48_v3, 14  ;;  %vm68_vm1 = vcmp.ge.s32.totalorder %v48_v3, 1  ;;  %s2134_s28 = sld [smem:[#allocation3 + $0xb]] }
   0xd   :  { %v2367_v8 = vsel %vm72_vm0, 1.0, %v2298_v7  ;;  %v2373_v11 = vsel %vm68_vm1, 1.0, %v2298_v7  ;;  %vm371_vm0 = vcmask 1045504   ;;  %vm233_vm1 = vcmask 1039360   ;;  %s2125_s29 = sld [smem:[#allocation3 + $0x2]] }
   0xe   :  { %vm73_vm2 = vcmp.le.s32.totalorder %v55_v5, 14  ;;  %vm69_vm4 = vcmp.ge.s32.totalorder %v55_v5, 1  ;;  %3765 = vst [vmem:[#allocation7_spill] sm:$0xff] %v2373_v11  ;;  %s3007_s16 = sld [smem:[#allocation3 + $0xd]] }
   0xf   :  { %v2369_v9 = vsel %vm73_vm2, 1.0, %v2298_v7  ;;  %v2371_v10 = vsel %vm69_vm4, 1.0, %v2298_v7  ;;  %vm250_vm2 = vcmask 1031168   ;;  %vm270_vm4 = vcmask 916480   ;;  %s3011_s17 = sld [smem:[#allocation3 + $0x8]] }
  0x10   :  { %3764 = vst [vmem:[#allocation6_spill] sm:$0xff] %v2371_v10  ;;  %v101_v12 = vrot.slane %v2369_v9, 4  ;;  %v84_v13 = vrot.slane %v2371_v10, 4  ;;  %s3024_s20 = sld [smem:[#allocation3 + $0xe]] }
  0x11   :  { %s3032_s21 = sld [smem:[#allocation3 + $0x4]] }
  0x12   :  { %v102_v14 = vsel %vm85_vm3, %v2367_v8, %v101_v12  ;;  %v2381_v15 = vsel %vm85_vm3, %v2373_v11, %v84_v13  ;;  %s3048_s22 = sld [smem:[#allocation3 + $0x6]] }
  0x13   :  { %103 = vrot.lane.b32.xlu0 %v102_v14, %s2299_s5  ;;  %v88_v16 = vmul.f32 %v2381_v15, %v2365_v6  ;;  %147 = vrot.lane.b32.xlu1 %v102_v14, %s2300_s30  ;;  %s3052_s23 = sld [smem:[#allocation3 + $0xa]] }
  0x14   :  { %191 = vrot.lane.b32.xlu2 %v102_v14, %s2301_s8  ;;  %s3076_s24 = sld [smem:[#allocation3 + $0xc]] }
  0x15   :  { %90 = vst [vmem:[#allocation1] ss:$2 sm:$0xff] %v88_v16  ;;  %s3108_s25 = sld [smem:[#allocation3 + $0x10]] }
  0x1b   :  { %125 = vrot.lane.b32.xlu0 %v2381_v15, %s2302_s9  ;;  %169 = vrot.lane.b32.xlu1 %v2381_v15, %s2303_s10 }
  0x1c   :  { %v2395_v20 = vld.sshfl [vmem:[#allocation1] sm:$0xff pattern:$0x75316420]  ;;  %v2397_v21 = vld.sshfl [vmem:[#allocation1 + $0x8] sm:$0xff pattern:$0x75316420] }
  0x6e   :  { %v192_v47 = vpop.permute.xlu2 %191 }
  0x6f   :  { %v2445_v50 = vrot.slane %v192_v47, 4 }
  0x71   :  { %v2451_v57 = vsel %vm3716_vm9, %v2445_v50, %v192_v47  ;;  %v199_v60 = vmul.f32 %v2445_v50, %v96_v17  ;;  %vm690_vm9 = vcmask 293888  }
  0x72   :  { %v198_v61 = vmul.f32 %v2451_v57, %v2365_v6 }
  0x85   :  { %v104_v18 = vpop.permute.xlu0 %103  ;;  %v148_v25 = vpop.permute.xlu1 %147 }
  0x86   :  { %v2393_v19 = vrot.slane %v104_v18, 4  ;;  %v2417_v32 = vrot.slane %v148_v25, 4 }
  0x88   :  { %v2401_v22 = vsel %vm106_vm5, %v2393_v19, %v104_v18  ;;  %v111_v23 = vmul.f32 %v2393_v19, %v96_v17  ;;  %v2424_v37 = vsel %vm150_vm7, %v2417_v32, %v148_v25  ;;  %v155_v40 = vmul.f32 %v2417_v32, %v96_v17 }
  0x89   :  { %v110_v24 = vmul.f32 %v2401_v22, %v2365_v6  ;;  %v154_v41 = vmul.f32 %v2424_v37, %v2365_v6 }
  0x8a   :  { %116 = vst [vmem:[#allocation1 + $0x10] ss:$2 sm:$0xff] %v111_v23 }
  0x8b   :  { %114 = vst [vmem:[#allocation1] ss:$2 sm:$0xff] %v110_v24 }
  0x8d   :  { %v126_v26 = vpop.permute.xlu0 %125  ;;  %v170_v38 = vpop.permute.xlu1 %169 }
  0x8e   :  { %v2406_v27 = vrot.slane %v126_v26, 4  ;;  %v2430_v42 = vrot.slane %v170_v38, 4 }
  0x90   :  { %v2410_v28 = vsel %vm128_vm6, %v2406_v27, %v126_v26  ;;  %v133_v29 = vmul.f32 %v2406_v27, %v96_v17  ;;  %v2440_v46 = vsel %vm172_vm8, %v2430_v42, %v170_v38  ;;  %v177_v48 = vmul.f32 %v2430_v42, %v96_v17 }
  0x91   :  { %v2413_v30 = vld.sshfl [vmem:[#allocation1 + $0x10] sm:$0xff pattern:$0x75316420]  ;;  %v132_v31 = vmul.f32 %v2410_v28, %v2365_v6  ;;  %v176_v49 = vmul.f32 %v2440_v46, %v2365_v6 }
  0x92   :  { %v117_v33 = vld.sshfl [vmem:[#allocation1] sm:$0xff pattern:$0x75316420]  ;;  %v118_v34 = vld.sshfl [vmem:[#allocation1 + $0x8] sm:$0xff pattern:$0x75316420] }
  0x93   :  { %136 = vst [vmem:[#allocation1] ss:$2 sm:$0xff] %v132_v31  ;;  %v2419_v35 = vpack.c.bf16 %v118_v34, %v117_v33 }
  0x94   :  { %138 = vst [vmem:[#allocation1 + $0x10] ss:$2 sm:$0xff] %v133_v29 }
  0x95   :  { %v238_v36 = vunpack.c.l.b16 %v2419_v35 }
  0x97   :  { %v241_v39 = vpack.c.b16 %v238_v36, %v238_v36  ;;  %v2475_v36 = vld [vmem:[%s3708_s0 + $0x6] sm:$0x3f]  ;;  %s2310_s0 = smov 95  }
  0x99   :  { %244 = vrot.lane.b32.xlu0 %v241_v39, %s2304_s11  ;;  %v396_v39 = vunpack.c.l.bf16 %v2475_v36 }
  0x9a   :  { %v2432_v43 = vld.sshfl [vmem:[#allocation1] sm:$0xff pattern:$0x75316420]  ;;  %v2434_v44 = vld.sshfl [vmem:[#allocation1 + $0x8] sm:$0xff pattern:$0x75316420] }
  0x9b   :  { %v2436_v45 = vld.sshfl [vmem:[#allocation1 + $0x10] sm:$0xff pattern:$0x75316420]  ;;  %158 = vst [vmem:[#allocation1] ss:$2 sm:$0xff] %v154_v41  ;;  %v397_v41 = vmul.f32 %v396_v39, %v2381_v15 }
  0x9c   :  { %160 = vst [vmem:[#allocation1 + $0x10] ss:$2 sm:$0xff] %v155_v40  ;;  %v405_v40 = vunpack.c.h.bf16 %v2475_v36 }
  0x9e   :  { %v407_v47 = vmul.f32 %v405_v40, %v2393_v19 }
  0xa2   :  { %v161_v51 = vld.sshfl [vmem:[#allocation1] sm:$0xff pattern:$0x75316420]  ;;  %v162_v52 = vld.sshfl [vmem:[#allocation1 + $0x8] sm:$0xff pattern:$0x75316420] }
  0xa3   :  { %v2447_v53 = vld.sshfl [vmem:[#allocation1 + $0x10] sm:$0xff pattern:$0x75316420]  ;;  %180 = vst [vmem:[#allocation1] ss:$2 sm:$0xff] %v176_v49  ;;  %v167_v54 = vpack.c.bf16 %v162_v52, %v161_v51  ;;  %v422_v52 = vmul.f32 %v405_v40, %v2406_v27 }
  0xa4   :  { %182 = vst [vmem:[#allocation1 + $0x10] ss:$2 sm:$0xff] %v177_v48 }
  0xa5   :  { %v292_v55 = vunpack.c.h.b16 %v167_v54  ;;  %v291_v56 = vunpack.c.l.b16 %v167_v54 }
  0xa7   :  { %v295_v58 = vpack.c.b16 %v292_v55, %v292_v55  ;;  %v294_v59 = vpack.c.b16 %v291_v56, %v291_v56  ;;  %v421_v55 = vmul.f32 %v396_v39, %v2410_v28  ;;  %v437_v56 = vmul.f32 %v405_v40, %v2417_v32 }
  0xa8   :  { %v452_v28 = vmul.f32 %v405_v40, %v2430_v42 }
  0xa9   :  { %v298_v62 = vrot.slane %v295_v58, 6  ;;  %v297_v63 = vrot.slane %v294_v59, 6 }
  0xaa   :  { %v183_v0 = vld.sshfl [vmem:[#allocation1] sm:$0xff pattern:$0x75316420]  ;;  %v184_v1 = vld.sshfl [vmem:[#allocation1 + $0x8] sm:$0xff pattern:$0x75316420] }
  0xab   :  { %v2456_v2 = vld.sshfl [vmem:[#allocation1 + $0x10] sm:$0xff pattern:$0x75316420]  ;;  %202 = vst [vmem:[#allocation1] ss:$2 sm:$0xff] %v198_v61  ;;  %302 = vrot.lane.b32.xlu2 %v298_v62, %s2305_s12  ;;  %300 = vrot.lane.b32.xlu1 %v297_v63, %s2305_s12  ;;  %v189_v3 = vpack.c.bf16 %v184_v1, %v183_v0  ;;  %v436_v0 = vmul.f32 %v396_v39, %v2424_v37 }
  0xac   :  { %204 = vst [vmem:[#allocation1 + $0x10] ss:$2 sm:$0xff] %v199_v60 }
  0xad   :  { %v311_v5 = vunpack.c.l.b16 %v189_v3  ;;  %v312_v7 = vunpack.c.h.b16 %v189_v3 }
  0xaf   :  { %v314_v12 = vpack.c.b16 %v311_v5, %v311_v5  ;;  %v315_v6 = vpack.c.b16 %v312_v7, %v312_v7 }
  0xb1   :  { %317 = vrot.lane.b32.xlu0 %v314_v12, %s2306_s13 }
  0xb2   :  { %v205_v13 = vld.sshfl [vmem:[#allocation1] sm:$0xff pattern:$0x75316420]  ;;  %v206_v14 = vld.sshfl [vmem:[#allocation1 + $0x8] sm:$0xff pattern:$0x75316420] }
  0xb3   :  { %v2461_v16 = vld.sshfl [vmem:[#allocation1 + $0x10] sm:$0xff pattern:$0x75316420]  ;;  %319 = vrot.lane.b32.xlu1 %v315_v6, %s2306_s13  ;;  %v211_v17 = vpack.c.bf16 %v206_v14, %v205_v13  ;;  %v451_v14 = vmul.f32 %v396_v39, %v2440_v46 }
  0xb4   :  { %220 = vst [vmem:[#allocation1 + $0x1] ss:$4 sm:$0xff] %v2362_v4 }
  0xb5   :  { %v345_v18 = vunpack.c.l.b16 %v211_v17  ;;  %v346_v23 = vunpack.c.h.b16 %v211_v17 }
  0xb7   :  { %v348_v24 = vpack.c.b16 %v345_v18, %v345_v18  ;;  %v349_v25 = vpack.c.b16 %v346_v23, %v346_v23 }
  0xb9   :  { %351 = vrot.lane.b32.xlu0 %v348_v24, %s2307_s14  ;;  %v467_v24 = vmul.f32 %v405_v40, %v2445_v50 }
  0xbb   :  { %v221_v26 = vld.sshfl [vmem:[#allocation1] sm:$0xff pattern:$0x73625140]  ;;  %v223_v29 = vld.sshfl [vmem:[#allocation1 + $0x8] sm:$0xff pattern:$0x73625140]  ;;  %353 = vrot.lane.b32.xlu1 %v349_v25, %s2307_s14 }
  0xbc   :  { %v2467_v31 = vld.sshfl [vmem:[#allocation1 + $0x10] sm:$0xff pattern:$0x73625140]  ;;  %229 = vrot.lane.b32.xlu2 %v223_v29, %s2308_s15 }
  0xbd   :  { %273 = vst [vmem:[#allocation1] ss:$4 sm:$0xff] %v2362_v4 }
  0xc3   :  { %227 = vrot.lane.b32.xlu1 %v221_v26, %s2308_s15 }
  0xc4   :  { %v274_v33 = vld.sshfl [vmem:[#allocation1] sm:$0xff pattern:$0x73625140]  ;;  %v276_v34 = vld.sshfl [vmem:[#allocation1 + $0x8] sm:$0xff pattern:$0x73625140] }
  0xc5   :  { %v2477_v38 = vld.sshfl [vmem:[#allocation1 + $0x10] sm:$0xff pattern:$0x73625140]  ;;  %280 = vrot.lane.b32.xlu2 %v274_v33, %s2309_s18  ;;  %282 = vrot.lane.b32.xlu0 %v276_v34, %s2309_s18  ;;  %v466_v34 = vmul.f32 %v396_v39, %v2451_v57 }
  0xc6   :  { %327 = vst [vmem:[#allocation1 + $0x3] ss:$4 sm:$0xff] %v2362_v4  ;;  %v406_v4 = vmul.f32 %v396_v39, %v2401_v22 }
  0xcd   :  { %v328_v48 = vld.sshfl [vmem:[#allocation1] sm:$0xff pattern:$0x73625140]  ;;  %v330_v49 = vld.sshfl [vmem:[#allocation1 + $0x8] sm:$0xff pattern:$0x73625140] }
  0xce   :  { %v2486_v51 = vld.sshfl [vmem:[#allocation1 + $0x10] sm:$0xff pattern:$0x73625140]  ;;  %399 = vst [vmem:[#allocation1] ss:$2 sm:$0xff] %v397_v41  ;;  %334 = vrot.lane.b32.xlu2 %v328_v48, %s2310_s0  ;;  %336 = vrot.lane.b32.xlu0 %v330_v49, %s2310_s0 }
  0xcf   :  { %412 = vst [vmem:[#allocation1 + $0x10] ss:$2 sm:$0xff] %v407_v47 }
  0xd5   :  { %v2492_v54 = vld.sshfl [vmem:[#allocation1] sm:$0xff pattern:$0x75316420]  ;;  %v2494_v15 = vld.sshfl [vmem:[#allocation1 + $0x8] sm:$0xff pattern:$0x75316420] }
  0xd6   :  { %410 = vst [vmem:[#allocation1] ss:$2 sm:$0xff] %v406_v4  ;;  %v2496_v19 = vld.sshfl [vmem:[#allocation1 + $0x10] sm:$0xff pattern:$0x75316420] }
  0xd7   :  { %427 = vst [vmem:[#allocation1 + $0x10] ss:$2 sm:$0xff] %v422_v52 }
  0xdd   :  { %v413_v58 = vld.sshfl [vmem:[#allocation1] sm:$0xff pattern:$0x75316420]  ;;  %v414_v59 = vld.sshfl [vmem:[#allocation1 + $0x8] sm:$0xff pattern:$0x75316420] }
  0xde   :  { %425 = vst [vmem:[#allocation1] ss:$2 sm:$0xff] %v421_v55  ;;  %v2500_v60 = vld.sshfl [vmem:[#allocation1 + $0x10] sm:$0xff pattern:$0x75316420]  ;;  %v419_v22 = vpack.c.bf16 %v414_v59, %v413_v58 }
  0xdf   :  { %442 = vst [vmem:[#allocation1 + $0x10] ss:$2 sm:$0xff] %v437_v56 }
  0xe0   :  { %v505_v27 = vunpack.c.l.b16 %v419_v22  ;;  %v506_v61 = vunpack.c.h.b16 %v419_v22 }
  0xe2   :  { %v508_v62 = vpack.c.b16 %v505_v27, %v505_v27  ;;  %v509_v63 = vpack.c.b16 %v506_v61, %v506_v61 }
  0xe4   :  { %511 = vrot.lane.b32.xlu2 %v508_v62, %s2304_s11  ;;  %513 = vrot.lane.b32.xlu0 %v509_v63, %s2304_s11 }
  0xe5   :  { %v428_v32 = vld.sshfl [vmem:[#allocation1] sm:$0xff pattern:$0x75316420]  ;;  %v429_v1 = vld.sshfl [vmem:[#allocation1 + $0x8] sm:$0xff pattern:$0x75316420] }
  0xe6   :  { %440 = vst [vmem:[#allocation1] ss:$2 sm:$0xff] %v436_v0  ;;  %v2506_v3 = vld.sshfl [vmem:[#allocation1 + $0x10] sm:$0xff pattern:$0x75316420]  ;;  %v434_v5 = vpack.c.bf16 %v429_v1, %v428_v32 }
  0xe7   :  { %457 = vst [vmem:[#allocation1 + $0x10] ss:$2 sm:$0xff] %v452_v28  ;;  %v145_v28 = vpack.c.bf16 %v2434_v44, %v2432_v43 }
  0xe8   :  { %v522_v7 = vunpack.c.h.b16 %v434_v5  ;;  %v521_v12 = vunpack.c.l.b16 %v434_v5 }
  0xe9   :  { %v256_v32 = vunpack.c.h.b16 %v145_v28  ;;  %v255_v43 = vunpack.c.l.b16 %v145_v28 }
  0xea   :  { %v525_v6 = vpack.c.b16 %v522_v7, %v522_v7  ;;  %v524_v13 = vpack.c.b16 %v521_v12, %v521_v12 }
  0xeb   :  { %v259_v12 = vpack.c.b16 %v256_v32, %v256_v32 }
  0xec   :  { %v528_v37 = vrot.slane %v525_v6, 2  ;;  %v527_v17 = vrot.slane %v524_v13, 2  ;;  %v450_v6 = vpack.c.bf16 %v2506_v3, %v2506_v3 }
  0xed   :  { %v443_v18 = vld.sshfl [vmem:[#allocation1] sm:$0xff pattern:$0x75316420]  ;;  %v444_v23 = vld.sshfl [vmem:[#allocation1 + $0x8] sm:$0xff pattern:$0x75316420] }
  0xee   :  { %455 = vst [vmem:[#allocation1] ss:$2 sm:$0xff] %v451_v14  ;;  %v2510_v42 = vld.sshfl [vmem:[#allocation1 + $0x10] sm:$0xff pattern:$0x75316420]  ;;  %532 = vrot.lane.b32.xlu2 %v528_v37, %s2311_s19  ;;  %530 = vrot.lane.b32.xlu1 %v527_v17, %s2311_s19  ;;  %v449_v25 = vpack.c.bf16 %v444_v23, %v443_v18  ;;  %v262_v13 = vrot.slane %v259_v12, 2  ;;  %v557_v14 = vunpack.c.l.b16 %v450_v6  ;;  %v258_v18 = vpack.c.b16 %v255_v43, %v255_v43 }
  0xef   :  { %472 = vst [vmem:[#allocation1 + $0x10] ss:$2 sm:$0xff] %v467_v24  ;;  %v239_v23 = vunpack.c.h.b16 %v2419_v35  ;;  %v212_v35 = vpack.c.bf16 %v2461_v16, %v2461_v16 }
  0xf0   :  { %v556_v26 = vunpack.c.h.b16 %v449_v25  ;;  %v555_v29 = vunpack.c.l.b16 %v449_v25  ;;  %v560_v17 = vpack.c.b16 %v557_v14, %v557_v14  ;;  %v261_v3 = vrot.slane %v258_v18, 2 }
  0xf2   :  { %v559_v33 = vpack.c.b16 %v556_v26, %v556_v26  ;;  %v558_v46 = vpack.c.b16 %v555_v29, %v555_v29  ;;  %v563_v24 = vrot.slane %v560_v17, 6  ;;  %v242_v26 = vpack.c.b16 %v239_v23, %v239_v23 }
  0xf3   :  { %v146_v23 = vpack.c.bf16 %v2436_v45, %v2436_v45 }
  0xf4   :  { %v562_v41 = vrot.slane %v559_v33, 6  ;;  %v561_v47 = vrot.slane %v558_v46, 6 }
  0xf5   :  { %v458_v48 = vld.sshfl [vmem:[#allocation1] sm:$0xff pattern:$0x75316420]  ;;  %v459_v50 = vld.sshfl [vmem:[#allocation1 + $0x8] sm:$0xff pattern:$0x75316420] }
  0xf6   :  { %470 = vst [vmem:[#allocation1] ss:$2 sm:$0xff] %v466_v34  ;;  %566 = vrot.lane.b32.xlu1 %v562_v41, %s2305_s12  ;;  %564 = vrot.lane.b32.xlu0 %v561_v47, %s2305_s12  ;;  %v464_v40 = vpack.c.bf16 %v459_v50, %v458_v48  ;;  %v475_v55 = vld.sshfl [vmem:[#allocation1 + $0x10] sm:$0xff pattern:$0x75316420]  ;;  %v465_v48 = vpack.c.bf16 %v2510_v42, %v2510_v42  ;;  %v347_v50 = vunpack.c.l.b16 %v212_v35 }
  0xf7   :  { %v480_v29 = vpack.c.bf16 %v475_v55, %v475_v55 }
  0xf8   :  { %v574_v49 = vunpack.c.l.b16 %v464_v40  ;;  %v575_v4 = vunpack.c.h.b16 %v464_v40  ;;  %v576_v40 = vunpack.c.l.b16 %v465_v48  ;;  %v350_v16 = vpack.c.b16 %v347_v50, %v347_v50 }
  0xf9   :  { %v608_v33 = vunpack.c.l.b16 %v480_v29 }
  0xfa   :  { %v577_v52 = vpack.c.b16 %v574_v49, %v574_v49  ;;  %v578_v56 = vpack.c.b16 %v575_v4, %v575_v4  ;;  %v435_v49 = vpack.c.bf16 %v2500_v60, %v2500_v60  ;;  %v579_v42 = vpack.c.b16 %v576_v40, %v576_v40 }
  0xfb   :  { %v611_v47 = vpack.c.b16 %v608_v33, %v608_v33  ;;  %v420_v60 = vpack.c.bf16 %v2496_v19, %v2496_v19 }
  0xfc   :  { %580 = vrot.lane.b32.xlu2 %v577_v52, %s2306_s13  ;;  %v190_v52 = vpack.c.bf16 %v2456_v2, %v2456_v2 }
  0xfd   :  { %v473_v58 = vld.sshfl [vmem:[#allocation1] sm:$0xff pattern:$0x75316420]  ;;  %v474_v59 = vld.sshfl [vmem:[#allocation1 + $0x8] sm:$0xff pattern:$0x75316420] }
  0xfe   :  { %488 = vst [vmem:[#allocation1 + $0x1] ss:$4 sm:$0xff] %v2475_v36  ;;  %582 = vrot.lane.b32.xlu0 %v578_v56, %s2306_s13  ;;  %v479_v57 = vpack.c.bf16 %v474_v59, %v473_v58  ;;  %v523_v59 = vunpack.c.l.b16 %v435_v49  ;;  %v313_v2 = vunpack.c.l.b16 %v190_v52  ;;  %v2617_v52 = vpack.c.bf16 %v2494_v15, %v2492_v54 }
 0x100   :  { %v606_v39 = vunpack.c.l.b16 %v479_v57  ;;  %v607_v22 = vunpack.c.h.b16 %v479_v57 }
 0x102   :  { %v609_v27 = vpack.c.b16 %v606_v39, %v606_v39  ;;  %v610_v61 = vpack.c.b16 %v607_v22, %v607_v22  ;;  %v526_v22 = vpack.c.b16 %v523_v59, %v523_v59  ;;  %v482_v59 = vunpack.c.l.b16 %v2617_v52 }
 0x104   :  { %612 = vrot.lane.b32.xlu2 %v609_v27, %s2307_s14  ;;  %v507_v27 = vunpack.c.l.b16 %v420_v60  ;;  %v529_v19 = vrot.slane %v526_v22, 2 }
 0x105   :  { %v489_v62 = vld.sshfl [vmem:[#allocation1] sm:$0xff pattern:$0x73625140]  ;;  %v491_v63 = vld.sshfl [vmem:[#allocation1 + $0x8] sm:$0xff pattern:$0x73625140]  ;;  %v2541_v34 = vpop.permute.xlu2 %302 }
 0x106   :  { %v493_v0 = vld.sshfl [vmem:[#allocation1 + $0x10] sm:$0xff pattern:$0x73625140]  ;;  %497 = vrot.lane.b32.xlu1 %v491_v63, %s2308_s15  ;;  %614 = vrot.lane.b32.xlu0 %v610_v61, %s2307_s14  ;;  %v168_v61 = vpack.c.bf16 %v2447_v53, %v2447_v53  ;;  %v124_v63 = vpack.c.bf16 %v2413_v30, %v2413_v30  ;;  %v510_v28 = vpack.c.b16 %v507_v27, %v507_v27 }
 0x107   :  { %538 = vst [vmem:[#allocation1] ss:$4 sm:$0xff] %v2475_v36 }
 0x108   :  { %v293_v32 = vunpack.c.l.b16 %v168_v61 }
 0x10a   :  { %v296_v53 = vpack.c.b16 %v293_v32, %v293_v32 }
 0x10e   :  { %v543_v1 = vld.sshfl [vmem:[#allocation1 + $0x10] sm:$0xff pattern:$0x73625140]  ;;  %v541_v5 = vld.sshfl [vmem:[#allocation1 + $0x8] sm:$0xff pattern:$0x73625140]  ;;  %495 = vrot.lane.b32.xlu0 %v489_v62, %s2308_s15  ;;  %v316_v62 = vpack.c.b16 %v313_v2, %v313_v2 }
 0x10f   :  { %547 = vrot.lane.b32.xlu2 %v541_v5, %s2309_s18  ;;  %v539_v7 = vld.sshfl [vmem:[#allocation1] sm:$0xff pattern:$0x73625140]  ;;  %v240_v5 = vunpack.c.l.b16 %v124_v63 }
 0x110   :  { %545 = vrot.lane.b32.xlu1 %v539_v7, %s2309_s18  ;;  %589 = vst [vmem:[#allocation1 + $0x3] ss:$4 sm:$0xff] %v2475_v36  ;;  %v2536_v36 = vpop.permute.xlu0 %244 }
 0x111   :  { %v243_v30 = vpack.c.b16 %v240_v5, %v240_v5 }
 0x116   :  { %266 = vrot.lane.b32.xlu0 %v262_v13, %s2311_s19  ;;  %v2554_v4 = vpop.permute.xlu2 %229  ;;  %v299_v13 = vrot.slane %v296_v53, 6 }
 0x117   :  { %v592_v44 = vld.sshfl [vmem:[#allocation1 + $0x8] sm:$0xff pattern:$0x73625140]  ;;  %v590_v37 = vld.sshfl [vmem:[#allocation1] sm:$0xff pattern:$0x73625140] }
 0x118   :  { %598 = vrot.lane.b32.xlu2 %v592_v44, %s2310_s0  ;;  %596 = vrot.lane.b32.xlu1 %v590_v37, %s2310_s0  ;;  %v594_v57 = vld.sshfl [vmem:[#allocation1 + $0x10] sm:$0xff pattern:$0x73625140] }
 0x11d   :  { %v301_v25 = vpop.permute.xlu1 %300 }
 0x11e   :  { %568 = vrot.lane.b32.xlu0 %v563_v24, %s2305_s12  ;;  %v307_v12 = vsel %vm3720_vm13, %v301_v25, %v2541_v34  ;;  %v257_v24 = vunpack.c.l.b16 %v146_v23 }
 0x120   :  { %264 = vrot.lane.b32.xlu2 %v261_v3, %s2311_s19  ;;  %246 = vrot.lane.b32.xlu1 %v242_v26, %s2304_s11 }
 0x123   :  { %v318_v46 = vpop.permute.xlu0 %317 }
 0x125   :  { %v2545_v41 = vpop.permute.xlu1 %319 }
 0x126   :  { %499 = vrot.lane.b32.xlu0 %v493_v0, %s2308_s15  ;;  %v281_v0 = vpop.permute.xlu2 %280  ;;  %v324_v43 = vsel %vm3719_vm14, %v318_v46, %v2545_v41 }
 0x128   :  { %549 = vrot.lane.b32.xlu2 %v543_v1, %s2309_s18  ;;  %616 = vrot.lane.b32.xlu1 %v611_v47, %s2307_s14 }
 0x12b   :  { %v352_v55 = vpop.permute.xlu0 %351 }
 0x12d   :  { %v2558_v56 = vpop.permute.xlu1 %353 }
 0x12e   :  { %355 = vrot.lane.b32.xlu0 %v350_v16, %s2307_s14  ;;  %v358_v58 = vsel %vm3717_vm10, %v352_v55, %v2558_v56  ;;  %v335_v14 = vpop.permute.xlu2 %334 }
 0x12f   :  { %v698_v39 = vsel %vm360_vm11, %v358_v58, 0 }
 0x130   :  { %600 = vrot.lane.b32.xlu2 %v594_v57, %s2310_s0  ;;  %584 = vrot.lane.b32.xlu1 %v579_v42, %s2306_s13  ;;  %v484_v57 = vpack.c.b16 %v482_v59, %v482_v59 }
 0x131   :  { %714 = vmatpush.bf16.msra.mxu0 %v698_v39  ;;  %v2626_v39 = vpack.c.bf16 %v2397_v21, %v2395_v20 }
 0x133   :  { %v214_v20 = vunpack.c.l.b16 %v2626_v39 }
 0x135   :  { %v228_v29 = vpop.permute.xlu1 %227  ;;  %v216_v5 = vpack.c.b16 %v214_v20, %v214_v20 }
 0x136   :  { %321 = vrot.lane.b32.xlu0 %v316_v62, %s2306_s13 }
 0x137   :  { %v2573_v1 = vpop.permute.xlu0 %282 }
 0x138   :  { %534 = vrot.lane.b32.xlu2 %v529_v19, %s2311_s19  ;;  %515 = vrot.lane.b32.xlu1 %v510_v28, %s2304_s11  ;;  %v287_v7 = vsel %vm286_vm12, %v281_v0, %v2573_v1 }
 0x139   :  { %v380_v6 = vsel %vm360_vm11, %v287_v7, %v307_v12  ;;  %v234_v7 = vsel %vm233_vm1, %v228_v29, %v2554_v4  ;;  %v2312_v29 = vmov 0  }
 0x13a   :  { %v385_v17 = vsel %vm85_vm3, %v380_v6, %v324_v43  ;;  %v2654_v6 = vld [vmem:[%s3709_s1] sm:$0xff]  ;;  %2204 = vset.pattern.permute.xlu0 %v2312_v29  ;;  %2205 = vset.pattern.permute.xlu1 %v2312_v29 }
 0x13b   :  { %2203 = vset.pattern.permute.xlu2 %v2312_v29 }
 0x13e   :  { %248 = vrot.lane.b32.xlu0 %v243_v30, %s2304_s11  ;;  %v512_v3 = vpop.permute.xlu2 %511 }
 0x140   :  { %304 = vrot.lane.b32.xlu2 %v299_v13, %s2305_s12  ;;  %284 = vrot.lane.b32.xlu1 %v2477_v38, %s2309_s18  ;;  %v2588_v44 = vpop.permute.xlu0 %336  ;;  %v260_v38 = vpack.c.b16 %v257_v24, %v257_v24 }
 0x141   :  { %v341_v37 = vsel %vm3718_vm15, %v335_v14, %v2588_v44  ;;  %v363_v14 = vsel %vm360_vm11, %v216_v5, %v234_v7 }
 0x142   :  { %v389_v18 = vsel %vm371_vm0, %v385_v17, %v341_v37  ;;  %v263_v25 = vrot.slane %v260_v38, 2 }
 0x143   :  { %715 = vmatpush.bf16.msra.mxu0 %v389_v18 }
 0x148   :  { %231 = vrot.lane.b32.xlu2 %v2467_v31, %s2308_s15  ;;  %338 = vrot.lane.b32.xlu1 %v2486_v51, %s2310_s0  ;;  %v2601_v26 = vpop.permute.xlu2 %532 }
 0x150   :  { %268 = vrot.lane.b32.xlu1 %v263_v25, %s2311_s19 }
 0x156   :  { %v2603_v33 = vpop.permute.xlu0 %513  ;;  %v581_v46 = vpop.permute.xlu2 %580 }
 0x157   :  { %v517_v19 = vsel %vm250_vm2, %v512_v3, %v2603_v33 }
 0x15e   :  { %v613_v47 = vpop.permute.xlu2 %612 }
 0x160   :  { %v531_v45 = vpop.permute.xlu1 %530 }
 0x161   :  { %v536_v53 = vsel %vm270_vm4, %v531_v45, %v2601_v26 }
 0x168   :  { %v565_v35 = vpop.permute.xlu0 %564  ;;  %v2605_v48 = vpop.permute.xlu1 %566 }
 0x169   :  { %v2609_v50 = vpop.permute.xlu2 %547  ;;  %v570_v2 = vsel %vm3720_vm13, %v565_v35, %v2605_v48  ;;  %v2677_v35 = vld [vmem:[%s3709_s1 + $0x8] sm:$0xff]  ;;  %s3289_s1 = sld [smem:[#allocation3 + $0x11]] }
 0x170   :  { %v2607_v31 = vpop.permute.xlu0 %582 }
 0x171   :  { %v586_v27 = vsel %vm3719_vm14, %v581_v46, %v2607_v31 }
 0x172   :  { %v2619_v55 = vpop.permute.xlu2 %598 }
 0x178   :  { %v2611_v51 = vpop.permute.xlu1 %497  ;;  %v615_v40 = vpop.permute.xlu0 %614 }
 0x179   :  { %v618_v49 = vsel %vm3717_vm10, %v613_v47, %v615_v40 }
 0x17a   :  { %v704_v16 = vsel %vm360_vm11, %v618_v49, 0  ;;  %v265_v61 = vpop.permute.xlu2 %264 }
 0x17b   :  { %752 = vmatpush.bf16.msra.mxu2 %v704_v16 }
 0x180   :  { %v496_v42 = vpop.permute.xlu0 %495 }
 0x181   :  { %v501_v54 = vsel %vm233_vm1, %v496_v42, %v2611_v51  ;;  %v658_v42 = vld [vmem:[%s3710_s2 + $0x10] sm:$0xff] }
 0x182   :  { %v546_v58 = vpop.permute.xlu1 %545  ;;  %v622_v62 = vsel %vm360_vm11, %v484_v57, %v501_v54  ;;  %v550_v37 = vpop.permute.xlu2 %549  ;;  %672 = vperm.xlu0 %2204, %v658_v42  }
 0x183   :  { %v551_v60 = vsel %vm286_vm12, %v546_v58, %v2609_v50  ;;  %v627_v32 = vsel %vm85_vm3, %v622_v62, %v517_v19  ;;  %v483_v58 = vunpack.c.h.b16 %v2617_v52 }
 0x184   :  { %v638_v15 = vsel %vm360_vm11, %v551_v60, %v570_v2  ;;  %v631_v30 = vsel %vm371_vm0, %v627_v32, %v536_v53 }
 0x185   :  { %v643_v0 = vsel %vm85_vm3, %v638_v15, %v586_v27 }
 0x188   :  { %v2633_v22 = vpop.permute.xlu0 %266 }
 0x189   :  { %v271_v17 = vsel %vm270_vm4, %v265_v61, %v2633_v22 }
 0x18a   :  { %v597_v63 = vpop.permute.xlu1 %596  ;;  %v601_v3 = vpop.permute.xlu2 %600 }
 0x18b   :  { %v602_v21 = vsel %vm3718_vm15, %v597_v63, %v2619_v55  ;;  %v656_v63 = vld [vmem:[%s3710_s2] sm:$0xff] }
 0x18c   :  { %v647_v28 = vsel %vm371_vm0, %v643_v0, %v602_v21 }
 0x18d   :  { %753 = vmatpush.bf16.msra.mxu2 %v647_v28  ;;  %v215_v28 = vunpack.c.h.b16 %v2626_v39 }
 0x190   :  { %v569_v12 = vpop.permute.xlu0 %568 }
 0x191   :  { %754 = vmatpush.bf16.msra.mxu2 %v631_v30  ;;  %v571_v46 = vsel %vm3720_vm13, %v2605_v48, %v569_v12 }
 0x192   :  { %v2656_v13 = vpop.permute.xlu1 %246  ;;  %v535_v57 = vpop.permute.xlu2 %534 }
 0x193   :  { %v251_v43 = vsel %vm250_vm2, %v2536_v36, %v2656_v13  ;;  %v537_v61 = vsel %vm270_vm4, %v2601_v26, %v535_v57 }
 0x194   :  { %2110 = vmatmul.msk.bf16.vlgmr.msra.gmra.mxu2 %vm690_vm9, %v2654_v6  ;;  %v368_v18 = vsel %vm85_vm3, %v363_v14, %v251_v43 }
 0x195   :  { %v373_v23 = vsel %vm371_vm0, %v368_v18, %v271_v17 }
 0x196   :  { %716 = vmatpush.bf16.msra.mxu0 %v373_v23 }
 0x198   :  { %v500_v24 = vpop.permute.xlu0 %499 }
 0x199   :  { %2106 = vmatmul.msk.bf16.vlgmr.msra.gmra.mxu0 %vm690_vm9, %v2654_v6  ;;  %v502_v2 = vsel %vm233_vm1, %v2611_v51, %v500_v24 }
 0x19a   :  { %v617_v38 = vpop.permute.xlu1 %616  ;;  %v305_v20 = vpop.permute.xlu2 %304 }
 0x19b   :  { %v619_v25 = vsel %vm3717_vm10, %v615_v40, %v617_v38  ;;  %v552_v40 = vsel %vm286_vm12, %v2609_v50, %v550_v37  ;;  %v603_v50 = vsel %vm3718_vm15, %v2619_v55, %v601_v3  ;;  %v659_v55 = vld [vmem:[%s3710_s2 + $0x18] sm:$0xff]  ;;  %v308_v0 = vsel %vm3720_vm13, %v2541_v34, %v305_v20 }
 0x19c   :  { %v707_v36 = vsel %vm360_vm11, %v619_v25, 0  ;;  %v641_v48 = vsel %vm360_vm11, %v552_v40, %v571_v46  ;;  %677 = vperm.xlu2 %2203, %v659_v55   ;;  %v217_v34 = vpack.c.b16 %v215_v28, %v215_v28 }
 0x19d   :  { %771 = vmatpush.bf16.msrb.mxu2 %v707_v36  ;;  %2181 = vmatpush.bf16.msra.mxu3 %v707_v36 }
 0x1a0   :  { %v356_v45 = vpop.permute.xlu0 %355 }
 0x1a1   :  { %v359_v47 = vsel %vm3717_vm10, %v2558_v56, %v356_v45  ;;  %v657_v56 = vld [vmem:[%s3710_s2 + $0x8] sm:$0xff]  ;;  %s3009_s2 = sld [smem:[#allocation3 + $0x1]] }
 0x1a2   :  { %v585_v49 = vpop.permute.xlu1 %584  ;;  %v701_v16 = vsel %vm360_vm11, %v359_v47, 0  ;;  %667 = vperm.xlu1 %2205, %v657_v56   ;;  %v232_v30 = vpop.permute.xlu2 %231 }
 0x1a3   :  { %v587_v59 = vsel %vm3719_vm14, %v2607_v31, %v585_v49  ;;  %733 = vmatpush.bf16.msrb.mxu0 %v701_v16  ;;  %2178 = vmatpush.bf16.msra.mxu1 %v701_v16  ;;  %v485_v31 = vpack.c.b16 %v483_v58, %v483_v58  ;;  %v235_v14 = vsel %vm233_vm1, %v2554_v4, %v232_v30 }
 0x1a4   :  { %2111 = vmatmul.msk.bf16.gmra.mxu2 %vm690_vm9, %v2677_v35  ;;  %v645_v60 = vsel %vm85_vm3, %v641_v48, %v587_v59  ;;  %662 = vperm.xlu2 %2203, %v656_v63  }
 0x1a5   :  { %v650_v52 = vsel %vm371_vm0, %v645_v60, %v603_v50  ;;  %v625_v15 = vsel %vm360_vm11, %v485_v31, %v502_v2 }
 0x1a6   :  { %772 = vmatpush.bf16.msrb.mxu2 %v650_v52  ;;  %2182 = vmatpush.bf16.msra.mxu3 %v650_v52 }
 0x1a9   :  { %2107 = vmatmul.msk.bf16.gmra.mxu0 %vm690_vm9, %v2677_v35 }
 0x1aa   :  { %v516_v54 = vpop.permute.xlu1 %515 }
 0x1ab   :  { %v518_v27 = vsel %vm250_vm2, %v2603_v33, %v516_v54  ;;  %v322_v33 = vpop.permute.xlu0 %321 }
 0x1ac   :  { %v629_v62 = vsel %vm85_vm3, %v625_v15, %v518_v27  ;;  %v325_v32 = vsel %vm3719_vm14, %v2545_v41, %v322_v33  ;;  %v366_v41 = vsel %vm360_vm11, %v217_v34, %v235_v14 }
 0x1ad   :  { %v634_v51 = vsel %vm371_vm0, %v629_v62, %v537_v61 }
 0x1ae   :  { %773 = vmatpush.bf16.msrb.mxu2 %v634_v51  ;;  %2183 = vmatpush.bf16.msra.mxu3 %v634_v51 }
 0x1b1   :  { %2113 = vmatmul.msk.bf16.vlgmr.msra.gmra.mxu3 %vm690_vm9, %v2677_v35 }
 0x1b2   :  { %v285_v21 = vpop.permute.xlu1 %284 }
 0x1b3   :  { %v288_v26 = vsel %vm286_vm12, %v2573_v1, %v285_v21  ;;  %v249_v1 = vpop.permute.xlu0 %248 }
 0x1b4   :  { %2112 = vmatmul.msk.bf16.vlgmr.msrb.gmra.mxu2 %vm690_vm9, %v2654_v6  ;;  %v383_v19 = vsel %vm360_vm11, %v288_v26, %v308_v0  ;;  %v252_v39 = vsel %vm250_vm2, %v2656_v13, %v249_v1 }
 0x1b5   :  { %v387_v7 = vsel %vm85_vm3, %v383_v19, %v325_v32  ;;  %v370_v37 = vsel %vm85_vm3, %v366_v41, %v252_v39 }
 0x1ba   :  { %v339_v5 = vpop.permute.xlu1 %338 }
 0x1bb   :  { %v342_v53 = vsel %vm3718_vm15, %v2588_v44, %v339_v5 }
 0x1bc   :  { %v392_v12 = vsel %vm371_vm0, %v387_v7, %v342_v53 }
 0x1bd   :  { %734 = vmatpush.bf16.msrb.mxu0 %v392_v12  ;;  %2179 = vmatpush.bf16.msra.mxu1 %v392_v12 }
 0x1c2   :  { %v269_v43 = vpop.permute.xlu1 %268 }
 0x1c3   :  { %v272_v44 = vsel %vm270_vm4, %v2633_v22, %v269_v43 }
 0x1c4   :  { %v376_v17 = vsel %vm371_vm0, %v370_v37, %v272_v44 }
 0x1c5   :  { %735 = vmatpush.bf16.msrb.mxu0 %v376_v17  ;;  %2180 = vmatpush.bf16.msra.mxu1 %v376_v17 }
 0x1c8   :  { %2108 = vmatmul.msk.bf16.vlgmr.msrb.gmra.mxu0 %vm690_vm9, %v2654_v6  ;;  %2109 = vmatmul.msk.bf16.vlgmr.msra.gmra.mxu1 %vm690_vm9, %v2677_v35  ;;  %vm836_vm9 = vcmask 7168  }
 0x1f4   :  { %v673_v24 = vpop.permute.xlu0 %672 }
 0x1f6   :  { %v678_v29 = vpop.permute.xlu2 %677 }
 0x1fe   :  { %v663_v48 = vpop.permute.xlu2 %662 }
 0x214   :  { %v668_v19 = vpop.permute.xlu1 %667 }
 0x216   :  { %v718_v18 = vpop.f32.mrf.mxu0 }
 0x217   :  { %v756_v4 = vpop.f32.mrf.mxu2  ;;  %v719_v7 = vadd.f32 %v718_v18, %v663_v48 }
 0x218   :  { %v757_v59 = vadd.f32 %v756_v4, %v663_v48 }
 0x219   :  { %v2786_v34 = vmax.f32 %v719_v7, 0.0  ;;  %v1512_v7 = vld [vmem:[%s3711_s3] sm:$0x3] }
 0x21a   :  { %v2762_v2 = vmax.f32 %v757_v59, 0.0 }
 0x21e   :  { %v2746_v38 = vpop.f32.mrf.mxu0 }
 0x21f   :  { %v758_v13 = vpop.f32.mrf.mxu2 }
 0x220   :  { %v759_v30 = vadd.f32 %v758_v13, %v668_v19 }
 0x222   :  { %v2788_v14 = vmax.f32 %v759_v30, 0.0 }
 0x226   :  { %v723_v47 = vpop.f32.mrf.mxu0 }
 0x227   :  { %v761_v23 = vpop.f32.mrf.mxu2  ;;  %v724_v60 = vadd.f32 %v723_v47, %v673_v24 }
 0x228   :  { %v762_v22 = vadd.f32 %v761_v23, %v673_v24  ;;  %v721_v23 = vadd.f32 %v2746_v38, %v668_v19 }
 0x229   :  { %v2764_v55 = vmax.f32 %v724_v60, 0.0 }
 0x22a   :  { %v2748_v3 = vmax.f32 %v762_v22, 0.0  ;;  %v2807_v22 = vmax.f32 %v721_v23, 0.0 }
 0x22e   :  { %v725_v31 = vpop.f32.mrf.mxu0 }
 0x22f   :  { %v763_v46 = vpop.f32.mrf.mxu2  ;;  %v726_v62 = vadd.f32 %v725_v31, %v678_v29 }
 0x230   :  { %v764_v6 = vadd.f32 %v763_v46, %v678_v29 }
 0x231   :  { %v2772_v21 = vmax.f32 %v726_v62, 0.0 }
 0x232   :  { %v2754_v49 = vmax.f32 %v764_v6, 0.0 }
 0x234   :  { %v780_v25 = vpop.f32.mrf.mxu3 }
 0x235   :  { %v781_v36 = vadd.f32 %v780_v25, %v673_v24 }
 0x237   :  { %v2750_v45 = vmax.f32 %v781_v36, 0.0  ;;  %v775_v58 = vpop.f32.mrf.mxu2 }
 0x238   :  { %v776_v56 = vadd.f32 %v775_v58, %v663_v48 }
 0x239   :  { %v1502_v35 = vmax.f32 %v2748_v3, %v2750_v45  ;;  %v1486_v39 = vadd.f32 %v2750_v45, %v2748_v3 }
 0x23a   :  { %v2760_v52 = vmax.f32 %v776_v56, 0.0 }
 0x23b   :  { %1503 = vmax.xlane.f32.xlu1 %v1502_v35 }
 0x23c   :  { %v782_v40 = vpop.f32.mrf.mxu3  ;;  %v1496_v27 = vmax.f32 %v2762_v2, %v2760_v52  ;;  %v1480_v44 = vadd.f32 %v2760_v52, %v2762_v2 }
 0x23d   :  { %v783_v16 = vadd.f32 %v782_v40, %v678_v29 }
 0x23f   :  { %v2756_v42 = vmax.f32 %v783_v16, 0.0  ;;  %v777_v33 = vpop.f32.mrf.mxu2 }
 0x240   :  { %v778_v53 = vadd.f32 %v777_v33, %v668_v19 }
 0x241   :  { %v1489_v50 = vadd.f32 %v2756_v42, %v2754_v49  ;;  %v1505_v0 = vmax.f32 %v2754_v49, %v2756_v42 }
 0x242   :  { %v2784_v1 = vmax.f32 %v778_v53, 0.0 }
 0x243   :  { %1490 = vadd.xlane.f32.xlu1 %v1489_v50 }
 0x244   :  { %v1499_v43 = vmax.f32 %v2788_v14, %v2784_v1  ;;  %v1483_v13 = vadd.f32 %v2784_v1, %v2788_v14 }
 0x245   :  { %v742_v57 = vpop.f32.mrf.mxu1  ;;  %v737_v20 = vpop.f32.mrf.mxu0 }
 0x246   :  { %v743_v54 = vadd.f32 %v742_v57, %v673_v24  ;;  %v738_v28 = vadd.f32 %v737_v20, %v663_v48 }
 0x248   :  { %v2766_v15 = vmax.f32 %v743_v54, 0.0  ;;  %v2782_v12 = vmax.f32 %v738_v28, 0.0 }
 0x24a   :  { %v807_v61 = vadd.f32 %v2766_v15, %v2764_v55  ;;  %v801_v41 = vadd.f32 %v2782_v12, %v2786_v34  ;;  %v830_v37 = vmax.f32 %v2764_v55, %v2766_v15  ;;  %v824_v18 = vmax.f32 %v2786_v34, %v2782_v12 }
 0x24b   :  { %1497 = vmax.xlane.f32.xlu1 %v1496_v27 }
 0x24c   :  { %808 = vadd.xlane.f32.xlu0 %v807_v61 }
 0x24d   :  { %v744_v51 = vpop.f32.mrf.mxu1  ;;  %v739_v17 = vpop.f32.mrf.mxu0 }
 0x24e   :  { %v745_v63 = vadd.f32 %v744_v51, %v678_v29  ;;  %v740_v4 = vadd.f32 %v739_v17, %v668_v19  ;;  %v2313_v29 = vmov 256.0  }
 0x24f   :  { %2231 = vrcp.f32 %v2313_v29 }
 0x250   :  { %v2774_v26 = vmax.f32 %v745_v63, 0.0  ;;  %v2805_v24 = vmax.f32 %v740_v4, 0.0 }
 0x252   :  { %v833_v32 = vmax.f32 %v2772_v21, %v2774_v26  ;;  %v810_v5 = vadd.f32 %v2774_v26, %v2772_v21  ;;  %v804_v25 = vadd.f32 %v2805_v24, %v2807_v22  ;;  %v827_v36 = vmax.f32 %v2807_v22, %v2805_v24 }
 0x254   :  { %834 = vmax.xlane.f32.xlu1 %v833_v32  ;;  %811 = vadd.xlane.f32.xlu2 %v810_v5 }
 0x255   :  { %1506 = vmax.xlane.f32.xlu0 %v1505_v0  ;;  %v2232_v6 = vpop.eup %2231 }
 0x256   :  { %v814_v35 = vmul.f32 256.0, %v2232_v6  ;;  %vm818_vm3 = vweird.f32 %v2232_v6 }
 0x258   :  { %v815_v47 = vsub.f32 1.0, %v814_v35  ;;  %v1539_v35 = vld [vmem:[%s3712_s4 + $0x10] sm:$0xff] }
 0x25a   :  { %v816_v40 = vmul.f32 %v2232_v6, %v815_v47 }
 0x25c   :  { %1487 = vadd.xlane.f32.xlu2 %v1486_v39  ;;  %802 = vadd.xlane.f32.xlu1 %v801_v41  ;;  %v817_v58 = vadd.f32 %v2232_v6, %v816_v40 }
 0x25d   :  { %1500 = vmax.xlane.f32.xlu0 %v1499_v43 }
 0x25e   :  { %v819_v59 = vsel %vm818_vm3, %v2232_v6, %v817_v58  ;;  %v1538_v6 = vld [vmem:[%s3712_s4 + $0x8] sm:$0xff] }
 0x264   :  { %1481 = vadd.xlane.f32.xlu2 %v1480_v44 }
 0x265   :  { %831 = vmax.xlane.f32.xlu0 %v830_v37 }
 0x26c   :  { %1484 = vadd.xlane.f32.xlu2 %v1483_v13  ;;  %v841_v13 = vld [vmem:[%s3711_s3] sm:$0x3]  ;;  %s3148_s3 = sld [smem:[#allocation3]] }
 0x26d   :  { %825 = vmax.xlane.f32.xlu0 %v824_v18 }
 0x274   :  { %805 = vadd.xlane.f32.xlu2 %v804_v25 }
 0x27c   :  { %828 = vmax.xlane.f32.xlu2 %v827_v36  ;;  %v1537_v36 = vld [vmem:[%s3712_s4] sm:$0xff] }
 0x2ae   :  { %v1504_v46 = vpop.xlane.xlu1 %1503 }
 0x2b6   :  { %v1491_v38 = vpop.xlane.xlu1 %1490 }
 0x2b7   :  { %v1495_v56 = vmul.f32 %v1491_v38, %v819_v59  ;;  %v869_v38 = vld [vmem:[%s3712_s4 + $0x18] sm:$0xff]  ;;  %s2315_s4 = smov 17  }
 0x2be   :  { %v1498_v16 = vpop.xlane.xlu1 %1497 }
 0x2bf   :  { %v809_v48 = vpop.xlane.xlu0 %808 }
 0x2c0   :  { %v822_v20 = vmul.f32 %v819_v59, %v809_v48 }
 0x2c7   :  { %v812_v50 = vpop.xlane.xlu2 %811  ;;  %v835_v57 = vpop.xlane.xlu1 %834 }
 0x2c8   :  { %v823_v60 = vmul.f32 %v819_v59, %v812_v50  ;;  %v1507_v31 = vpop.xlane.xlu0 %1506 }
 0x2c9   :  { %v1511_v54 = vsel %vm836_vm9, %v1495_v56, %v1507_v31  ;;  %v2206_v31 = vpack.i.bf16 %v2369_v9, %v2367_v8 }
 0x2ca   :  { %1528 = vmatpush.msra.mxu2 %v1511_v54  ;;  %v840_v27 = vsel %vm836_vm9, %v823_v60, %v835_v57  ;;  %v2211_v60 = vpack.i.bf16 %v2371_v10, %v2373_v11 }
 0x2cb   :  { %857 = vmatpush.msra.mxu0 %v840_v27 }
 0x2cf   :  { %v1488_v61 = vpop.xlane.xlu2 %1487  ;;  %v803_v41 = vpop.xlane.xlu1 %802 }
 0x2d0   :  { %v1494_v62 = vmul.f32 %v1488_v61, %v819_v59  ;;  %v1501_v51 = vpop.xlane.xlu0 %1500  ;;  %v820_v17 = vmul.f32 %v819_v59, %v803_v41 }
 0x2d2   :  { %v1510_v63 = vsel %vm836_vm9, %v1494_v62, %v1504_v46 }
 0x2d3   :  { %1529 = vmatpush.msra.mxu2 %v1510_v63 }
 0x2d7   :  { %v1482_v33 = vpop.xlane.xlu2 %1481 }
 0x2d8   :  { %v832_v0 = vpop.xlane.xlu0 %831  ;;  %v1492_v32 = vmul.f32 %v1482_v33, %v819_v59 }
 0x2d9   :  { %v839_v19 = vsel %vm836_vm9, %v822_v20, %v832_v0 }
 0x2da   :  { %858 = vmatpush.msra.mxu0 %v839_v19  ;;  %v1508_v30 = vsel %vm836_vm9, %v1492_v32, %v1498_v16 }
 0x2df   :  { %v1485_v28 = vpop.xlane.xlu2 %1484 }
 0x2e0   :  { %v1493_v5 = vmul.f32 %v1485_v28, %v819_v59  ;;  %v826_v44 = vpop.xlane.xlu0 %825 }
 0x2e1   :  { %v837_v18 = vsel %vm836_vm9, %v820_v17, %v826_v44 }
 0x2e2   :  { %v1509_v53 = vsel %vm836_vm9, %v1493_v5, %v1501_v51 }
 0x2e3   :  { %1530 = vmatpush.msra.mxu2 %v1509_v53 }
 0x2e5   :  { %1531 = vmatpush.msra.mxu2 %v1508_v30 }
 0x2e6   :  { %2143 = vmatmul.msk.f32.vlgmr.msra.gmra.mxu2 %vm172_vm8, %v1512_v7 }
 0x2e7   :  { %v806_v39 = vpop.xlane.xlu2 %805 }
 0x2e8   :  { %v821_v43 = vmul.f32 %v819_v59, %v806_v39 }
 0x2ef   :  { %v829_v37 = vpop.xlane.xlu2 %828 }
 0x2f0   :  { %v838_v4 = vsel %vm836_vm9, %v821_v43, %v829_v37 }
 0x2f1   :  { %859 = vmatpush.msra.mxu0 %v838_v4 }
 0x2f3   :  { %860 = vmatpush.msra.mxu0 %v837_v18 }
 0x2f4   :  { %2114 = vmatmul.msk.f32.vlgmr.msra.gmra.mxu0 %vm172_vm8, %v841_v13 }
 0x369   :  { %v1533_v23 = vpop.f32.mrf.mxu2 }
 0x36a   :  { %v1536_v25 = vmax.f32 %v1533_v23, 0.0 }
 0x36c   :  { %2144 = vmatpush.msk.msrb.mxu3 %vm360_vm11, %v1536_v25 }
 0x36d   :  { %2145 = vmatmul.msk.f32.vlgmr.msrb.gmra.mxu3 %vm106_vm5, %v1537_v36 }
 0x371   :  { %v862_v29 = vpop.f32.mrf.mxu0 }
 0x372   :  { %v865_v46 = vmax.f32 %v862_v29, 0.0 }
 0x374   :  { %2115 = vmatpush.msk.msrb.mxu1 %vm360_vm11, %v865_v46 }
 0x375   :  { %2116 = vmatmul.msk.f32.vlgmr.msrb.gmra.mxu1 %vm106_vm5, %v1537_v36  ;;  %2146 = vmatmul.msk.f32.gmra.mxu3 %vm106_vm5, %v1538_v6 }
 0x37d   :  { %2117 = vmatmul.msk.f32.gmra.mxu1 %vm106_vm5, %v1538_v6  ;;  %2147 = vmatmul.msk.f32.gmra.mxu3 %vm106_vm5, %v1539_v35 }
 0x385   :  { %2118 = vmatmul.msk.f32.gmra.mxu1 %vm106_vm5, %v1539_v35  ;;  %2148 = vmatmul.msk.f32.gmra.mxu3 %vm106_vm5, %v869_v38 }
 0x38d   :  { %2119 = vmatmul.msk.f32.gmra.mxu1 %vm106_vm5, %v869_v38 }
 0x3f0   :  { %v2851_v47 = vpop.f32.mrf.mxu3 }
 0x3f2   :  { %v902_v40 = vpop.f32.mrf.mxu1 }
 0x3f3   :  { %918 = vrot.lane.b32.xlu1 %v902_v40, %s2308_s15 }
 0x3f8   :  { %v2854_v16 = vpop.f32.mrf.mxu3 }
 0x3fa   :  { %v905_v48 = vpop.f32.mrf.mxu1 }
 0x3fb   :  { %920 = vrot.lane.b32.xlu2 %v905_v48, %s2308_s15 }
 0x400   :  { %v1579_v58 = vpop.f32.mrf.mxu3 }
 0x402   :  { %v908_v59 = vpop.f32.mrf.mxu1 }
 0x403   :  { %1593 = vrot.lane.b32.xlu2 %v1579_v58, %s2308_s15  ;;  %922 = vrot.lane.b32.xlu0 %v908_v59, %s2308_s15 }
 0x408   :  { %v2864_v50 = vpop.f32.mrf.mxu3 }
 0x40a   :  { %v911_v56 = vpop.f32.mrf.mxu1 }
 0x40b   :  { %1591 = vrot.lane.b32.xlu0 %v2854_v16, %s2308_s15  ;;  %924 = vrot.lane.b32.xlu1 %v911_v56, %s2308_s15 }
 0x40c   :  { %2212 = vrot.lane.b32.xlu2 %v2211_v60, %s2302_s9  ;;  %s2128_s9 = sld [smem:[#allocation3 + $0x5]] }
 0x413   :  { %1589 = vrot.lane.b32.xlu1 %v2851_v47, %s2308_s15  ;;  %2207 = vrot.lane.b32.xlu0 %v2206_v31, %s2299_s5  ;;  %s2126_s5 = sld [smem:[#allocation3 + $0x3]] }
 0x414   :  { %2222 = vrot.lane.b32.xlu2 %v2211_v60, %s2303_s10  ;;  %s2130_s10 = sld [smem:[#allocation3 + $0x7]] }
 0x41b   :  { %1595 = vrot.lane.b32.xlu1 %v2864_v50, %s2308_s15  ;;  %2217 = vrot.lane.b32.xlu0 %v2206_v31, %s2300_s30  ;;  %s2132_s30 = sld [smem:[#allocation3 + $0x9]] }
 0x423   :  { %2227 = vrot.lane.b32.xlu0 %v2206_v31, %s2301_s8  ;;  %s2138_s8 = sld [smem:[#allocation3 + $0xf]] }
 0x455   :  { %v921_v57 = vpop.permute.xlu2 %920 }
 0x456   :  { %v931_v54 = vadd.f32 %v921_v57, %v905_v48 }
 0x458   :  { %v2121_v27 = vmul.f32 -1.442695, %v931_v54 }
 0x45a   :  { %2233 = vpow2.f32 %v2121_v27 }
 0x45d   :  { %v1594_v5 = vpop.permute.xlu2 %1593 }
 0x45e   :  { %v1603_v41 = vadd.f32 %v1594_v5, %v1579_v58 }
 0x460   :  { %v2234_v61 = vpop.eup %2233  ;;  %v2151_v17 = vmul.f32 -1.442695, %v1603_v41 }
 0x461   :  { %v947_v62 = vadd.f32 1.0, %v2234_v61 }
 0x463   :  { %2235 = vrcp.f32 %v947_v62  ;;  %v976_v0 = vand.u32 2147483648, %v947_v62  ;;  %v974_v28 = vand.u32 2147483647, %v947_v62  ;;  %vm970_vm0 = vweird.f32 %v947_v62 }
 0x465   :  { %v919_v51 = vpop.permute.xlu1 %918  ;;  %v977_v30 = vor.u32 1.1754944e-38, %v976_v0  ;;  %vm975_vm9 = vcmp.eq.f32.partialorder %v974_v28, 8.507059e+37 }
 0x466   :  { %v930_v63 = vadd.f32 %v919_v51, %v902_v40 }
 0x468   :  { %v2120_v20 = vmul.f32 -1.442695, %v930_v63 }
 0x469   :  { %v2236_v33 = vpop.eup %2235 }
 0x46a   :  { %2237 = vpow2.f32 %v2120_v20  ;;  %v966_v8 = vmul.f32 %v2236_v33, %v947_v62  ;;  %vm971_vm11 = vweird.f32 %v2236_v33 }
 0x46b   :  { %vm972_vm3 = vmor %vm970_vm0, %vm971_vm11 }
 0x46c   :  { %v967_v9 = vsub.f32 1.0, %v966_v8 }
 0x46e   :  { %v968_v19 = vmul.f32 %v2236_v33, %v967_v9 }
 0x470   :  { %v2238_v32 = vpop.eup %2237  ;;  %v969_v53 = vadd.f32 %v2236_v33, %v968_v19 }
 0x471   :  { %v946_v7 = vadd.f32 1.0, %v2238_v32 }
 0x472   :  { %v973_v39 = vsel %vm972_vm3, %v2236_v33, %v969_v53 }
 0x473   :  { %2239 = vrcp.f32 %v946_v7  ;;  %v978_v43 = vsel %vm975_vm9, %v977_v30, %v973_v39  ;;  %v959_v29 = vand.u32 2147483647, %v946_v7  ;;  %v961_v46 = vand.u32 2147483648, %v946_v7 }
 0x474   :  { %1017 = vperm.xlu2 %2203, %v978_v43   ;;  %vm955_vm0 = vweird.f32 %v946_v7 }
 0x475   :  { %v923_v44 = vpop.permute.xlu0 %922  ;;  %v962_v57 = vor.u32 1.1754944e-38, %v961_v46  ;;  %vm960_vm9 = vcmp.eq.f32.partialorder %v959_v29, 8.507059e+37 }
 0x476   :  { %v932_v37 = vadd.f32 %v923_v44, %v908_v59 }
 0x478   :  { %v2122_v4 = vmul.f32 -1.442695, %v932_v37 }
 0x479   :  { %v2240_v13 = vpop.eup %2239 }
 0x47a   :  { %2241 = vpow2.f32 %v2122_v4  ;;  %v951_v18 = vmul.f32 %v2240_v13, %v946_v7  ;;  %vm956_vm11 = vweird.f32 %v2240_v13 }
 0x47b   :  { %2243 = vpow2.f32 %v2151_v17  ;;  %vm957_vm3 = vmor %vm955_vm0, %vm956_vm11 }
 0x47c   :  { %v952_v23 = vsub.f32 1.0, %v951_v18 }
 0x47d   :  { %v1592_v25 = vpop.permute.xlu0 %1591  ;;  %v925_v36 = vpop.permute.xlu1 %924 }
 0x47e   :  { %v1602_v6 = vadd.f32 %v1592_v25, %v2854_v16  ;;  %v933_v35 = vadd.f32 %v925_v36, %v911_v56  ;;  %v953_v38 = vmul.f32 %v2240_v13, %v952_v23 }
 0x480   :  { %v2242_v40 = vpop.eup %2241  ;;  %v2150_v48 = vmul.f32 -1.442695, %v1602_v6  ;;  %v2123_v58 = vmul.f32 -1.442695, %v933_v35  ;;  %v954_v59 = vadd.f32 %v2240_v13, %v953_v38 }
 0x481   :  { %v2244_v60 = vpop.eup %2243  ;;  %v948_v31 = vadd.f32 1.0, %v2242_v40 }
 0x482   :  { %2245 = vpow2.f32 %v2150_v48  ;;  %v958_v54 = vsel %vm957_vm3, %v2240_v13, %v954_v59  ;;  %v2878_v61 = vadd.f32 1.0, %v2244_v60 }
 0x483   :  { %2247 = vrcp.f32 %v948_v31  ;;  %v963_v27 = vsel %vm960_vm9, %v962_v57, %v958_v54  ;;  %v991_v28 = vand.u32 2147483648, %v948_v31  ;;  %v989_v53 = vand.u32 2147483647, %v948_v31 }
 0x484   :  { %2249 = vpow2.f32 %v2123_v58  ;;  %1012 = vperm.xlu0 %2204, %v963_v27   ;;  %vm985_vm0 = vweird.f32 %v948_v31 }
 0x485   :  { %v1590_v16 = vpop.permute.xlu1 %1589  ;;  %2251 = vrcp.f32 %v2878_v61  ;;  %v992_v44 = vor.u32 1.1754944e-38, %v991_v28  ;;  %vm990_vm9 = vcmp.eq.f32.partialorder %v989_v53, 8.507059e+37 }
 0x486   :  { %v1601_v56 = vadd.f32 %v1590_v16, %v2851_v47 }
 0x488   :  { %v2246_v62 = vpop.eup %2245  ;;  %v2149_v51 = vmul.f32 -1.442695, %v1601_v56 }
 0x489   :  { %v2248_v63 = vpop.eup %2247  ;;  %v1618_v20 = vadd.f32 1.0, %v2246_v62 }
 0x48a   :  { %v2250_v33 = vpop.eup %2249  ;;  %2253 = vpow2.f32 %v2149_v51  ;;  %v981_v8 = vmul.f32 %v2248_v63, %v948_v31  ;;  %vm986_vm11 = vweird.f32 %v2248_v63 }
 0x48b   :  { %2255 = vrcp.f32 %v1618_v20  ;;  %v949_v9 = vadd.f32 1.0, %v2250_v33  ;;  %v2882_v32 = vpop.eup %2251  ;;  %vm987_vm3 = vmor %vm985_vm0, %vm986_vm11  ;;  %v1645_v25 = vand.u32 2147483647, %v1618_v20  ;;  %v1647_v36 = vand.u32 2147483648, %v1618_v20 }
 0x48c   :  { %v982_v0 = vsub.f32 1.0, %v981_v8  ;;  %v1652_v37 = vmul.f32 %v2882_v32, %v2878_v61  ;;  %vm1641_vm0 = vweird.f32 %v1618_v20 }
 0x48d   :  { %2257 = vrcp.f32 %v949_v9  ;;  %v1596_v19 = vpop.permute.xlu1 %1595  ;;  %v1006_v35 = vand.u32 2147483648, %v949_v9  ;;  %v1004_v58 = vand.u32 2147483647, %v949_v9  ;;  %v1648_v31 = vor.u32 1.1754944e-38, %v1647_v36  ;;  %v2909_v36 = vpop.permute.xlu2 %2212 }
 0x48e   :  { %v1604_v5 = vadd.f32 %v1596_v19, %v2864_v50  ;;  %v983_v47 = vmul.f32 %v2248_v63, %v982_v0  ;;  %v1653_v29 = vsub.f32 1.0, %v1652_v37  ;;  %vm1000_vm15 = vweird.f32 %v949_v9 }
 0x48f   :  { %v1007_v62 = vor.u32 1.1754944e-38, %v1006_v35  ;;  %vm1005_vm13 = vcmp.eq.f32.partialorder %v1004_v58, 8.507059e+37  ;;  %v1662_v19 = vand.u32 2147483648, %v2878_v61 }
 0x490   :  { %v2254_v7 = vpop.eup %2253  ;;  %v2152_v30 = vmul.f32 -1.442695, %v1604_v5  ;;  %v984_v39 = vadd.f32 %v2248_v63, %v983_v47  ;;  %v1654_v57 = vmul.f32 %v2882_v32, %v1653_v29  ;;  %v1660_v5 = vand.u32 2147483647, %v2878_v61 }
 0x491   :  { %v2256_v41 = vpop.eup %2255  ;;  %v2885_v43 = vadd.f32 1.0, %v2254_v7 }
 0x492   :  { %2259 = vpow2.f32 %v2152_v30  ;;  %v988_v17 = vsel %vm987_vm3, %v2248_v63, %v984_v39  ;;  %v1637_v4 = vmul.f32 %v2256_v41, %v1618_v20  ;;  %vm1642_vm11 = vweird.f32 %v2256_v41 }
 0x493   :  { %v2258_v50 = vpop.eup %2257  ;;  %2261 = vrcp.f32 %v2885_v43  ;;  %v993_v13 = vsel %vm990_vm9, %v992_v44, %v988_v17  ;;  %vm1643_vm10 = vmor %vm1641_vm0, %vm1642_vm11  ;;  %vm1646_vm9 = vcmp.eq.f32.partialorder %v1645_v25, 8.507059e+37  ;;  %vm1657_vm11 = vweird.f32 %v2882_v32  ;;  %v2907_v25 = vpop.permute.xlu0 %2207 }
 0x494   :  { %1022 = vperm.xlu0 %2204, %v993_v13   ;;  %v1638_v18 = vsub.f32 1.0, %v1637_v4  ;;  %v996_v23 = vmul.f32 %v2258_v50, %v949_v9  ;;  %vm1001_vm3 = vweird.f32 %v2258_v50  ;;  %v1632_v33 = vand.u32 2147483648, %v2885_v43 }
 0x495   :  { %vm1002_vm14 = vmor %vm1000_vm15, %vm1001_vm3  ;;  %v1655_v8 = vadd.f32 %v2882_v32, %v1654_v57  ;;  %v1630_v9 = vand.u32 2147483647, %v2885_v43  ;;  %vm1656_vm0 = vweird.f32 %v2878_v61  ;;  %v1663_v44 = vor.u32 1.1754944e-38, %v1662_v19 }
 0x496   :  { %v1639_v46 = vmul.f32 %v2256_v41, %v1638_v18  ;;  %v997_v6 = vsub.f32 1.0, %v996_v23  ;;  %vm2898_vm15 = vmor %vm1656_vm0, %vm1657_vm11  ;;  %v1633_v7 = vor.u32 1.1754944e-38, %v1632_v33 }
 0x497   :  { %v1659_v30 = vsel %vm2898_vm15, %v2882_v32, %v1655_v8  ;;  %vm1631_vm3 = vcmp.eq.f32.partialorder %v1630_v9, 8.507059e+37 }
 0x498   :  { %v2260_v38 = vpop.eup %2259  ;;  %v1640_v40 = vadd.f32 %v2256_v41, %v1639_v46  ;;  %v998_v48 = vmul.f32 %v2258_v50, %v997_v6  ;;  %v2913_v46 = vpop.permute.xlu2 %2222 }
 0x499   :  { %v2262_v59 = vpop.eup %2261  ;;  %v1620_v60 = vadd.f32 1.0, %v2260_v38  ;;  %v2314_v38 = vmov 32.0  }
 0x49a   :  { %v1644_v54 = vsel %vm1643_vm10, %v2256_v41, %v1640_v40  ;;  %v999_v27 = vadd.f32 %v2258_v50, %v998_v48  ;;  %v1622_v16 = vmul.f32 %v2262_v59, %v2885_v43  ;;  %vm1627_vm10 = vweird.f32 %v2262_v59 }
 0x49b   :  { %2263 = vrcp.f32 %v1620_v60  ;;  %v1649_v56 = vsel %vm1646_vm9, %v1648_v31, %v1644_v54  ;;  %vm1661_vm9 = vcmp.eq.f32.partialorder %v1660_v5, 8.507059e+37  ;;  %v1677_v61 = vand.u32 2147483648, %v1620_v60  ;;  %v2911_v29 = vpop.permute.xlu0 %2217 }
 0x49c   :  { %1688 = vperm.xlu0 %2204, %v1649_v56   ;;  %v1003_v51 = vsel %vm1002_vm14, %v2258_v50, %v999_v27  ;;  %v1623_v63 = vsub.f32 1.0, %v1622_v16  ;;  %v1664_v4 = vsel %vm1661_vm9, %v1663_v44, %v1659_v30  ;;  %2265 = vrcp.f32 %v2314_v38 }
 0x49d   :  { %v1008_v20 = vsel %vm1005_vm13, %v1007_v62, %v1003_v51  ;;  %vm1626_vm13 = vweird.f32 %v2885_v43  ;;  %v1675_v43 = vand.u32 2147483647, %v1620_v60  ;;  %v1678_v18 = vor.u32 1.1754944e-38, %v1677_v61 }
 0x49e   :  { %1027 = vperm.xlu2 %2203, %v1008_v20   ;;  %v1624_v0 = vmul.f32 %v2262_v59, %v1623_v63  ;;  %vm1628_vm14 = vmor %vm1626_vm13, %vm1627_vm10  ;;  %vm1671_vm10 = vweird.f32 %v1620_v60  ;;  %vm3833_vm9 = vcmask 777216  }
 0x49f   :  { %vm1676_vm15 = vcmp.eq.f32.partialorder %v1675_v43, 8.507059e+37 }
 0x4a0   :  { %v1625_v47 = vadd.f32 %v2262_v59, %v1624_v0 }
 0x4a1   :  { %v2264_v53 = vpop.eup %2263 }
 0x4a2   :  { %v1629_v39 = vsel %vm1628_vm14, %v2262_v59, %v1625_v47  ;;  %v1667_v41 = vmul.f32 %v2264_v53, %v1620_v60  ;;  %vm1672_vm11 = vweird.f32 %v2264_v53  ;;  %v2266_v58 = vpop.eup %2265  ;;  %vm1071_vm14 = vcmask 138240  }
 0x4a3   :  { %v1634_v37 = vsel %vm1631_vm3, %v1633_v7, %v1629_v39  ;;  %vm1673_vm0 = vmor %vm1671_vm10, %vm1672_vm11  ;;  %v2915_v6 = vpop.permute.xlu0 %2227  ;;  %v1057_v56 = vmul.f32 32.0, %v2266_v58  ;;  %vm1061_vm13 = vweird.f32 %v2266_v58  ;;  %vm3835_vm10 = vcmask 769024  }
 0x4a4   :  { %1683 = vperm.xlu1 %2205, %v1634_v37   ;;  %v1668_v17 = vsub.f32 1.0, %v1667_v41  ;;  %vm3834_vm11 = vmmov %vm3833_vm9 }
 0x4a5   :  { %v1058_v20 = vsub.f32 1.0, %v1057_v56 }
 0x4a6   :  { %1693 = vperm.xlu2 %2203, %v1664_v4   ;;  %v1669_v50 = vmul.f32 %v2264_v53, %v1668_v17 }
 0x4a7   :  { %v1059_v5 = vmul.f32 %v2266_v58, %v1058_v20 }
 0x4a8   :  { %v1670_v13 = vadd.f32 %v2264_v53, %v1669_v50 }
 0x4a9   :  { %v1060_v44 = vadd.f32 %v2266_v58, %v1059_v5 }
 0x4aa   :  { %v1674_v23 = vsel %vm1673_vm0, %v2264_v53, %v1670_v13  ;;  %vm3836_vm0 = vmmov %vm3835_vm10 }
 0x4ab   :  { %v1679_v32 = vsel %vm1676_vm15, %v1678_v18, %v1674_v23 }
 0x4ac   :  { %1698 = vperm.xlu1 %2205, %v1679_v32   ;;  %v1062_v32 = vsel %vm1061_vm13, %v2266_v58, %v1060_v44 }
 0x4ce   :  { %v1018_v35 = vpop.permute.xlu2 %1017 }
 0x4cf   :  { %v2930_v54 = vmul.f32 %v1018_v35, %v2807_v22  ;;  %v2933_v27 = vmul.f32 %v1018_v35, %v2805_v24 }
 0x4d1   :  { %3772 = vst [vmem:[#allocation12_spill] sm:$0xff] %v2930_v54 }
 0x4d2   :  { %3773 = vst [vmem:[#allocation13_spill] sm:$0xff] %v2933_v27 }
 0x4f6   :  { %v1013_v40 = vpop.permute.xlu0 %1012 }
 0x4f7   :  { %v2918_v59 = vmul.f32 %v1013_v40, %v2786_v34  ;;  %v2921_v60 = vmul.f32 %v1013_v40, %v2782_v12 }
 0x4f8   :  { %v1028_v48 = vpop.permute.xlu2 %1027 }
 0x4f9   :  { %3768 = vst [vmem:[#allocation8_spill] sm:$0xff] %v2918_v59  ;;  %v2924_v31 = vmul.f32 %v1028_v48, %v2772_v21  ;;  %v2927_v57 = vmul.f32 %v1028_v48, %v2774_v26  ;;  %v1038_v34 = vadd.f32 %v2930_v54, %v2918_v59  ;;  %v1047_v12 = vadd.f32 %v2933_v27, %v2921_v60 }
 0x4fa   :  { %3769 = vst [vmem:[#allocation9_spill] sm:$0xff] %v2921_v60 }
 0x4fb   :  { %3770 = vst [vmem:[#allocation10_spill] sm:$0xff] %v2924_v31  ;;  %v1079_v22 = vmax.f32 %v2930_v54, %v2924_v31  ;;  %v1088_v24 = vmax.f32 %v2933_v27, %v2927_v57 }
 0x4fc   :  { %3771 = vst [vmem:[#allocation11_spill] sm:$0xff] %v2927_v57 }
 0x500   :  { %v1694_v58 = vpop.permute.xlu2 %1693 }
 0x506   :  { %v1023_v16 = vpop.permute.xlu0 %1022 }
 0x507   :  { %v2940_v21 = vmul.f32 %v1023_v16, %v2764_v55  ;;  %v2943_v26 = vmul.f32 %v1023_v16, %v2766_v15 }
 0x509   :  { %3774 = vst [vmem:[#allocation14_spill] sm:$0xff] %v2940_v21  ;;  %v1039_v62 = vadd.f32 %v1038_v34, %v2940_v21  ;;  %v1048_v51 = vadd.f32 %v1047_v12, %v2943_v26  ;;  %v1078_v63 = vmax.f32 %v2918_v59, %v2940_v21  ;;  %v1087_v55 = vmax.f32 %v2921_v60, %v2943_v26 }
 0x50a   :  { %3775 = vst [vmem:[#allocation15_spill] sm:$0xff] %v2943_v26  ;;  %v3198_v26 = vstv %s3108_s25 }
 0x50b   :  { %v1040_v15 = vadd.f32 %v1039_v62, %v2924_v31  ;;  %v1049_v33 = vadd.f32 %v1048_v51, %v2927_v57  ;;  %v1080_v8 = vmax.f32 %v1078_v63, %v1079_v22  ;;  %v1089_v0 = vmax.f32 %v1087_v55, %v1088_v24 }
 0x50d   :  { %v1041_v9 = vrot.slane %v1040_v15, 4  ;;  %v1050_v19 = vrot.slane %v1049_v33, 4  ;;  %v1081_v28 = vrot.slane %v1080_v8, 4  ;;  %v1090_v47 = vrot.slane %v1089_v0, 4 }
 0x50e   :  { %v1689_v18 = vpop.permute.xlu0 %1688 }
 0x50f   :  { %v1082_v53 = vmax.f32 %v1080_v8, %v1081_v28  ;;  %v1051_v7 = vadd.f32 %v1050_v19, %v1049_v33  ;;  %v1042_v30 = vadd.f32 %v1041_v9, %v1040_v15  ;;  %v1091_v17 = vmax.f32 %v1089_v0, %v1090_v47 }
 0x510   :  { %v2964_v12 = vmul.f32 %v1689_v18, %v2788_v14  ;;  %v2967_v22 = vmul.f32 %v1689_v18, %v2784_v1  ;;  %v2977_v1 = vmul.f32 %v1694_v58, %v2748_v3  ;;  %v2980_v14 = vmul.f32 %v1694_v58, %v2750_v45 }
 0x511   :  { %v1083_v39 = vrot.slane %v1082_v53, 2  ;;  %v1052_v41 = vrot.slane %v1051_v7, 2  ;;  %v1043_v37 = vrot.slane %v1042_v30, 2  ;;  %v1092_v38 = vrot.slane %v1091_v17, 2 }
 0x512   :  { %3778 = vst [vmem:[#allocation18_spill] sm:$0xff] %v2964_v12 }
 0x513   :  { %v1084_v4 = vmax.f32 %v1082_v53, %v1083_v39  ;;  %v1053_v61 = vadd.f32 %v1052_v41, %v1051_v7  ;;  %v1044_v50 = vadd.f32 %v1043_v37, %v1042_v30  ;;  %3779 = vst [vmem:[#allocation19_spill] sm:$0xff] %v2967_v22 }
 0x514   :  { %3780 = vst [vmem:[#allocation20_spill] sm:$0xff] %v2977_v1 }
 0x515   :  { %v1085_v43 = vrot.slane %v1084_v4, 1  ;;  %v1054_v13 = vrot.slane %v1053_v61, 1  ;;  %v1045_v35 = vrot.slane %v1044_v50, 1  ;;  %3781 = vst [vmem:[#allocation21_spill] sm:$0xff] %v2980_v14 }
 0x516   :  { %v1684_v23 = vpop.permute.xlu1 %1683 }
 0x517   :  { %v2958_v40 = vmul.f32 %v1684_v23, %v2762_v2  ;;  %v2961_v48 = vmul.f32 %v1684_v23, %v2760_v52  ;;  %v1086_v16 = vmax.f32 %v1084_v4, %v1085_v43  ;;  %v1055_v56 = vadd.f32 %v1054_v13, %v1053_v61 }
 0x518   :  { %v1046_v34 = vadd.f32 %v1045_v35, %v1044_v50  ;;  %v1093_v2 = vmax.f32 %v1091_v17, %v1092_v38 }
 0x519   :  { %3776 = vst [vmem:[#allocation16_spill] sm:$0xff] %v2958_v40  ;;  %1098 = vrot.lane.b32.xlu2 %v1086_v16, %s2315_s4  ;;  %v1064_v24 = vmul.f32 %v1062_v32, %v1055_v56  ;;  %v1709_v52 = vadd.f32 %v2964_v12, %v2958_v40  ;;  %v1718_v51 = vadd.f32 %v2967_v22, %v2961_v48 }
 0x51a   :  { %3777 = vst [vmem:[#allocation17_spill] sm:$0xff] %v2961_v48  ;;  %v1063_v62 = vmul.f32 %v1062_v32, %v1046_v34  ;;  %v1094_v55 = vrot.slane %v1093_v2, 1  ;;  %v1741_v0 = vmax.f32 %v2958_v40, %v2977_v1  ;;  %v1750_v3 = vmax.f32 %v2961_v48, %v2980_v14 }
 0x51b   :  { %1069 = vrot.lane.b32.xlu0 %v1064_v24, %s2315_s4  ;;  %v1710_v20 = vadd.f32 %v1709_v52, %v2977_v1  ;;  %v1719_v15 = vadd.f32 %v1718_v51, %v2980_v14 }
 0x51c   :  { %1067 = vrot.lane.b32.xlu1 %v1063_v62, %s2315_s4  ;;  %v1095_v28 = vmax.f32 %v1093_v2, %v1094_v55  ;;  %v3020_v55 = vunpack.i.l.bf16 %v2907_v25 }
 0x51e   :  { %v1699_v63 = vpop.permute.xlu1 %1698 }
 0x51f   :  { %v2985_v33 = vmul.f32 %v1699_v63, %v2754_v49  ;;  %v2988_v8 = vmul.f32 %v1699_v63, %v2756_v42  ;;  %v3017_v63 = vunpack.i.h.bf16 %v2907_v25 }
 0x521   :  { %3782 = vst [vmem:[#allocation22_spill] sm:$0xff] %v2985_v33  ;;  %v1711_v45 = vadd.f32 %v1710_v20, %v2985_v33  ;;  %v1720_v9 = vadd.f32 %v1719_v15, %v2988_v8  ;;  %v1742_v19 = vmax.f32 %v2964_v12, %v2985_v33  ;;  %v1751_v49 = vmax.f32 %v2967_v22, %v2988_v8 }
 0x522   :  { %3783 = vst [vmem:[#allocation23_spill] sm:$0xff] %v2988_v8  ;;  %v3022_v20 = vstv %s2126_s5  ;;  %v3172_v22 = vstv %s3076_s24 }
 0x523   :  { %v1712_v5 = vrot.slane %v1711_v45, 4  ;;  %v1721_v42 = vrot.slane %v1720_v9, 4  ;;  %v1743_v47 = vmax.f32 %v1741_v0, %v1742_v19  ;;  %v1752_v53 = vmax.f32 %v1750_v3, %v1751_v49  ;;  %3785 = vst [vmem:[#allocation25_spill] sm:$0xff] %v3017_v63 }
 0x524   :  { %1100 = vrot.lane.b32.xlu1 %v1095_v28, %s2315_s4  ;;  %v3028_v0 = vstv %s2132_s30  ;;  %v3030_v3 = vstv %s2138_s8  ;;  %v3046_v49 = vstv %s2125_s29 }
 0x525   :  { %v1713_v7 = vadd.f32 %v1712_v5, %v1711_v45  ;;  %v1722_v30 = vadd.f32 %v1721_v42, %v1720_v9  ;;  %v1744_v39 = vrot.slane %v1743_v47, 4  ;;  %v1753_v41 = vrot.slane %v1752_v53, 4 }
 0x526   :  { %v3034_v45 = vstv %s2128_s9  ;;  %v3036_v9 = vstv %s2130_s10  ;;  %v3050_v28 = vstv %s2134_s28 }
 0x527   :  { %v1723_v44 = vrot.slane %v1722_v30, 2  ;;  %v1745_v37 = vmax.f32 %v1743_v47, %v1744_v39  ;;  %v1714_v17 = vrot.slane %v1713_v7, 2  ;;  %v1754_v4 = vmax.f32 %v1752_v53, %v1753_v41 }
 0x529   :  { %v1724_v61 = vadd.f32 %v1723_v44, %v1722_v30  ;;  %v1746_v50 = vrot.slane %v1745_v37, 2  ;;  %v1715_v43 = vadd.f32 %v1714_v17, %v1713_v7  ;;  %v1755_v35 = vrot.slane %v1754_v4, 2 }
 0x52a   :  { %v3071_v7 = vunpack.i.h.bf16 %v2911_v29  ;;  %v3074_v30 = vunpack.i.l.bf16 %v2911_v29  ;;  %v3090_v17 = vunpack.i.h.bf16 %v2913_v46  ;;  %v3093_v29 = vunpack.i.l.bf16 %v2913_v46 }
 0x52b   :  { %v1725_v13 = vrot.slane %v1724_v61, 1  ;;  %v1747_v18 = vmax.f32 %v1745_v37, %v1746_v50  ;;  %v1716_v23 = vrot.slane %v1715_v43, 1  ;;  %v1756_v62 = vmax.f32 %v1754_v4, %v1755_v35 }
 0x52c   :  { %3788 = vst [vmem:[#allocation28_spill] sm:$0xff] %v3071_v7  ;;  %v3087_v37 = vunpack.i.l.bf16 %v2909_v36  ;;  %v3102_v50 = vunpack.i.l.bf16 %v2915_v6 }
 0x52d   :  { %v1726_v38 = vadd.f32 %v1725_v13, %v1724_v61  ;;  %v1748_v16 = vrot.slane %v1747_v18, 1  ;;  %v1717_v56 = vadd.f32 %v1716_v23, %v1715_v43  ;;  %v1757_v2 = vrot.slane %v1756_v62, 1  ;;  %3789 = vst [vmem:[#allocation29_spill] sm:$0xff] %v3090_v17 }
 0x52e   :  { %v3099_v61 = vunpack.i.h.bf16 %v2915_v6  ;;  %3792 = vst [vmem:[#allocation32_spill] sm:$0xff] %v3102_v50  ;;  %v3118_v6 = vsel %vm150_vm7, %v3074_v30, %v3071_v7  ;;  %v3121_v23 = vstv %s3011_s17 }
 0x52f   :  { %v1728_v34 = vmul.f32 %v1726_v38, %v1062_v32  ;;  %v1749_v58 = vmax.f32 %v1747_v18, %v1748_v16  ;;  %v1727_v24 = vmul.f32 %v1717_v56, %v1062_v32  ;;  %v1758_v52 = vmax.f32 %v1756_v62, %v1757_v2  ;;  %3793 = vst [vmem:[#allocation33_spill] sm:$0xff] %v3118_v6 }
 0x530   :  { %v3014_v32 = vunpack.i.h.bf16 %v2909_v36  ;;  %3791 = vst [vmem:[#allocation31_spill] sm:$0xff] %v3099_v61  ;;  %v3113_v18 = vsel %vm106_vm5, %v3020_v55, %v3017_v63  ;;  %v3129_v38 = vstv %s3007_s16  ;;  %v3134_v16 = vsel %vm172_vm8, %v3093_v29, %v3090_v17 }
 0x531   :  { %1733 = vrot.lane.b32.xlu0 %v1728_v34, %s2315_s4  ;;  %1761 = vrot.lane.b32.xlu2 %v1749_v58, %s2315_s4  ;;  %3795 = vst [vmem:[#allocation35_spill] sm:$0xff] %v3134_v16  ;;  %v3138_v56 = vstv %s3024_s20  ;;  %v3141_v34 = vstv %s3032_s21  ;;  %vm3796_vm5 = vcmask 277504   ;;  %vm3831_vm8 = vcmask 785408  }
 0x532   :  { %1731 = vrot.lane.b32.xlu1 %v1727_v24, %s2315_s4  ;;  %3784 = vst [vmem:[#allocation24_spill] sm:$0xff] %v3014_v32  ;;  %v3126_v35 = vsel %vm128_vm6, %v3087_v37, %v3014_v32  ;;  %v3146_v58 = vsel %vm3796_vm5, %v3102_v50, %v3099_v61  ;;  %v3151_v24 = vstv %s3009_s2  ;;  %vm3829_vm6 = vcmask 900096   ;;  %vm3832_vm3 = vmmov %vm3831_vm8 }
 0x533   :  { %3794 = vst [vmem:[#allocation34_spill] sm:$0xff] %v3126_v35  ;;  %vm3830_vm7 = vmmov %vm3829_vm6 }
 0x53a   :  { %1763 = vrot.lane.b32.xlu1 %v1758_v52, %s2315_s4  ;;  %v3160_v52 = vstv %s3048_s22 }
 0x573   :  { %v3005_v51 = vpop.permute.xlu2 %1098 }
 0x574   :  { %v3040_v25 = vsel %vm1071_vm14, 0.0, %v3005_v51 }
 0x575   :  { %3786 = vst [vmem:[#allocation26_spill] sm:$0xff] %v3040_v25  ;;  %v1132_v43 = vmul.f32 %v3022_v20, %v3040_v25  ;;  %v1245_v8 = vmul.f32 %v3028_v0, %v3040_v25  ;;  %v1354_v14 = vmul.f32 %v3030_v3, %v3040_v25  ;;  %v1203_v48 = vmul.f32 %v3036_v9, %v3040_v25 }
 0x576   :  { %v1161_v33 = vmul.f32 %v3034_v45, %v3040_v25  ;;  %v3202_v27 = vmul.f32 %v3151_v24, %v3040_v25 }
 0x578   :  { %3799 = vst [vmem:[#allocation38_spill] sm:$0xff] %v3202_v27 }
 0x58b   :  { %v3026_v15 = vpop.permute.xlu2 %1761 }
 0x58c   :  { %v3044_v19 = vsel %vm1071_vm14, 0.0, %v3026_v15 }
 0x58d   :  { %3787 = vst [vmem:[#allocation27_spill] sm:$0xff] %v3044_v19  ;;  %v3056_v5 = vmul.f32 %v3044_v19, %v3022_v20  ;;  %v3060_v42 = vmul.f32 %v3044_v19, %v3028_v0  ;;  %v3064_v47 = vmul.f32 %v3044_v19, %v3030_v3  ;;  %v3068_v53 = vmul.f32 %v3044_v19, %v3034_v45  ;;  %v1070_v46 = vpop.permute.xlu0 %1069 }
 0x58e   :  { %v1068_v39 = vpop.permute.xlu1 %1067  ;;  %v3080_v41 = vmul.f32 %v3044_v19, %v3036_v9  ;;  %v3084_v44 = vmul.f32 %v3044_v19, %v3050_v28  ;;  %v3154_v62 = vsel %vm1071_vm14, %v1070_v46, 0.0  ;;  %v3206_v54 = vmul.f32 %v3044_v19, %v3129_v38 }
 0x58f   :  { %v3096_v4 = vsel %vm1071_vm14, 0.0, %v1068_v39  ;;  %3797 = vst [vmem:[#allocation36_spill] sm:$0xff] %v3154_v62  ;;  %v3157_v2 = vsel %vm1071_vm14, %v1068_v39, %v1070_v46  ;;  %v1129_v1 = vmul.f32 %v3046_v49, %v3154_v62  ;;  %v1351_v59 = vmul.f32 %v3138_v56, %v3154_v62 }
 0x590   :  { %3790 = vst [vmem:[#allocation30_spill] sm:$0xff] %v3096_v4  ;;  %v1127_v36 = vmul.f32 %v3046_v49, %v3096_v4  ;;  %v1128_v40 = vmul.f32 %v3046_v49, %v3157_v2  ;;  %v1156_v57 = vmul.f32 %v3141_v34, %v3096_v4  ;;  %v1349_v17 = vmul.f32 %v3138_v56, %v3096_v4 }
 0x591   :  { %3798 = vst [vmem:[#allocation37_spill] sm:$0xff] %v3157_v2  ;;  %v1199_v35 = vmul.f32 %v3160_v52, %v3157_v2 }
 0x592   :  { %v1135_v13 = vadd.f32 %v1132_v43, %v1127_v36  ;;  %v3163_v36 = vstv %s3052_s23 }
 0x594   :  { %1141 = vrot.lane.b32.xlu0 %v1135_v13, %s2308_s15  ;;  %v1240_v13 = vmul.f32 %v3121_v23, %v3096_v4 }
 0x596   :  { %v1101_v43 = vpop.permute.xlu1 %1100  ;;  %v1248_v60 = vadd.f32 %v1245_v8, %v1240_v13  ;;  %v3225_v8 = vstv %s3148_s3  ;;  %v1350_v13 = vmul.f32 %v3138_v56, %v3157_v2 }
 0x597   :  { %v3176_v39 = vsel %vm1071_vm14, %v3005_v51, %v1101_v43  ;;  %v3179_v46 = vsel %vm1071_vm14, %v1101_v43, 0.0  ;;  %v1198_v43 = vmul.f32 %v3160_v52, %v3096_v4 }
 0x598   :  { %v1134_v12 = vmul.f32 %v3022_v20, %v3179_v46  ;;  %v1133_v51 = vmul.f32 %v3022_v20, %v3176_v39  ;;  %v1163_v50 = vmul.f32 %v3034_v45, %v3179_v46  ;;  %v1162_v10 = vmul.f32 %v3034_v45, %v3176_v39 }
 0x599   :  { %v1356_v11 = vmul.f32 %v3030_v3, %v3179_v46  ;;  %v1247_v16 = vmul.f32 %v3028_v0, %v3179_v46  ;;  %v1246_v25 = vmul.f32 %v3028_v0, %v3176_v39  ;;  %v1205_v6 = vmul.f32 %v3036_v9, %v3179_v46 }
 0x59a   :  { %v1137_v31 = vadd.f32 %v1134_v12, %v1129_v1  ;;  %v1136_v21 = vadd.f32 %v1133_v51, %v1128_v40  ;;  %v1242_v40 = vmul.f32 %v3121_v23, %v3154_v62  ;;  %v1241_v12 = vmul.f32 %v3121_v23, %v3157_v2 }
 0x59b   :  { %v1158_v1 = vmul.f32 %v3141_v34, %v3154_v62  ;;  %v1206_v51 = vadd.f32 %v1203_v48, %v1198_v43  ;;  %v1355_v48 = vmul.f32 %v3030_v3, %v3176_v39  ;;  %v3242_v43 = vadd.f32 %v1354_v14, %v1349_v17 }
 0x59c   :  { %1254 = vrot.lane.b32.xlu0 %v1248_v60, %s2309_s18  ;;  %1145 = vrot.lane.b32.xlu1 %v1137_v31, %s2308_s15  ;;  %v1157_v60 = vmul.f32 %v3141_v34, %v3157_v2  ;;  %v1164_v31 = vadd.f32 %v1161_v33, %v1156_v57  ;;  %v1276_v57 = vmul.f32 %v3050_v28, %v3179_v46 }
 0x59d   :  { %1143 = vrot.lane.b32.xlu2 %v1136_v21, %s2308_s15  ;;  %v1271_v21 = vmul.f32 %v3163_v36, %v3154_v62  ;;  %v1166_v19 = vadd.f32 %v1163_v50, %v1158_v1  ;;  %v1200_v33 = vmul.f32 %v3160_v52, %v3154_v62  ;;  %v3253_v50 = vmul.f32 %v3087_v37, %v1206_v51 }
 0x59e   :  { %v1165_v61 = vadd.f32 %v1162_v10, %v1157_v60  ;;  %v3256_v1 = vmul.f32 %v3020_v55, %v1164_v31  ;;  %v3260_v10 = vmul.f32 %v3172_v22, %v3154_v62  ;;  %v3264_v14 = vmul.f32 %v3163_v36, %v3096_v4 }
 0x59f   :  { %v1359_v17 = vadd.f32 %v1356_v11, %v1351_v59  ;;  %v1250_v60 = vadd.f32 %v1247_v16, %v1242_v40  ;;  %v1249_v7 = vadd.f32 %v1246_v25, %v1241_v12  ;;  %v1204_v2 = vmul.f32 %v3036_v9, %v3176_v39 }
 0x5a0   :  { %3800 = vst [vmem:[#allocation39_spill] sm:$0xff] %v3260_v10  ;;  %v1179_v51 = vmul.f32 %v3017_v63, %v1166_v19  ;;  %v1358_v27 = vadd.f32 %v1355_v48, %v1350_v13  ;;  %v3270_v31 = vmul.f32 %v3113_v18, %v1165_v61  ;;  %v3274_v62 = vmul.f32 %v3129_v38, %v3179_v46 }
 0x5a1   :  { %v3281_v59 = vadd.f32 %v1276_v57, %v1271_v21  ;;  %v3283_v25 = vadd.f32 %v1205_v6, %v1200_v33  ;;  %v3287_v19 = vmul.f32 %v3050_v28, %v3176_v39  ;;  %v3302_v12 = vadd.f32 %v1204_v2, %v1199_v35 }
 0x5a3   :  { %v1734_v32 = vpop.permute.xlu0 %1733 }
 0x5a4   :  { %v3277_v10 = vsel %vm1071_vm14, %v1734_v32, 0.0  ;;  %1367 = vrot.lane.b32.xlu0 %v1359_v17, %s2310_s0  ;;  %1258 = vrot.lane.b32.xlu1 %v1250_v60, %s2309_s18  ;;  %v1732_v11 = vpop.permute.xlu1 %1731 }
 0x5a5   :  { %1256 = vrot.lane.b32.xlu2 %v1249_v7, %s2309_s18  ;;  %v3293_v61 = vsel %vm1071_vm14, %v1732_v11, %v1734_v32  ;;  %v3296_v16 = vsel %vm1071_vm14, 0.0, %v1732_v11  ;;  %v1792_v40 = vmul.f32 %v3277_v10, %v3046_v49  ;;  %v1882_v6 = vmul.f32 %v3277_v10, %v3121_v23 }
 0x5a6   :  { %v1999_v13 = vmul.f32 %v3293_v61, %v3198_v26  ;;  %v1790_v7 = vmul.f32 %v3296_v16, %v3046_v49  ;;  %v3310_v32 = vmul.f32 %v3225_v8, %v3096_v4  ;;  %v1880_v21 = vmul.f32 %v3296_v16, %v3121_v23 }
 0x5a7   :  { %v1791_v48 = vmul.f32 %v3293_v61, %v3046_v49  ;;  %v1970_v35 = vmul.f32 %v3296_v16, %v3138_v56  ;;  %v1881_v2 = vmul.f32 %v3293_v61, %v3121_v23  ;;  %v1818_v33 = vmul.f32 %v3296_v16, %v3141_v34 }
 0x5a8   :  { %v3321_v57 = vadd.f32 %v3056_v5, %v1790_v7  ;;  %v1972_v17 = vmul.f32 %v3277_v10, %v3138_v56  ;;  %v1971_v60 = vmul.f32 %v3293_v61, %v3138_v56  ;;  %v3330_v49 = vadd.f32 %v3060_v42, %v1880_v21 }
 0x5a9   :  { %v3333_v11 = vadd.f32 %v3064_v47, %v1970_v35  ;;  %v1849_v5 = vmul.f32 %v3296_v16, %v3160_v52  ;;  %v1820_v23 = vmul.f32 %v3277_v10, %v3141_v34  ;;  %v1826_v7 = vadd.f32 %v3068_v53, %v1818_v33 }
 0x5aa   :  { %3801 = vst [vmem:[#allocation40_spill] sm:$0xff] %v3321_v57  ;;  %v1819_v63 = vmul.f32 %v3293_v61, %v3141_v34  ;;  %v1908_v56 = vmul.f32 %v3296_v16, %v3163_v36  ;;  %v1851_v42 = vmul.f32 %v3277_v10, %v3160_v52  ;;  %v1850_v21 = vmul.f32 %v3293_v61, %v3160_v52 }
 0x5ab   :  { %3802 = vst [vmem:[#allocation41_spill] sm:$0xff] %v3330_v49  ;;  %v1857_v47 = vadd.f32 %v3080_v41, %v1849_v5  ;;  %v1939_v35 = vmul.f32 %v3296_v16, %v3172_v22  ;;  %v1910_v53 = vmul.f32 %v3277_v10, %v3163_v36  ;;  %v3356_v33 = vstv %s3289_s1 }
 0x5ac   :  { %3803 = vst [vmem:[#allocation42_spill] sm:$0xff] %v3333_v11  ;;  %1187 = vrot.lane.b32.xlu0 %v1179_v51, %s2304_s11  ;;  %1365 = vrot.lane.b32.xlu1 %v1358_v27, %s2310_s0  ;;  %v1764_v34 = vpop.permute.xlu1 %1763  ;;  %v3359_v11 = vmul.f32 %v3020_v55, %v1826_v7  ;;  %v1916_v41 = vadd.f32 %v3084_v44, %v1908_v56 }
 0x5ad   :  { %v1909_v52 = vmul.f32 %v3293_v61, %v3163_v36  ;;  %1363 = vrot.lane.b32.xlu2 %v3242_v43, %s2310_s0  ;;  %v3368_v5 = vsel %vm1071_vm14, %v3026_v15, %v1764_v34  ;;  %v1770_v27 = vsel %vm1071_vm14, %v1764_v34, 0.0  ;;  %v3372_v51 = vmul.f32 %v3087_v37, %v1857_v47 }
 0x5ae   :  { %3804 = vst [vmem:[#allocation43_spill] sm:$0xff] %v3359_v11  ;;  %v1947_v55 = vadd.f32 %v3206_v54, %v1939_v35  ;;  %v2004_v44 = vmul.f32 %v3368_v5, %v3356_v33  ;;  %v1797_v7 = vmul.f32 %v1770_v27, %v3022_v20  ;;  %v1796_v56 = vmul.f32 %v3368_v5, %v3022_v20 }
 0x5af   :  { %3805 = vst [vmem:[#allocation44_spill] sm:$0xff] %v3372_v51  ;;  %v1887_v43 = vmul.f32 %v1770_v27, %v3028_v0  ;;  %v1886_v15 = vmul.f32 %v3368_v5, %v3028_v0  ;;  %v1977_v34 = vmul.f32 %v1770_v27, %v3030_v3  ;;  %v1976_v37 = vmul.f32 %v3368_v5, %v3030_v3 }
 0x5b0   :  { %v1825_v54 = vmul.f32 %v1770_v27, %v3034_v45  ;;  %v2007_v47 = vadd.f32 %v2004_v44, %v1999_v13  ;;  %v3387_v35 = vadd.f32 %v1797_v7, %v1792_v40  ;;  %v3389_v51 = vadd.f32 %v1796_v56, %v1791_v48 }
 0x5b1   :  { %v3391_v11 = vadd.f32 %v1887_v43, %v1882_v6  ;;  %v3393_v20 = vadd.f32 %v1886_v15, %v1881_v2  ;;  %v3395_v49 = vadd.f32 %v1977_v34, %v1972_v17  ;;  %v3397_v57 = vadd.f32 %v1976_v37, %v1971_v60  ;;  %v3810_v15 = vld [vmem:[#allocation37_spill] sm:$0xff] }
 0x5b2   :  { %v3399_v0 = vadd.f32 %v1825_v54, %v1820_v23  ;;  %v3402_v4 = vmul.f32 %v2007_v47, %v3146_v58  ;;  %v1824_v3 = vmul.f32 %v3368_v5, %v3034_v45  ;;  %v3407_v40 = vmul.f32 %v3074_v30, %v1916_v41 }
 0x5b3   :  { %v1856_v6 = vmul.f32 %v1770_v27, %v3036_v9  ;;  %v1855_v13 = vmul.f32 %v3368_v5, %v3036_v9  ;;  %v3413_v48 = vmul.f32 %v3093_v29, %v1947_v55  ;;  %v1915_v2 = vmul.f32 %v1770_v27, %v3050_v28  ;;  %v3806_v55 = vld [vmem:[#allocation38_spill] sm:$0xff] }
 0x5b4   :  { %v1118_v17 = vmul.f32 %v3151_v24, %v3176_v39  ;;  %1225 = vrot.lane.b32.xlu0 %v3253_v50, %s2311_s19  ;;  %1185 = vrot.lane.b32.xlu1 %v3270_v31, %s2304_s11  ;;  %v1827_v45 = vadd.f32 %v1824_v3, %v1819_v63  ;;  %v1914_v23 = vmul.f32 %v3368_v5, %v3050_v28  ;;  %v3807_v63 = vld [vmem:[#allocation24_spill] sm:$0xff] }
 0x5b5   :  { %v1859_v60 = vadd.f32 %v1856_v6, %v1851_v42  ;;  %1183 = vrot.lane.b32.xlu2 %v3256_v1, %s2304_s11  ;;  %v1858_v9 = vadd.f32 %v1855_v13, %v1850_v21  ;;  %v3426_v41 = vadd.f32 %v1915_v2, %v1910_v53  ;;  %v3430_v44 = vadd.f32 %v3806_v55, %v3310_v32  ;;  %v3808_v1 = vld [vmem:[#allocation28_spill] sm:$0xff]  ;;  %v3809_v53 = vld [vmem:[#allocation34_spill] sm:$0xff]  ;;  %v3812_v2 = vld [vmem:[#allocation31_spill] sm:$0xff] }
 0x5b6   :  { %v2000_v50 = vmul.f32 %v3277_v10, %v3198_v26  ;;  %v3435_v31 = vmul.f32 %v1827_v45, %v3113_v18  ;;  %v1917_v7 = vadd.f32 %v1914_v23, %v1909_v52  ;;  %v2005_v56 = vmul.f32 %v1770_v27, %v3356_v33  ;;  %v3811_v18 = vld [vmem:[#allocation33_spill] sm:$0xff] }
 0x5b7   :  { %v3438_v42 = vmul.f32 %v3807_v63, %v1859_v60  ;;  %v1290_v21 = vmul.f32 %v3808_v1, %v3281_v59  ;;  %v3444_v43 = vmul.f32 %v1858_v9, %v3809_v53  ;;  %v1941_v32 = vmul.f32 %v3277_v10, %v3172_v22  ;;  %v3813_v60 = vld [vmem:[#allocation27_spill] sm:$0xff] }
 0x5b8   :  { %v1114_v34 = vmul.f32 %v3225_v8, %v3810_v15  ;;  %v3451_v37 = vmul.f32 %v1917_v7, %v3811_v18  ;;  %v2008_v54 = vadd.f32 %v2005_v56, %v2000_v50  ;;  %v1946_v52 = vmul.f32 %v1770_v27, %v3129_v38  ;;  %v3814_v7 = vld [vmem:[#allocation26_spill] sm:$0xff]  ;;  %v3815_v56 = vld [vmem:[#allocation35_spill] sm:$0xff] }
 0x5b9   :  { %v1940_v47 = vmul.f32 %v3293_v61, %v3172_v22  ;;  %v1221_v59 = vmul.f32 %v3807_v63, %v3283_v25  ;;  %v1945_v3 = vmul.f32 %v3368_v5, %v3129_v38  ;;  %v1998_v10 = vmul.f32 %v3296_v16, %v3198_v26 }
 0x5ba   :  { %v3460_v6 = vadd.f32 %v1118_v17, %v1114_v34  ;;  %v1220_v13 = vmul.f32 %v3809_v53, %v3302_v12  ;;  %v3467_v45 = vmul.f32 %v3812_v2, %v2008_v54  ;;  %v3469_v27 = vadd.f32 %v1946_v52, %v1941_v32  ;;  %v3817_v54 = vld [vmem:[#allocation7_spill] sm:$0xff] }
 0x5bb   :  { %v2003_v23 = vmul.f32 %v3813_v60, %v3356_v33  ;;  %v1948_v25 = vadd.f32 %v1945_v3, %v1940_v47  ;;  %v1780_v9 = vmul.f32 %v3813_v60, %v3151_v24  ;;  %v1776_v17 = vmul.f32 %v3296_v16, %v3225_v8  ;;  %v3820_v60 = vld [vmem:[#allocation30_spill] sm:$0xff] }
 0x5bc   :  { %v1777_v55 = vmul.f32 %v3293_v61, %v3225_v8  ;;  %1298 = vrot.lane.b32.xlu0 %v1290_v21, %s2305_s12  ;;  %1229 = vrot.lane.b32.xlu1 %v1221_v59, %s2311_s19  ;;  %v1270_v12 = vmul.f32 %v3163_v36, %v3810_v15  ;;  %v1781_v63 = vmul.f32 %v3368_v5, %v3151_v24  ;;  %v3816_v61 = vld [vmem:[#allocation39_spill] sm:$0xff]  ;;  %v3501_v24 = vstv %s3714_s6 }
 0x5bd   :  { %v3483_v50 = vadd.f32 %v2003_v23, %v1998_v10  ;;  %1227 = vrot.lane.b32.xlu2 %v1220_v13, %s2311_s19  ;;  %v1274_v16 = vmul.f32 %v3050_v28, %v3814_v7  ;;  %v3491_v53 = vmul.f32 %v1948_v25, %v3815_v56  ;;  %v1782_v8 = vadd.f32 %v1780_v9, %v1776_v17  ;;  %v3818_v28 = vld [vmem:[#allocation6_spill] sm:$0xff] }
 0x5be   :  { %v1319_v21 = vadd.f32 %v3274_v62, %v3816_v61  ;;  %v1278_v32 = vadd.f32 %v3287_v19, %v1270_v12  ;;  %v1783_v36 = vadd.f32 %v1781_v63, %v1777_v55  ;;  %v1385_v47 = vmul.f32 %v3356_v33, %v3179_v46  ;;  %v3819_v62 = vld [vmem:[#allocation29_spill] sm:$0xff]  ;;  %v3821_v46 = vld [vmem:[#allocation36_spill] sm:$0xff] }
 0x5bf   :  { %v1277_v34 = vadd.f32 %v1274_v16, %v3264_v14  ;;  %v1784_v52 = vmul.f32 %v1782_v8, %v3817_v54  ;;  %v1315_v14 = vmul.f32 %v3129_v38, %v3176_v39  ;;  %v1309_v23 = vmul.f32 %v3172_v22, %v3820_v60 }
 0x5c0   :  { %v1785_v5 = vmul.f32 %v1783_v36, %v3818_v28  ;;  %v1330_v19 = vmul.f32 %v3819_v62, %v1319_v21  ;;  %v1289_v3 = vmul.f32 %v3811_v18, %v1278_v32  ;;  %v1380_v25 = vmul.f32 %v3198_v26, %v3821_v46  ;;  %v3823_v32 = vld [vmem:[#allocation40_spill] sm:$0xff] }
 0x5c1   :  { %v3507_v59 = vadd.f32 %v1784_v52, %v3501_v24  ;;  %v1288_v13 = vmul.f32 %v3074_v30, %v1277_v34  ;;  %v1310_v18 = vmul.f32 %v3172_v22, %v3810_v15  ;;  %v1314_v9 = vmul.f32 %v3129_v38, %v3814_v7 }
 0x5c2   :  { %v3514_v10 = vadd.f32 %v1785_v5, %v3501_v24  ;;  %v1388_v17 = vadd.f32 %v1385_v47, %v1380_v25  ;;  %v1384_v16 = vmul.f32 %v3356_v33, %v3176_v39  ;;  %v1378_v22 = vmul.f32 %v3198_v26, %v3820_v60 }
 0x5c3   :  { %v1318_v30 = vadd.f32 %v1315_v14, %v1310_v18  ;;  %v1317_v55 = vadd.f32 %v1314_v9, %v1309_v23  ;;  %v1379_v38 = vmul.f32 %v3198_v26, %v3810_v15  ;;  %v3824_v26 = vld [vmem:[#allocation41_spill] sm:$0xff]  ;;  %v3828_v15 = vld [vmem:[#allocation44_spill] sm:$0xff] }
 0x5c4   :  { %1338 = vrot.lane.b32.xlu0 %v1330_v19, %s2306_s13  ;;  %1296 = vrot.lane.b32.xlu1 %v1289_v3, %s2305_s12  ;;  %v1399_v12 = vmul.f32 %v3812_v2, %v1388_v17  ;;  %v1383_v2 = vmul.f32 %v3356_v33, %v3814_v7  ;;  %v3826_v33 = vld [vmem:[#allocation43_spill] sm:$0xff] }
 0x5c5   :  { %1294 = vrot.lane.b32.xlu2 %v1288_v13, %s2305_s12  ;;  %v1329_v63 = vmul.f32 %v3815_v56, %v1318_v30  ;;  %v1328_v8 = vmul.f32 %v3093_v29, %v1317_v55  ;;  %v1387_v56 = vadd.f32 %v1384_v16, %v1379_v38  ;;  %v3822_v29 = vld [vmem:[#allocation32_spill] sm:$0xff] }
 0x5c6   :  { %v1386_v61 = vadd.f32 %v1383_v2, %v1378_v22 }
 0x5c7   :  { %v1398_v39 = vmul.f32 %v3146_v58, %v1387_v56  ;;  %v3825_v58 = vld [vmem:[#allocation42_spill] sm:$0xff] }
 0x5c8   :  { %v1397_v21 = vmul.f32 %v3822_v29, %v1386_v61 }
 0x5cc   :  { %1407 = vrot.lane.b32.xlu0 %v1399_v12, %s2307_s14  ;;  %1336 = vrot.lane.b32.xlu1 %v1329_v63, %s2306_s13 }
 0x5cd   :  { %1334 = vrot.lane.b32.xlu2 %v1328_v8, %s2306_s13 }
 0x5d4   :  { %1405 = vrot.lane.b32.xlu1 %v1398_v39, %s2307_s14  ;;  %1804 = vrot.lane.b32.xlu0 %v3823_v32, %s2308_s15 }
 0x5d5   :  { %1403 = vrot.lane.b32.xlu2 %v1397_v21, %s2307_s14 }
 0x5dc   :  { %1894 = vrot.lane.b32.xlu0 %v3824_v26, %s2309_s18  ;;  %1808 = vrot.lane.b32.xlu1 %v3387_v35, %s2308_s15 }
 0x5dd   :  { %1806 = vrot.lane.b32.xlu2 %v3389_v51, %s2308_s15  ;;  %v3827_v51 = vld [vmem:[#allocation25_spill] sm:$0xff] }
 0x5de   :  { %v1831_v35 = vmul.f32 %v3827_v51, %v3399_v0 }
 0x5e4   :  { %1984 = vrot.lane.b32.xlu0 %v3825_v58, %s2310_s0  ;;  %1898 = vrot.lane.b32.xlu1 %v3391_v11, %s2309_s18 }
 0x5e5   :  { %1896 = vrot.lane.b32.xlu2 %v3393_v20, %s2309_s18 }
 0x5ec   :  { %1835 = vrot.lane.b32.xlu0 %v3826_v33, %s2304_s11  ;;  %1988 = vrot.lane.b32.xlu1 %v3395_v49, %s2310_s0  ;;  %v1921_v49 = vmul.f32 %v3808_v1, %v3426_v41 }
 0x5ed   :  { %1986 = vrot.lane.b32.xlu2 %v3397_v57, %s2310_s0 }
 0x5f4   :  { %1866 = vrot.lane.b32.xlu0 %v3828_v15, %s2311_s19  ;;  %1839 = vrot.lane.b32.xlu1 %v1831_v35, %s2304_s11 }
 0x5f5   :  { %1837 = vrot.lane.b32.xlu2 %v3435_v31, %s2304_s11 }
 0x5f7   :  { %v1144_v11 = vpop.permute.xlu2 %1143 }
 0x5fc   :  { %1925 = vrot.lane.b32.xlu0 %v3407_v40, %s2305_s12  ;;  %1870 = vrot.lane.b32.xlu1 %v3438_v42, %s2311_s19  ;;  %v1952_v40 = vmul.f32 %v3819_v62, %v3469_v27  ;;  %v2009_v42 = vmul.f32 %v3822_v29, %v3483_v50  ;;  %v1122_v50 = vmul.f32 %v3460_v6, %v3818_v28 }
 0x5fd   :  { %1868 = vrot.lane.b32.xlu2 %v3444_v43, %s2311_s19 }
 0x5fe   :  { %v1124_v13 = vadd.f32 %v1122_v50, %v3501_v24 }
 0x5ff   :  { %v1257_v57 = vpop.permute.xlu2 %1256 }
 0x604   :  { %1956 = vrot.lane.b32.xlu0 %v3413_v48, %s2306_s13  ;;  %1929 = vrot.lane.b32.xlu1 %v1921_v49, %s2305_s12 }
 0x605   :  { %1927 = vrot.lane.b32.xlu2 %v3451_v37, %s2305_s12 }
 0x606   :  { %v1142_v20 = vpop.permute.xlu0 %1141 }
 0x607   :  { %v1364_v0 = vpop.permute.xlu2 %1363 }
 0x60c   :  { %2019 = vrot.lane.b32.xlu0 %v3467_v45, %s2307_s14  ;;  %1960 = vrot.lane.b32.xlu1 %v1952_v40, %s2306_s13 }
 0x60d   :  { %1958 = vrot.lane.b32.xlu2 %v3491_v53, %s2306_s13  ;;  %v1121_v53 = vmul.f32 %v3430_v44, %v3817_v54 }
 0x60e   :  { %v1255_v41 = vpop.permute.xlu0 %1254  ;;  %v1146_v48 = vpop.permute.xlu1 %1145 }
 0x60f   :  { %v1184_v31 = vpop.permute.xlu2 %1183  ;;  %v1123_v62 = vadd.f32 %v1121_v53, %v3501_v24  ;;  %v1149_v19 = vsel %vm233_vm1, %v1144_v11, %v1146_v48  ;;  %v1261_v30 = vsel %vm286_vm12, %v1255_v41, %v1257_v57 }
 0x610   :  { %v1153_v44 = vadd.f32 %v1149_v19, %v1124_v13 }
 0x614   :  { %2017 = vrot.lane.b32.xlu1 %v3402_v4, %s2307_s14  ;;  %v1148_v4 = vsel %vm233_vm1, %v1142_v20, %v1144_v11 }
 0x615   :  { %2015 = vrot.lane.b32.xlu2 %v2009_v42, %s2307_s14  ;;  %v1152_v14 = vadd.f32 %v1148_v4, %v1123_v62 }
 0x616   :  { %v1368_v1 = vpop.permute.xlu0 %1367  ;;  %v1259_v43 = vpop.permute.xlu1 %1258 }
 0x617   :  { %v1228_v37 = vpop.permute.xlu2 %1227  ;;  %v1262_v55 = vsel %vm286_vm12, %v1257_v57, %v1259_v43 }
 0x61e   :  { %v1188_v45 = vpop.permute.xlu0 %1187  ;;  %v1366_v27 = vpop.permute.xlu1 %1365 }
 0x61f   :  { %v1295_v7 = vpop.permute.xlu2 %1294  ;;  %v1370_v32 = vsel %vm3833_vm9, %v1364_v0, %v1366_v27  ;;  %v1371_v26 = vsel %vm3834_vm11, %v1366_v27, %v1368_v1 }
 0x626   :  { %v1226_v36 = vpop.permute.xlu0 %1225  ;;  %v1186_v34 = vpop.permute.xlu1 %1185 }
 0x627   :  { %v1335_v47 = vpop.permute.xlu2 %1334  ;;  %v1190_v3 = vsel %vm250_vm2, %v1184_v31, %v1186_v34  ;;  %v1191_v60 = vsel %vm250_vm2, %v1186_v34, %v1188_v45  ;;  %v1232_v25 = vsel %vm270_vm4, %v1226_v36, %v1228_v37 }
 0x628   :  { %v1194_v54 = vadd.f32 %v1190_v3, %v1152_v14  ;;  %v1195_v28 = vadd.f32 %v1191_v60, %v1153_v44 }
 0x62a   :  { %v1236_v18 = vadd.f32 %v1232_v25, %v1194_v54 }
 0x62c   :  { %v1265_v63 = vadd.f32 %v1261_v30, %v1236_v18  ;;  %v3837_v30 = vld [vmem:[#allocation8_spill] sm:$0xff] }
 0x62e   :  { %v1299_v52 = vpop.permute.xlu0 %1298  ;;  %v1230_v5 = vpop.permute.xlu1 %1229 }
 0x62f   :  { %v1233_v6 = vsel %vm270_vm4, %v1228_v37, %v1230_v5  ;;  %v1404_v9 = vpop.permute.xlu2 %1403 }
 0x630   :  { %v1237_v17 = vadd.f32 %v1233_v6, %v1195_v28 }
 0x632   :  { %v1266_v16 = vadd.f32 %v1262_v55, %v1237_v17 }
 0x636   :  { %v1339_v23 = vpop.permute.xlu0 %1338  ;;  %v1297_v46 = vpop.permute.xlu1 %1296 }
 0x637   :  { %v1301_v24 = vsel %vm3829_vm6, %v1295_v7, %v1297_v46  ;;  %v1302_v12 = vsel %vm3830_vm7, %v1297_v46, %v1299_v52  ;;  %v3616_v21 = vpop.permute.xlu2 %1806 }
 0x638   :  { %v1305_v56 = vadd.f32 %v1301_v24, %v1265_v63  ;;  %v1306_v61 = vadd.f32 %v1302_v12, %v1266_v16  ;;  %v3838_v24 = vld [vmem:[#allocation12_spill] sm:$0xff]  ;;  %v3839_v63 = vld [vmem:[#allocation14_spill] sm:$0xff] }
 0x63e   :  { %v1408_v8 = vpop.permute.xlu0 %1407  ;;  %v1337_v22 = vpop.permute.xlu1 %1336 }
 0x63f   :  { %v1341_v38 = vsel %vm3831_vm8, %v1335_v47, %v1337_v22  ;;  %v1342_v2 = vsel %vm3832_vm3, %v1337_v22, %v1339_v23  ;;  %v3624_v41 = vpop.permute.xlu2 %1896 }
 0x640   :  { %v1345_v39 = vadd.f32 %v1341_v38, %v1305_v56  ;;  %v1346_v29 = vadd.f32 %v1342_v2, %v1306_v61  ;;  %v3841_v38 = vld [vmem:[#allocation9_spill] sm:$0xff] }
 0x641   :  { %v3842_v56 = vld [vmem:[#allocation13_spill] sm:$0xff] }
 0x642   :  { %v1374_v58 = vadd.f32 %v1370_v32, %v1345_v39  ;;  %v1375_v33 = vadd.f32 %v1371_v26, %v1346_v29  ;;  %v3843_v39 = vld [vmem:[#allocation15_spill] sm:$0xff] }
 0x643   :  { %v3844_v32 = vld [vmem:[#allocation11_spill] sm:$0xff] }
 0x646   :  { %v1406_v51 = vpop.permute.xlu1 %1405  ;;  %v3622_v11 = vpop.permute.xlu0 %1804 }
 0x647   :  { %v1410_v35 = vsel %vm3835_vm10, %v1404_v9, %v1406_v51  ;;  %v1411_v15 = vsel %vm3836_vm0, %v1406_v51, %v1408_v8  ;;  %v3630_v37 = vpop.permute.xlu2 %1986  ;;  %v3840_v8 = vld [vmem:[#allocation10_spill] sm:$0xff]  ;;  %vm3850_vm10 = vmmov %vm3836_vm0 }
 0x648   :  { %v1414_v57 = vadd.f32 %v1410_v35, %v1374_v58  ;;  %v1415_v49 = vadd.f32 %v1411_v15, %v1375_v33 }
 0x64a   :  { %v2141_v20 = vmul.f32 -1.442695, %v1414_v57  ;;  %v2142_v40 = vmul.f32 -1.442695, %v1415_v49 }
 0x64c   :  { %2267 = vpow2.f32 %v2141_v20 }
 0x64d   :  { %2269 = vpow2.f32 %v2142_v40 }
 0x64e   :  { %v3626_v48 = vpop.permute.xlu0 %1894  ;;  %v3628_v1 = vpop.permute.xlu1 %1808 }
 0x64f   :  { %v1838_v13 = vpop.permute.xlu2 %1837 }
 0x652   :  { %v2268_v0 = vpop.eup %2267 }
 0x653   :  { %v2270_v31 = vpop.eup %2269  ;;  %v1422_v42 = vadd.f32 1.0, %v2268_v0 }
 0x654   :  { %v1423_v43 = vadd.f32 1.0, %v2270_v31 }
 0x655   :  { %2271 = vrcp.f32 %v1422_v42  ;;  %v1435_v5 = vand.u32 2147483648, %v1422_v42  ;;  %v1433_v4 = vand.u32 2147483647, %v1422_v42  ;;  %vm1429_vm14 = vweird.f32 %v1422_v42 }
 0x656   :  { %2273 = vrcp.f32 %v1423_v43  ;;  %v3632_v45 = vpop.permute.xlu0 %1984  ;;  %v3634_v7 = vpop.permute.xlu1 %1898  ;;  %v1450_v62 = vand.u32 2147483648, %v1423_v43  ;;  %v1448_v3 = vand.u32 2147483647, %v1423_v43  ;;  %vm1444_vm6 = vweird.f32 %v1423_v43 }
 0x657   :  { %v1436_v60 = vor.u32 1.1754944e-38, %v1435_v5  ;;  %vm1434_vm7 = vcmp.eq.f32.partialorder %v1433_v4, 8.507059e+37  ;;  %v1869_v0 = vpop.permute.xlu2 %1868  ;;  %v1810_v5 = vsel %vm233_vm1, %v3622_v11, %v3616_v21 }
 0x658   :  { %v1451_v6 = vor.u32 1.1754944e-38, %v1450_v62  ;;  %vm1449_vm3 = vcmp.eq.f32.partialorder %v1448_v3, 8.507059e+37  ;;  %v1814_v62 = vadd.f32 %v1810_v5, %v3507_v59  ;;  %v1901_v59 = vsel %vm286_vm12, %v3624_v41, %v3634_v7 }
 0x65b   :  { %v2272_v27 = vpop.eup %2271 }
 0x65c   :  { %v2274_v36 = vpop.eup %2273  ;;  %v1425_v34 = vmul.f32 %v2272_v27, %v1422_v42  ;;  %vm1430_vm15 = vweird.f32 %v2272_v27 }
 0x65d   :  { %v1440_v53 = vmul.f32 %v2274_v36, %v1423_v43  ;;  %vm1445_vm13 = vweird.f32 %v2274_v36  ;;  %vm1431_vm5 = vmor %vm1429_vm14, %vm1430_vm15 }
 0x65e   :  { %v1426_v52 = vsub.f32 1.0, %v1425_v34  ;;  %v1836_v54 = vpop.permute.xlu0 %1835  ;;  %v3636_v23 = vpop.permute.xlu1 %1988  ;;  %vm1446_vm8 = vmor %vm1444_vm6, %vm1445_vm13 }
 0x65f   :  { %v1441_v50 = vsub.f32 1.0, %v1440_v53  ;;  %v1928_v53 = vpop.permute.xlu2 %1927 }
 0x660   :  { %v1427_v47 = vmul.f32 %v2272_v27, %v1426_v52 }
 0x661   :  { %v1442_v19 = vmul.f32 %v2274_v36, %v1441_v50  ;;  %v1811_v50 = vsel %vm233_vm1, %v3616_v21, %v3628_v1  ;;  %v1900_v21 = vsel %vm286_vm12, %v3626_v48, %v3624_v41  ;;  %vm3845_vm1 = vcmask 900096   ;;  %vm3849_vm12 = vmmov %vm3834_vm11 }
 0x662   :  { %v1428_v14 = vadd.f32 %v2272_v27, %v1427_v47  ;;  %v1841_v47 = vsel %vm250_vm2, %v1836_v54, %v1838_v13  ;;  %v1990_v48 = vsel %vm3834_vm11, %v3632_v45, %v3630_v37  ;;  %v1991_v41 = vsel %vm3849_vm12, %v3630_v37, %v3636_v23 }
 0x663   :  { %v1443_v44 = vadd.f32 %v2274_v36, %v1442_v19  ;;  %v1815_v19 = vadd.f32 %v1811_v50, %v3514_v10 }
 0x664   :  { %v1432_v46 = vsel %vm1431_vm5, %v2272_v27, %v1428_v14 }
 0x665   :  { %v1437_v28 = vsel %vm1434_vm7, %v1436_v60, %v1432_v46  ;;  %v1447_v25 = vsel %vm1446_vm8, %v2274_v36, %v1443_v44  ;;  %v1845_v44 = vadd.f32 %v1841_v47, %v1814_v62 }
 0x666   :  { %v1452_v18 = vsel %vm1449_vm3, %v1451_v6, %v1447_v25  ;;  %v1454_v9 = vperm.slane %v1437_v28, 0  ;;  %v1840_v40 = vpop.permute.xlu1 %1839  ;;  %v1867_v36 = vpop.permute.xlu0 %1866 }
 0x667   :  { %v1455_v17 = vperm.slane %v1452_v18, 0  ;;  %v1842_v4 = vsel %vm250_vm2, %v1838_v13, %v1840_v40  ;;  %v1872_v14 = vsel %vm270_vm4, %v1867_v36, %v1869_v0  ;;  %v1959_v28 = vpop.permute.xlu2 %1958  ;;  %vm3846_vm2 = vmmov %vm3845_vm1 }
 0x668   :  { %v1456_v55 = vmul.f32 %v1454_v9, %v3837_v30  ;;  %v1458_v12 = vmul.f32 %v1454_v9, %v3838_v24  ;;  %v1460_v16 = vmul.f32 %v1454_v9, %v3839_v63  ;;  %v1462_v22 = vmul.f32 %v1454_v9, %v3840_v8 }
 0x669   :  { %v1457_v2 = vmul.f32 %v1455_v17, %v3841_v38  ;;  %v1459_v61 = vmul.f32 %v1455_v17, %v3842_v56  ;;  %v1461_v29 = vmul.f32 %v1455_v17, %v3843_v39  ;;  %v1463_v26 = vmul.f32 %v1455_v17, %v3844_v32 }
 0x66a   :  { %v1464_v58 = vmax.f32 %v1456_v55, 0.0  ;;  %v1466_v33 = vmax.f32 %v1458_v12, 0.0  ;;  %v1468_v51 = vmax.f32 %v1460_v16, 0.0  ;;  %v1470_v35 = vmax.f32 %v1462_v22, 0.0 }
 0x66b   :  { %v1465_v15 = vmax.f32 %v1457_v2, 0.0  ;;  %v1467_v57 = vmax.f32 %v1459_v61, 0.0  ;;  %v1469_v49 = vmax.f32 %v1461_v29, 0.0  ;;  %v1471_v20 = vmax.f32 %v1463_v26, 0.0 }
 0x66c   :  { %v1846_v46 = vadd.f32 %v1842_v4, %v1815_v19  ;;  %v1876_v11 = vadd.f32 %v1872_v14, %v1845_v44  ;;  %v3851_v4 = vld [vmem:[#allocation16_spill] sm:$0xff]  ;;  %v3852_v19 = vld [vmem:[#allocation18_spill] sm:$0xff] }
 0x66d   :  { %v1472_v31 = vpack.c.bf16 %v1465_v15, %v1464_v58  ;;  %v1473_v42 = vpack.c.bf16 %v1467_v57, %v1466_v33  ;;  %v1474_v43 = vpack.c.bf16 %v1469_v49, %v1468_v51  ;;  %v1475_v27 = vpack.c.bf16 %v1471_v20, %v1470_v35  ;;  %v3853_v14 = vld [vmem:[#allocation20_spill] sm:$0xff]  ;;  %v3854_v44 = vld [vmem:[#allocation22_spill] sm:$0xff] }
 0x66e   :  { %v1871_v34 = vpop.permute.xlu1 %1870  ;;  %v1926_v52 = vpop.permute.xlu0 %1925  ;;  %v1904_v13 = vadd.f32 %v1900_v21, %v1876_v11  ;;  %v3855_v11 = vld [vmem:[#allocation17_spill] sm:$0xff] }
 0x66f   :  { %1476 = vst [vmem:[%s3715_s7] sm:$0xff] %v1472_v31  ;;  %v1873_v60 = vsel %vm270_vm4, %v1869_v0, %v1871_v34  ;;  %v1931_v10 = vsel %vm3845_vm1, %v1926_v52, %v1928_v53  ;;  %vm3847_vm4 = vcmask 785408   ;;  %v2016_v7 = vpop.permute.xlu2 %2015  ;;  %v3857_v21 = vld [vmem:[#allocation21_spill] sm:$0xff] }
 0x670   :  { %1477 = vst [vmem:[%s3715_s7 + $0x8] sm:$0xff] %v1473_v42  ;;  %v1877_v6 = vadd.f32 %v1873_v60, %v1846_v46  ;;  %vm3848_vm9 = vmmov %vm3847_vm4  ;;  %v1935_v30 = vadd.f32 %v1931_v10, %v1904_v13  ;;  %v3858_v10 = vld [vmem:[#allocation23_spill] sm:$0xff] }
 0x671   :  { %1478 = vst [vmem:[%s3715_s7 + $0x10] sm:$0xff] %v1474_v43 }
 0x672   :  { %1479 = vst [vmem:[%s3715_s7 + $0x18] sm:$0xff] %v1475_v27  ;;  %v1905_v54 = vadd.f32 %v1901_v59, %v1877_v6 }
 0x676   :  { %v1930_v3 = vpop.permute.xlu1 %1929  ;;  %v1957_v25 = vpop.permute.xlu0 %1956 }
 0x677   :  { %v1932_v1 = vsel %vm3846_vm2, %v1928_v53, %v1930_v3  ;;  %v1962_v9 = vsel %vm3847_vm4, %v1957_v25, %v1959_v28 }
 0x678   :  { %v1936_v55 = vadd.f32 %v1932_v1, %v1905_v54  ;;  %v1966_v24 = vadd.f32 %v1962_v9, %v1935_v30 }
 0x67a   :  { %v1994_v16 = vadd.f32 %v1990_v48, %v1966_v24 }
 0x67e   :  { %v1961_v18 = vpop.permute.xlu1 %1960  ;;  %v2020_v63 = vpop.permute.xlu0 %2019 }
 0x67f   :  { %v1963_v17 = vsel %vm3848_vm9, %v1959_v28, %v1961_v18  ;;  %v3856_v28 = vld [vmem:[#allocation19_spill] sm:$0xff] }
 0x680   :  { %v1967_v12 = vadd.f32 %v1963_v17, %v1936_v55 }
 0x682   :  { %v1995_v8 = vadd.f32 %v1991_v41, %v1967_v12 }
 0x686   :  { %v2018_v22 = vpop.permute.xlu1 %2017 }
 0x687   :  { %v2021_v38 = vsel %vm3850_vm10, %v2016_v7, %v2018_v22  ;;  %v2022_v2 = vsel %vm3836_vm0, %v2018_v22, %v2020_v63 }
 0x688   :  { %v2025_v56 = vadd.f32 %v2021_v38, %v1994_v16  ;;  %v2026_v61 = vadd.f32 %v2022_v2, %v1995_v8 }
 0x68a   :  { %v2170_v39 = vmul.f32 -1.442695, %v2025_v56  ;;  %v2171_v29 = vmul.f32 -1.442695, %v2026_v61 }
 0x68c   :  { %2275 = vpow2.f32 %v2170_v39 }
 0x68d   :  { %2277 = vpow2.f32 %v2171_v29 }
 0x692   :  { %v2276_v45 = vpop.eup %2275 }
 0x693   :  { %v2278_v32 = vpop.eup %2277  ;;  %v2033_v26 = vadd.f32 1.0, %v2276_v45 }
 0x694   :  { %v2034_v58 = vadd.f32 1.0, %v2278_v32 }
 0x695   :  { %2279 = vrcp.f32 %v2033_v26  ;;  %v2046_v15 = vand.u32 2147483648, %v2033_v26  ;;  %v2044_v20 = vand.u32 2147483647, %v2033_v26  ;;  %vm2040_vm14 = vweird.f32 %v2033_v26 }
 0x696   :  { %2281 = vrcp.f32 %v2034_v58  ;;  %v2061_v40 = vand.u32 2147483648, %v2034_v58  ;;  %v2059_v31 = vand.u32 2147483647, %v2034_v58  ;;  %vm2055_vm6 = vweird.f32 %v2034_v58 }
 0x697   :  { %v2047_v43 = vor.u32 1.1754944e-38, %v2046_v15  ;;  %vm2045_vm7 = vcmp.eq.f32.partialorder %v2044_v20, 8.507059e+37 }
 0x698   :  { %v2062_v34 = vor.u32 1.1754944e-38, %v2061_v40  ;;  %vm2060_vm3 = vcmp.eq.f32.partialorder %v2059_v31, 8.507059e+37 }
 0x69b   :  { %v2280_v37 = vpop.eup %2279 }
 0x69c   :  { %v2282_v23 = vpop.eup %2281  ;;  %v2036_v33 = vmul.f32 %v2280_v37, %v2033_v26  ;;  %vm2041_vm15 = vweird.f32 %v2280_v37 }
 0x69d   :  { %v2051_v51 = vmul.f32 %v2282_v23, %v2034_v58  ;;  %vm2056_vm13 = vweird.f32 %v2282_v23  ;;  %vm2042_vm5 = vmor %vm2040_vm14, %vm2041_vm15 }
 0x69e   :  { %v2037_v35 = vsub.f32 1.0, %v2036_v33  ;;  %vm2057_vm8 = vmor %vm2055_vm6, %vm2056_vm13 }
 0x69f   :  { %v2052_v57 = vsub.f32 1.0, %v2051_v51 }
 0x6a0   :  { %v2038_v49 = vmul.f32 %v2280_v37, %v2037_v35 }
 0x6a1   :  { %v2053_v0 = vmul.f32 %v2282_v23, %v2052_v57 }
 0x6a2   :  { %v2039_v42 = vadd.f32 %v2280_v37, %v2038_v49 }
 0x6a3   :  { %v2054_v27 = vadd.f32 %v2282_v23, %v2053_v0 }
 0x6a4   :  { %v2043_v36 = vsel %vm2042_vm5, %v2280_v37, %v2039_v42 }
 0x6a5   :  { %v2048_v53 = vsel %vm2045_vm7, %v2047_v43, %v2043_v36  ;;  %v2058_v52 = vsel %vm2057_vm8, %v2282_v23, %v2054_v27 }
 0x6a6   :  { %v2063_v5 = vsel %vm2060_vm3, %v2062_v34, %v2058_v52  ;;  %v2065_v50 = vperm.slane %v2048_v53, 0 }
 0x6a7   :  { %v2066_v47 = vperm.slane %v2063_v5, 0 }
 0x6a8   :  { %v2067_v62 = vmul.f32 %v2065_v50, %v3851_v4  ;;  %v2069_v3 = vmul.f32 %v2065_v50, %v3852_v19  ;;  %v2071_v60 = vmul.f32 %v2065_v50, %v3853_v14  ;;  %v2073_v46 = vmul.f32 %v2065_v50, %v3854_v44 }
 0x6a9   :  { %v2068_v6 = vmul.f32 %v2066_v47, %v3855_v11  ;;  %v2070_v25 = vmul.f32 %v2066_v47, %v3856_v28  ;;  %v2072_v59 = vmul.f32 %v2066_v47, %v3857_v21  ;;  %v2074_v1 = vmul.f32 %v2066_v47, %v3858_v10 }
 0x6aa   :  { %v2075_v13 = vmax.f32 %v2067_v62, 0.0  ;;  %v2077_v54 = vmax.f32 %v2069_v3, 0.0  ;;  %v2079_v18 = vmax.f32 %v2071_v60, 0.0  ;;  %v2081_v9 = vmax.f32 %v2073_v46, 0.0 }
 0x6ab   :  { %v2076_v17 = vmax.f32 %v2068_v6, 0.0  ;;  %v2078_v30 = vmax.f32 %v2070_v25, 0.0  ;;  %v2080_v55 = vmax.f32 %v2072_v59, 0.0  ;;  %v2082_v24 = vmax.f32 %v2074_v1, 0.0 }
 0x6ad   :  { %v2083_v12 = vpack.c.bf16 %v2076_v17, %v2075_v13  ;;  %v2084_v48 = vpack.c.bf16 %v2078_v30, %v2077_v54  ;;  %v2085_v41 = vpack.c.bf16 %v2080_v55, %v2079_v18  ;;  %v2086_v7 = vpack.c.bf16 %v2082_v24, %v2081_v9 }
 0x6af   :  { %2172 = vst [vmem:[%s3715_s7 + $0x20] sm:$0xff] %v2083_v12 }
 0x6b0   :  { %2173 = vst [vmem:[%s3715_s7 + $0x28] sm:$0xff] %v2084_v48 }
 0x6b1   :  { %2174 = vst [vmem:[%s3715_s7 + $0x30] sm:$0xff] %v2085_v41 }
 0x6b2   :  { %2175 = vst [vmem:[%s3715_s7 + $0x38] sm:$0xff] %v2086_v7 }
 0x6b3   :  { %2096 = vsyncpa [#allocation4], 1 }

</bundles_post_ra>
